<compile_context>
chip_gen: v7x
topology: tpu7x:2x2x1
jax: 0.10.0
libtpu: 0.0.40
codegen_flags: <defaults>
</compile_context>

<pallas_src>
import functools

import numpy as np
import jax
import jax.numpy as jnp
from jax.experimental import pallas as pl
from jax.experimental.pallas import tpu as pltpu


def _build_scatter_matrices(H, W, KH, KW, stride, output_padding):
    """G[t, h*W+w, y*Wout+x] = [y == s*h + kh] * [x == s*w + kw], t = kh*KW+kw."""
    Hout = (H - 1) * stride + KH + output_padding
    Wout = (W - 1) * stride + KW + output_padding
    h = np.arange(H)
    w = np.arange(W)
    y = np.arange(Hout)
    x = np.arange(Wout)
    G = np.zeros((KH * KW, H * W, Hout * Wout), np.float32)
    for kh in range(KH):
        row_hit = (y[None, :] == stride * h[:, None] + kh).astype(np.float32)   # (H, Hout)
        for kw in range(KW):
            col_hit = (x[None, :] == stride * w[:, None] + kw).astype(np.float32)  # (W, Wout)
            g = row_hit[:, None, :, None] * col_hit[None, :, None, :]           # (H, W, Hout, Wout)
            G[kh * KW + kw] = g.reshape(H * W, Hout * Wout)
    return G, Hout, Wout


def _make_deconv_kernel(NB, Cin, Cout, KH, KW):
    T = KH * KW

    def kernel(w_ref, g_ref, x_ref, o_ref):
        # w_ref : VMEM f32[T*Cout, Cin]            (resident; row = t*Cout + o)
        # g_ref : VMEM f32[T, H*W, Hout*Wout]      (resident 0/1 scatter matrices)
        # x_ref : VMEM f32[NB, Cin, H*W]           (NB NCHW images, W,H merged)
        # o_ref : VMEM f32[NB, Cout, Hout*Wout]    (lane-dense output tiles)
        w = w_ref[...]                                       # (T*Cout, Cin)
        for i in range(NB):                                  # NB is small & static
            # Channel contraction on the MXU: z[t*Cout+o, h*W+w] = sum_c W*x.
            z = jnp.dot(w, x_ref[i], preferred_element_type=jnp.float32)  # (T*Cout, H*W)
            acc = None
            for t in range(T):
                zt = z[t * Cout:(t + 1) * Cout, :]           # (Cout, H*W), 8-row aligned
                # Fused row+column scatter for tap t (stride gaps and the
                # output_padding strip come out as zero columns of G[t]).
                p = jnp.dot(zt, g_ref[t], preferred_element_type=jnp.float32)  # (Cout, Ho*Wo)
                acc = p if acc is None else acc + p          # no zeros-init
            o_ref[i] = acc.astype(o_ref.dtype)

    return kernel


def _pick_batch_block(N, per_image_out_bytes, target_bytes=512 * 1024):
    """Images per grid step: big enough DMA, but keep >=2 steps for megacore."""
    nb = max(1, min(N, int(target_bytes // max(per_image_out_bytes, 1))))
    nb = min(nb, max(1, (N + 1) // 2))   # leave work for both TCs on v7x when N > 1
    while N % nb:                        # divisor of N -> no padding / masking
        nb -= 1
    return nb


@functools.partial(jax.jit, static_argnames=("stride", "output_padding"))
def deconv_forward(x_nchw, weight, *, stride=2, output_padding=1):
    """ConvTranspose2d(kernel=2, padding=0, bias=False) forward.

    x_nchw : (N, Cin, H, W)
    weight : (Cin, Cout, KH, KW)   (PyTorch ConvTranspose2d weight layout)
    returns: (N, Cout, (H-1)*stride + KH + output_padding,
                       (W-1)*stride + KW + output_padding)
    """
    N, Cin, H, W = x_nchw.shape
    Cin_w, Cout, KH, KW = weight.shape
    assert Cin == Cin_w
    if not (0 <= output_padding < stride):
        raise ValueError("output_padding must satisfy 0 <= output_padding < stride")

    G_np, Hout, Wout = _build_scatter_matrices(H, W, KH, KW, stride, output_padding)
    G = jnp.asarray(G_np)                                           # (T, H*W, Ho*Wo)

    # Tiny one-time weight rearrangement: (Cin,Cout,KH,KW) -> (T*Cout, Cin),
    # row index = (kh*KW + kw)*Cout + o.
    w_mat = (jnp.transpose(weight, (2, 3, 1, 0))
             .reshape(KH * KW * Cout, Cin).astype(jnp.float32))

    NB = _pick_batch_block(N, Cout * Hout * Wout * 4)
    grid = (N // NB,)

    kernel = _make_deconv_kernel(NB, Cin, Cout, KH, KW)

    # Free metadata reshape (contiguous trailing-dim merge): NCHW -> (N, Cin, H*W).
    x_flat = x_nchw.reshape(N, Cin, H * W).astype(jnp.float32)

    out_flat = pl.pallas_call(
        kernel,
        out_shape=jax.ShapeDtypeStruct((N, Cout, Hout * Wout), jnp.float32),
        grid=grid,
        in_specs=[
            # Weights: VMEM resident (constant index_map).
            pl.BlockSpec((KH * KW * Cout, Cin), lambda b: (0, 0)),
            # Scatter matrices: VMEM resident (constant index_map).
            pl.BlockSpec((KH * KW, H * W, Hout * Wout), lambda b: (0, 0, 0)),
            # NB input images per step.
            pl.BlockSpec((NB, Cin, H * W), lambda b: (b, 0, 0)),
        ],
        out_specs=pl.BlockSpec((NB, Cout, Hout * Wout), lambda b: (b, 0, 0)),
        compiler_params=pltpu.CompilerParams(
            dimension_semantics=("parallel",),
            vmem_limit_bytes=32 * 1024 * 1024,   # safe on v5e/v6e/v7x; usage ~10 MiB
        ),
    )(w_mat, G, x_flat)

    # Free metadata reshape back to NCHW.
    return out_flat.reshape(N, Cout, Hout, Wout)


def _reference(x, weight, stride, output_padding):
    """General scatter-add reference, valid for any stride (incl. stride < k)."""
    N, Cin, H, W = x.shape
    _, Cout, KH, KW = weight.shape
    Hout = (H - 1) * stride + KH + output_padding
    Wout = (W - 1) * stride + KW + output_padding
    out = jnp.zeros((N, Cout, Hout, Wout), jnp.float32)
    for kh in range(KH):
        for kw in range(KW):
            contrib = jnp.einsum("nchw,co->nohw", x, weight[:, :, kh, kw])
            out = out.at[:, :,
                         kh:kh + (H - 1) * stride + 1:stride,
                         kw:kw + (W - 1) * stride + 1:stride].add(contrib)
    return out


if __name__ == "__main__":
    key = jax.random.PRNGKey(0)
    kx, kw = jax.random.split(key)

    N, Cin, H, W = 2, 4, 16, 16
    Cout, stride, output_padding = 8, 2, 1

    x = jax.random.normal(kx, (N, Cin, H, W), dtype=jnp.float32)
    # ConvTranspose2d weight shape: (in_ch, out_ch, kH, kW)
    weight = jax.random.normal(kw, (Cin, Cout, 2, 2), dtype=jnp.float32) * 0.1

    out = deconv_forward(x, weight, stride=stride, output_padding=output_padding)
    out = jax.block_until_ready(out)

    expected_shape = (N, Cout, (H - 1) * stride + 2 + output_padding,
                      (W - 1) * stride + 2 + output_padding)
    assert out.shape == expected_shape, (out.shape, expected_shape)

    ref = _reference(x, weight, stride, output_padding)
    max_err = float(jnp.max(jnp.abs(out - ref)))
    assert max_err < 1e-4, max_err

    print("KERNEL_OK")
</pallas_src>

<mosaic_0001>
module attributes {stable_mosaic.version = 11 : i64} {
  func.func @kernel(%arg0: i32, %arg1: memref<32x4xf32, #tpu.memory_space<vmem>>, %arg2: memref<4x256x1089xf32, #tpu.memory_space<vmem>>, %arg3: memref<1x4x256xf32, #tpu.memory_space<vmem>>, %arg4: memref<1x8x1089xf32, #tpu.memory_space<vmem>>) attributes {dimension_semantics = [#tpu.dimension_semantics<parallel>], iteration_bounds = array<i64: 2>, scalar_prefetch = 0 : i64, scratch_operands = 0 : i64, tpu.core_type = #tpu.core_type<tc>, window_params = [{pipeline_mode = #tpu.pipeline_mode<synchronous>, transform_indices = @transform_0, window_bounds = array<i64: 32, 4>}, {pipeline_mode = #tpu.pipeline_mode<synchronous>, transform_indices = @transform_1, window_bounds = array<i64: 4, 256, 1089>}, {transform_indices = @transform_2, window_bounds = array<i64: 1, 4, 256>}, {transform_indices = @transform_3, window_bounds = array<i64: 1, 8, 1089>}]} {
    %c0 = arith.constant 0 : index
    %c0_0 = arith.constant 0 : index
    %0 = vector.load %arg1[%c0, %c0_0] : memref<32x4xf32, #tpu.memory_space<vmem>>, vector<32x4xf32>
    %c0_1 = arith.constant 0 : index
    %c0_2 = arith.constant 0 : index
    %c0_3 = arith.constant 0 : index
    %1 = vector.load %arg3[%c0_1, %c0_2, %c0_3] : memref<1x4x256xf32, #tpu.memory_space<vmem>>, vector<1x4x256xf32>
    %2 = vector.shape_cast %1 : vector<1x4x256xf32> to vector<4x256xf32>
    %cst = arith.constant dense<0.000000e+00> : vector<32x256xf32>
    %3 = tpu.matmul %0, %2, %cst {dimension_numbers = #tpu.dot_dimension_numbers<[1], [0], [0], [1], [0, 0, 1, 1], [], []>} : vector<32x4xf32>, vector<4x256xf32>, vector<32x256xf32> -> vector<32x256xf32>
    %4 = vector.extract_strided_slice %3 {offsets = [0, 0], sizes = [8, 256], strides = [1, 1]} : vector<32x256xf32> to vector<8x256xf32>
    %c0_4 = arith.constant 0 : index
    %c0_5 = arith.constant 0 : index
    %c0_6 = arith.constant 0 : index
    %5 = vector.load %arg2[%c0_4, %c0_5, %c0_6] : memref<4x256x1089xf32, #tpu.memory_space<vmem>>, vector<1x256x1089xf32>
    %6 = vector.shape_cast %5 : vector<1x256x1089xf32> to vector<256x1089xf32>
    %cst_7 = arith.constant dense<0.000000e+00> : vector<8x1089xf32>
    %7 = tpu.matmul %4, %6, %cst_7 {dimension_numbers = #tpu.dot_dimension_numbers<[1], [0], [0], [1], [0, 0, 1, 1], [], []>} : vector<8x256xf32>, vector<256x1089xf32>, vector<8x1089xf32> -> vector<8x1089xf32>
    %8 = vector.extract_strided_slice %3 {offsets = [8, 0], sizes = [8, 256], strides = [1, 1]} : vector<32x256xf32> to vector<8x256xf32>
    %c1 = arith.constant 1 : index
    %c0_8 = arith.constant 0 : index
    %c0_9 = arith.constant 0 : index
    %9 = vector.load %arg2[%c1, %c0_8, %c0_9] : memref<4x256x1089xf32, #tpu.memory_space<vmem>>, vector<1x256x1089xf32>
    %10 = vector.shape_cast %9 : vector<1x256x1089xf32> to vector<256x1089xf32>
    %cst_10 = arith.constant dense<0.000000e+00> : vector<8x1089xf32>
    %11 = tpu.matmul %8, %10, %cst_10 {dimension_numbers = #tpu.dot_dimension_numbers<[1], [0], [0], [1], [0, 0, 1, 1], [], []>} : vector<8x256xf32>, vector<256x1089xf32>, vector<8x1089xf32> -> vector<8x1089xf32>
    %12 = arith.addf %7, %11 : vector<8x1089xf32>
    %13 = vector.extract_strided_slice %3 {offsets = [16, 0], sizes = [8, 256], strides = [1, 1]} : vector<32x256xf32> to vector<8x256xf32>
    %c2 = arith.constant 2 : index
    %c0_11 = arith.constant 0 : index
    %c0_12 = arith.constant 0 : index
    %14 = vector.load %arg2[%c2, %c0_11, %c0_12] : memref<4x256x1089xf32, #tpu.memory_space<vmem>>, vector<1x256x1089xf32>
    %15 = vector.shape_cast %14 : vector<1x256x1089xf32> to vector<256x1089xf32>
    %cst_13 = arith.constant dense<0.000000e+00> : vector<8x1089xf32>
    %16 = tpu.matmul %13, %15, %cst_13 {dimension_numbers = #tpu.dot_dimension_numbers<[1], [0], [0], [1], [0, 0, 1, 1], [], []>} : vector<8x256xf32>, vector<256x1089xf32>, vector<8x1089xf32> -> vector<8x1089xf32>
    %17 = arith.addf %12, %16 : vector<8x1089xf32>
    %18 = vector.extract_strided_slice %3 {offsets = [24, 0], sizes = [8, 256], strides = [1, 1]} : vector<32x256xf32> to vector<8x256xf32>
    %c3 = arith.constant 3 : index
    %c0_14 = arith.constant 0 : index
    %c0_15 = arith.constant 0 : index
    %19 = vector.load %arg2[%c3, %c0_14, %c0_15] : memref<4x256x1089xf32, #tpu.memory_space<vmem>>, vector<1x256x1089xf32>
    %20 = vector.shape_cast %19 : vector<1x256x1089xf32> to vector<256x1089xf32>
    %cst_16 = arith.constant dense<0.000000e+00> : vector<8x1089xf32>
    %21 = tpu.matmul %18, %20, %cst_16 {dimension_numbers = #tpu.dot_dimension_numbers<[1], [0], [0], [1], [0, 0, 1, 1], [], []>} : vector<8x256xf32>, vector<256x1089xf32>, vector<8x1089xf32> -> vector<8x1089xf32>
    %22 = arith.addf %17, %21 : vector<8x1089xf32>
    %c0_17 = arith.constant 0 : index
    %c0_18 = arith.constant 0 : index
    %c0_19 = arith.constant 0 : index
    %23 = vector.load %arg4[%c0_17, %c0_18, %c0_19] : memref<1x8x1089xf32, #tpu.memory_space<vmem>>, vector<1x8x1089xf32>
    %24 = vector.shape_cast %23 : vector<1x8x1089xf32> to vector<8x1089xf32>
    %25 = vector.shape_cast %22 : vector<8x1089xf32> to vector<1x8x1089xf32>
    tpu.vector_store %arg4[%c0_17, %c0_18, %c0_19], %25 {strides = array<i32>} : memref<1x8x1089xf32, #tpu.memory_space<vmem>>, vector<1x8x1089xf32>,
    return
  }
  func.func @transform_0(%arg0: i32) -> (i32, i32) {
    %c0_i32 = arith.constant 0 : i32
    %c0_i32_0 = arith.constant 0 : i32
    %c0_i32_1 = arith.constant 0 : i32
    return %c0_i32, %c0_i32_0 : i32, i32
  }
  func.func @transform_1(%arg0: i32) -> (i32, i32, i32) {
    %c0_i32 = arith.constant 0 : i32
    %c0_i32_0 = arith.constant 0 : i32
    %c0_i32_1 = arith.constant 0 : i32
    %c0_i32_2 = arith.constant 0 : i32
    return %c0_i32, %c0_i32_0, %c0_i32_1 : i32, i32, i32
  }
  func.func @transform_2(%arg0: i32) -> (i32, i32, i32) {
    %c0_i32 = arith.constant 0 : i32
    %c0_i32_0 = arith.constant 0 : i32
    %c0_i32_1 = arith.constant 0 : i32
    return %arg0, %c0_i32, %c0_i32_0 : i32, i32, i32
  }
  func.func @transform_3(%arg0: i32) -> (i32, i32, i32) {
    %c0_i32 = arith.constant 0 : i32
    %c0_i32_0 = arith.constant 0 : i32
    %c0_i32_1 = arith.constant 0 : i32
    return %arg0, %c0_i32, %c0_i32_0 : i32, i32, i32
  }
}

</mosaic_0001>

<bundles_post_ra>
// kernel: deconv_forward.1
= control target key start
LH: loop header
LB: loop body
LE: loop exit
PB: predicated region body
PF: predicated region fallthrough
CT: control target
= control target key end

     0   :  { %8 = vsyncpa [#allocation3], 0  ;;  %s4389_s12 = smov 0   ;;  %s4533_s0 = inlined_call_operand.vmem [shape: f32[32,4], index: 0, kind: input, shape index: {}]   ;;  %s4534_s1 = inlined_call_operand.hbm [shape: f32[4,256,1089], index: 1, kind: input, shape index: {}]   ;;  %s4535_s2 = inlined_call_operand.vmem [shape: f32[2,4,256], index: 2, kind: input, shape index: {}]   ;;  %s4536_s3 = inlined_call_operand.vmem [shape: f32[2,8,1089], index: 3, kind: output, shape index: {}]  }
   0x1 LB: > { %s4395_s13 = sadd.s32 4294967295, %s4363_s12   ;;  %p2968_p0 = scmp.ge.s32.totalorder %s4363_s12, 1  ;;  %s4363_s12 = sphi %s4389_s12, %s14_s12  }
   0x2   : > { %p113_p1 = scmp.lt.s32.totalorder %s4363_s12, 3  ;;  %s4365_s14 = smov [#allocation2]  }
   0x3   : > { %s128_s15 = sshll.u32 %s4365_s14, 4  ;;  %p4537_p3 = scmp.eq.s32.totalorder %s4395_s13, 0  ;;  %s129_s15 = int_to_ptr.vmem [resolvable:$true] %s128_s15 }
   0x4   : > { %p4399_p2 = pnand %p2968_p0, %p113_p1  ;;  %s4325_s20 = scalar_lea.hbm %s4534_s1, 147456 }
   0x5   : > { %p4326_p6 = scmp.ne.s32.totalorder %s4534_s1, %s4325_s20  ;;  %p4332_p10 = scmp.lt.u32.totalorder %s4325_s20, %s4534_s1 }
   0x6   : > { %s4539_s16 = scalar_select %p4399_p2, 1, 0 }
   0x7   : > { %p4306_p4 = pneg %p4399_p2 }
   0x9   : > { %p4408_p5 = pnand %p4537_p3, %p4306_p4 }
   0xb   : > { %p4327_p7 = pneg %p4408_p5 }
   0xd   : > { %p4328_p8 = pnand %p4327_p7, %p4326_p6 }
   0xf   : > { %p4329_p9 = pneg %p4328_p8 }
  0x11   : > { %p4334_p11 = pnand %p4332_p10, %p4329_p9 }
  0x13   : > { %4337 = shalt.err (!%p4334_p11)
}
  0x14   : > { %s4338_s25 = scalar_lea.vmem %s129_s15, 147456  ;;  %p4346_p1 = scmp.lt.s32.totalorder %s129_s15, %s129_s15 }
  0x15   : > { %p4339_p12 = scmp.ne.s32.totalorder %s129_s15, %s4338_s25  ;;  %p4347_p4 = scmp.lt.s32.totalorder %s4338_s25, %s4338_s25 }
  0x17   : > { %p4341_p13 = pnand %p4339_p12, %p4327_p7  ;;  %p4348_p3 = por %p4347_p4, %p4346_p1 }
  0x19   : > { %p4342_p0 = pneg %p4341_p13 }
  0x1b   : > { %p4349_p2 = pnand %p4348_p3, %p4342_p0 }
  0x1d   : > { %4352 = shalt.err (!%p4349_p2)
}
  0x1e   : > { %s4366_s26 = smov 1152   ;;  %s4367_s27 = smov 72  }
  0x1f   : > { %4309 = dma.hbm_to_vmem [thread:$0]  (!%p4408_p5), %s4534_s1, 147456, %s129_s15, [#allocation3], %s4366_s26, %s4366_s26, %s4367_s27  }
  0x20   : > { %p4541_p6 = scmp.ne.s32.totalorder %s4539_s16, 0 }
  0x21   : > { %p4542_p8 = scmp.eq.s32.totalorder (!%p4541_p6), %s4395_s13, 0 }
  0x22   : > { %152 = sbr.rel (%p4541_p6) target bundleno = 1001 (0x3e9), region = 32 }
  0x29   : > { %4358 = dma.done.wait (%p4542_p8), [#allocation3], 147456   ;;  %p4543_p7 = pmov %p4542_p8 }
  0x2a   : > { %p176_p2 = scmp.lt.s32.totalorder %s4395_s13, 1  ;;  %v4368_v0 = vmov 0.0   ;;  %vm206_vm0 = vcmask 1043456   ;;  %v186_v2 = vld [vmem:[%s4533_s0] sm:$0xff]  ;;  %v590_v4 = vld [vmem:[#allocation2 + $0x908] sm:$0xff]  ;;  %v599_v5 = vld [vmem:[#allocation2 + $0x950] sm:$0xff] }
  0x2b   : > { %4360 = vsyncadd (%p4543_p7), [#allocation3], 4294819840  ;;  %275 = vmatprep.mubr.f32.mxu0 %v4368_v0  ;;  %v592_v6 = vld [vmem:[#allocation2 + $0x918] sm:$0xff]  ;;  %vm193_vm1 = vcmask 31744   ;;  %v3125_v7 = vpack.c.bf16 %v599_v5, %v590_v4  ;;  %v601_v8 = vld [vmem:[#allocation2 + $0x960] sm:$0xff]  ;;  %vm2897_vm2 = vcmask 531456  }
  0x2c   : > { %s4545_s13 = smov (!%p176_p2, %s4395_s13), 1  ;;  %v589_v9 = vld [vmem:[#allocation2 + $0x900] sm:$0xff]  ;;  %v598_v10 = vld [vmem:[#allocation2 + $0x948] sm:$0xff]  ;;  %v3189_v11 = vpack.c.bf16 %v601_v8, %v592_v6  ;;  %v591_v13 = vld [vmem:[#allocation2 + $0x910] sm:$0xff] }
  0x2d   : > { %s2984_s30 = sshll.u32 %s4545_s13, 3  ;;  %v3127_v12 = vpack.c.bf16 %v598_v10, %v589_v9  ;;  %v600_v14 = vld [vmem:[#allocation2 + $0x958] sm:$0xff]  ;;  %v187_v16 = vld [vmem:[%s4533_s0 + $0x8] sm:$0xff]  ;;  %3126 = vmatprep.subr.bf16.mxu1 %v3125_v7  ;;  %v617_v18 = vld [vmem:[#allocation2 + $0x9e0] sm:$0xff]  ;;  %s4301_s17 = smul.u32 72, %s4545_s13 }
  0x2e   : > { %s180_s6 = scalar_lea.vmem %s4535_s2, %s2984_s30  ;;  %v608_v15 = vld [vmem:[#allocation2 + $0x998] sm:$0xff]  ;;  %v3191_v17 = vpack.c.bf16 %v600_v14, %v591_v13  ;;  %v610_v19 = vld [vmem:[#allocation2 + $0x9a8] sm:$0xff]  ;;  %v619_v20 = vld [vmem:[#allocation2 + $0x9f0] sm:$0xff] }
  0x2f   : > { %v190_v1 = vld [vmem:[%s180_s6] sm:$0xff]  ;;  %v3129_v21 = vpack.c.bf16 %v617_v18, %v608_v15  ;;  %v3193_v22 = vpack.c.bf16 %v619_v20, %v610_v19  ;;  %v607_v23 = vld [vmem:[#allocation2 + $0x990] sm:$0xff]  ;;  %v616_v24 = vld [vmem:[#allocation2 + $0x9d8] sm:$0xff]  ;;  %3128 = vmatpush1.bf16.msra.mxu1 %v3127_v12  ;;  %s185_s20 = scalar_lea.vmem %s4536_s3, %s4301_s17 }
  0x30   : > { %v192_v3 = vcombine.high %v190_v1, %v190_v1  ;;  %v609_v25 = vld [vmem:[#allocation2 + $0x9a0] sm:$0xff]  ;;  %v3131_v26 = vpack.c.bf16 %v616_v24, %v607_v23  ;;  %v618_v27 = vld [vmem:[#allocation2 + $0x9e8] sm:$0xff]  ;;  %v635_v29 = vld [vmem:[#allocation2 + $0xa70] sm:$0xff] }
  0x31   : > { %v626_v28 = vld [vmem:[#allocation2 + $0xa28] sm:$0xff]  ;;  %3130 = vmatprep.subr.bf16.mxu1 %v3129_v21  ;;  %v3195_v30 = vpack.c.bf16 %v618_v27, %v609_v25  ;;  %v628_v32 = vld [vmem:[#allocation2 + $0xa38] sm:$0xff]  ;;  %v637_v33 = vld [vmem:[#allocation2 + $0xa80] sm:$0xff] }
  0x32   : > { %2976 = vmatprep.subr.msk.mxu0 %vm206_vm0, %v192_v3  ;;  %v3133_v31 = vpack.c.bf16 %v635_v29, %v626_v28  ;;  %v625_v34 = vld [vmem:[#allocation2 + $0xa20] sm:$0xff]  ;;  %v3197_v35 = vpack.c.bf16 %v637_v33, %v628_v32  ;;  %v634_v36 = vld [vmem:[#allocation2 + $0xa68] sm:$0xff]  ;;  %v627_v37 = vld [vmem:[#allocation2 + $0xa30] sm:$0xff] }
  0x33   : > { %2977 = vmatpush1.msk.msra.mxu0 %vm206_vm0, %v190_v1  ;;  %v636_v38 = vld [vmem:[#allocation2 + $0xa78] sm:$0xff]  ;;  %v653_v40 = vld [vmem:[#allocation2 + $0xb00] sm:$0xff]  ;;  %v646_v41 = vld [vmem:[#allocation2 + $0xac8] sm:$0xff]  ;;  %3132 = vmatpush1.bf16.msra.mxu1 %v3131_v26  ;;  %v3135_v42 = vpack.c.bf16 %v634_v36, %v625_v34 }
  0x34   : > { %2978 = vmatmul.mubr.msk.f32.vlgmr.msra.gmra.mrb[0].mxu0 %vm193_vm1, %v186_v2  ;;  %3190 = vmatprep.subr.bf16.mxu0 %v3189_v11  ;;  %v644_v39 = vld [vmem:[#allocation2 + $0xab8] sm:$0xff]  ;;  %v655_v43 = vld [vmem:[#allocation2 + $0xb10] sm:$0xff]  ;;  %v3199_v44 = vpack.c.bf16 %v636_v38, %v627_v37  ;;  %v645_v48 = vld [vmem:[#allocation2 + $0xac0] sm:$0xff] }
  0x35   : > { %281 = vmatprep.mubr.f32.mxu0 %v4368_v0  ;;  %3192 = vmatpush1.bf16.msra.mxu0 %v3191_v17  ;;  %v3137_v45 = vpack.c.bf16 %v653_v40, %v644_v39  ;;  %v643_v46 = vld [vmem:[#allocation2 + $0xab0] sm:$0xff]  ;;  %v652_v47 = vld [vmem:[#allocation2 + $0xaf8] sm:$0xff]  ;;  %v3201_v49 = vpack.c.bf16 %v655_v43, %v646_v41  ;;  %v654_v50 = vld [vmem:[#allocation2 + $0xb08] sm:$0xff] }
  0x36   : > { %3194 = vmatprep.subr.bf16.mxu0 %v3193_v22  ;;  %3134 = vmatprep.subr.bf16.mxu1 %v3133_v31  ;;  %v662_v51 = vld [vmem:[#allocation2 + $0xb48] sm:$0xff]  ;;  %v671_v52 = vld [vmem:[#allocation2 + $0xb90] sm:$0xff]  ;;  %v664_v53 = vld [vmem:[#allocation2 + $0xb58] sm:$0xff]  ;;  %v3139_v55 = vpack.c.bf16 %v652_v47, %v643_v46  ;;  %v3203_v56 = vpack.c.bf16 %v654_v50, %v645_v48 }
  0x37   : > { %v673_v54 = vld [vmem:[#allocation2 + $0xba0] sm:$0xff]  ;;  %3136 = vmatpush1.bf16.msra.mxu1 %v3135_v42  ;;  %v3141_v57 = vpack.c.bf16 %v671_v52, %v662_v51  ;;  %v670_v59 = vld [vmem:[#allocation2 + $0xb88] sm:$0xff]  ;;  %v663_v60 = vld [vmem:[#allocation2 + $0xb50] sm:$0xff] }
  0x38   : > { %2979 = vmatmul.mubr.msk.f32.gmra.mrb[2].mxu0 %vm193_vm1, %v187_v16  ;;  %3138 = vmatprep.subr.bf16.mxu1 %v3137_v45  ;;  %v661_v58 = vld [vmem:[#allocation2 + $0xb40] sm:$0xff]  ;;  %v3205_v61 = vpack.c.bf16 %v673_v54, %v664_v53  ;;  %v672_v62 = vld [vmem:[#allocation2 + $0xb98] sm:$0xff]  ;;  %v682_v2 = vld [vmem:[#allocation2 + $0xbe8] sm:$0xff] }
  0x39   : > { %287 = vmatprep.mubr.f32.mxu0 %v4368_v0  ;;  %3196 = vmatpush1.bf16.msra.mxu0 %v3195_v30  ;;  %v680_v63 = vld [vmem:[#allocation2 + $0xbd8] sm:$0xff]  ;;  %v689_v1 = vld [vmem:[#allocation2 + $0xc20] sm:$0xff]  ;;  %v691_v3 = vld [vmem:[#allocation2 + $0xc30] sm:$0xff]  ;;  %v3143_v4 = vpack.c.bf16 %v670_v59, %v661_v58  ;;  %v3207_v5 = vpack.c.bf16 %v672_v62, %v663_v60 }
  0x3a   : > { %3198 = vmatprep.subr.bf16.mxu0 %v3197_v35  ;;  %v3145_v6 = vpack.c.bf16 %v689_v1, %v680_v63  ;;  %v679_v7 = vld [vmem:[#allocation2 + $0xbd0] sm:$0xff]  ;;  %v688_v8 = vld [vmem:[#allocation2 + $0xc18] sm:$0xff]  ;;  %v681_v9 = vld [vmem:[#allocation2 + $0xbe0] sm:$0xff]  ;;  %v3209_v10 = vpack.c.bf16 %v691_v3, %v682_v2 }
  0x3b   : > { %3140 = vmatpush1.bf16.msra.mxu1 %v3139_v55  ;;  %v690_v11 = vld [vmem:[#allocation2 + $0xc28] sm:$0xff]  ;;  %v707_v13 = vld [vmem:[#allocation2 + $0xcb0] sm:$0xff]  ;;  %v700_v14 = vld [vmem:[#allocation2 + $0xc78] sm:$0xff]  ;;  %v3147_v16 = vpack.c.bf16 %v688_v8, %v679_v7 }
  0x3c   : > { %3142 = vmatprep.subr.bf16.mxu1 %v3141_v57  ;;  %v698_v12 = vld [vmem:[#allocation2 + $0xc68] sm:$0xff]  ;;  %v709_v15 = vld [vmem:[#allocation2 + $0xcc0] sm:$0xff]  ;;  %v3211_v17 = vpack.c.bf16 %v690_v11, %v681_v9  ;;  %v699_v21 = vld [vmem:[#allocation2 + $0xc70] sm:$0xff] }
  0x3d   : > { %3200 = vmatpush1.bf16.msra.mxu0 %v3199_v44  ;;  %v3149_v18 = vpack.c.bf16 %v707_v13, %v698_v12  ;;  %v697_v19 = vld [vmem:[#allocation2 + $0xc60] sm:$0xff]  ;;  %v706_v20 = vld [vmem:[#allocation2 + $0xca8] sm:$0xff]  ;;  %v3213_v22 = vpack.c.bf16 %v709_v15, %v700_v14  ;;  %v708_v23 = vld [vmem:[#allocation2 + $0xcb8] sm:$0xff] }
  0x3e   : > { %3202 = vmatprep.subr.bf16.mxu0 %v3201_v49  ;;  %v716_v24 = vld [vmem:[#allocation2 + $0xcf8] sm:$0xff]  ;;  %v725_v25 = vld [vmem:[#allocation2 + $0xd40] sm:$0xff]  ;;  %v718_v26 = vld [vmem:[#allocation2 + $0xd08] sm:$0xff]  ;;  %v3151_v28 = vpack.c.bf16 %v706_v20, %v697_v19  ;;  %v3215_v29 = vpack.c.bf16 %v708_v23, %v699_v21 }
  0x3f   : > { %3144 = vmatpush1.bf16.msra.mxu1 %v3143_v4  ;;  %v727_v27 = vld [vmem:[#allocation2 + $0xd50] sm:$0xff]  ;;  %v3153_v30 = vpack.c.bf16 %v725_v25, %v716_v24  ;;  %v724_v32 = vld [vmem:[#allocation2 + $0xd38] sm:$0xff]  ;;  %v717_v33 = vld [vmem:[#allocation2 + $0xd00] sm:$0xff] }
  0x40   : > { %3146 = vmatprep.subr.bf16.mxu1 %v3145_v6  ;;  %v715_v31 = vld [vmem:[#allocation2 + $0xcf0] sm:$0xff]  ;;  %v3217_v34 = vpack.c.bf16 %v727_v27, %v718_v26  ;;  %v726_v35 = vld [vmem:[#allocation2 + $0xd48] sm:$0xff]  ;;  %v736_v38 = vld [vmem:[#allocation2 + $0xd98] sm:$0xff] }
  0x41   : > { %3204 = vmatpush1.bf16.msra.mxu0 %v3203_v56  ;;  %v734_v36 = vld [vmem:[#allocation2 + $0xd88] sm:$0xff]  ;;  %v743_v37 = vld [vmem:[#allocation2 + $0xdd0] sm:$0xff]  ;;  %v745_v39 = vld [vmem:[#allocation2 + $0xde0] sm:$0xff]  ;;  %v3155_v40 = vpack.c.bf16 %v724_v32, %v715_v31  ;;  %v3219_v41 = vpack.c.bf16 %v726_v35, %v717_v33 }
  0x42   : > { %3206 = vmatprep.subr.bf16.mxu0 %v3205_v61  ;;  %v3157_v42 = vpack.c.bf16 %v743_v37, %v734_v36  ;;  %v733_v43 = vld [vmem:[#allocation2 + $0xd80] sm:$0xff]  ;;  %v742_v44 = vld [vmem:[#allocation2 + $0xdc8] sm:$0xff]  ;;  %v735_v45 = vld [vmem:[#allocation2 + $0xd90] sm:$0xff]  ;;  %v3221_v46 = vpack.c.bf16 %v745_v39, %v736_v38 }
  0x43   : > { %3148 = vmatpush1.bf16.msra.mxu1 %v3147_v16  ;;  %v744_v47 = vld [vmem:[#allocation2 + $0xdd8] sm:$0xff]  ;;  %v761_v49 = vld [vmem:[#allocation2 + $0xe60] sm:$0xff]  ;;  %v754_v50 = vld [vmem:[#allocation2 + $0xe28] sm:$0xff]  ;;  %v3159_v52 = vpack.c.bf16 %v742_v44, %v733_v43 }
  0x44   : > { %3150 = vmatprep.subr.bf16.mxu1 %v3149_v18  ;;  %v752_v48 = vld [vmem:[#allocation2 + $0xe18] sm:$0xff]  ;;  %v763_v51 = vld [vmem:[#allocation2 + $0xe70] sm:$0xff]  ;;  %v3223_v53 = vpack.c.bf16 %v744_v47, %v735_v45  ;;  %v753_v57 = vld [vmem:[#allocation2 + $0xe20] sm:$0xff] }
  0x45   : > { %3208 = vmatpush1.bf16.msra.mxu0 %v3207_v5  ;;  %v3161_v54 = vpack.c.bf16 %v761_v49, %v752_v48  ;;  %v751_v55 = vld [vmem:[#allocation2 + $0xe10] sm:$0xff]  ;;  %v760_v56 = vld [vmem:[#allocation2 + $0xe58] sm:$0xff]  ;;  %v3225_v58 = vpack.c.bf16 %v763_v51, %v754_v50  ;;  %v762_v59 = vld [vmem:[#allocation2 + $0xe68] sm:$0xff] }
  0x46   : > { %3210 = vmatprep.subr.bf16.mxu0 %v3209_v10  ;;  %v770_v60 = vld [vmem:[#allocation2 + $0xea8] sm:$0xff]  ;;  %v779_v61 = vld [vmem:[#allocation2 + $0xef0] sm:$0xff]  ;;  %v772_v62 = vld [vmem:[#allocation2 + $0xeb8] sm:$0xff]  ;;  %v3163_v1 = vpack.c.bf16 %v760_v56, %v751_v55  ;;  %v3227_v3 = vpack.c.bf16 %v762_v59, %v753_v57 }
  0x47   : > { %3152 = vmatpush1.bf16.msra.mxu1 %v3151_v28  ;;  %v781_v63 = vld [vmem:[#allocation2 + $0xf00] sm:$0xff]  ;;  %v188_v2 = vld [vmem:[%s4533_s0 + $0x10] sm:$0xff]  ;;  %v3165_v4 = vpack.c.bf16 %v779_v61, %v770_v60  ;;  %v778_v6 = vld [vmem:[#allocation2 + $0xee8] sm:$0xff] }
  0x48   : > { %3154 = vmatprep.subr.bf16.mxu1 %v3153_v30  ;;  %v769_v5 = vld [vmem:[#allocation2 + $0xea0] sm:$0xff]  ;;  %v771_v7 = vld [vmem:[#allocation2 + $0xeb0] sm:$0xff]  ;;  %v3229_v8 = vpack.c.bf16 %v781_v63, %v772_v62  ;;  %v780_v9 = vld [vmem:[#allocation2 + $0xef8] sm:$0xff]  ;;  %2980 = vmatmul.mubr.msk.f32.gmra.mrb[4].mxu0 %vm193_vm1, %v188_v2 }
  0x49   : > { %3212 = vmatpush1.bf16.msra.mxu0 %v3211_v17  ;;  %v788_v10 = vld [vmem:[#allocation2 + $0xf38] sm:$0xff]  ;;  %v797_v11 = vld [vmem:[#allocation2 + $0xf80] sm:$0xff]  ;;  %v790_v12 = vld [vmem:[#allocation2 + $0xf48] sm:$0xff]  ;;  %293 = vmatprep.mubr.f32.mxu0 %v4368_v0  ;;  %v3167_v14 = vpack.c.bf16 %v778_v6, %v769_v5  ;;  %v3231_v15 = vpack.c.bf16 %v780_v9, %v771_v7 }
  0x4a   : > { %3214 = vmatprep.subr.bf16.mxu0 %v3213_v22  ;;  %v799_v13 = vld [vmem:[#allocation2 + $0xf90] sm:$0xff]  ;;  %v3169_v16 = vpack.c.bf16 %v797_v11, %v788_v10  ;;  %v796_v18 = vld [vmem:[#allocation2 + $0xf78] sm:$0xff]  ;;  %v789_v19 = vld [vmem:[#allocation2 + $0xf40] sm:$0xff] }
  0x4b   : > { %3156 = vmatpush1.bf16.msra.mxu1 %v3155_v40  ;;  %v787_v17 = vld [vmem:[#allocation2 + $0xf30] sm:$0xff]  ;;  %v3233_v20 = vpack.c.bf16 %v799_v13, %v790_v12  ;;  %v798_v21 = vld [vmem:[#allocation2 + $0xf88] sm:$0xff]  ;;  %v808_v24 = vld [vmem:[#allocation2 + $0xfd8] sm:$0xff] }
  0x4c   : > { %3158 = vmatprep.subr.bf16.mxu1 %v3157_v42  ;;  %v806_v22 = vld [vmem:[#allocation2 + $0xfc8] sm:$0xff]  ;;  %v815_v23 = vld [vmem:[#allocation2 + $0x1010] sm:$0xff]  ;;  %v817_v25 = vld [vmem:[#allocation2 + $0x1020] sm:$0xff]  ;;  %v3171_v26 = vpack.c.bf16 %v796_v18, %v787_v17  ;;  %v3235_v0 = vpack.c.bf16 %v798_v21, %v789_v19 }
  0x4d   : > { %3216 = vmatpush1.bf16.msra.mxu0 %v3215_v29  ;;  %v3173_v27 = vpack.c.bf16 %v815_v23, %v806_v22  ;;  %v805_v28 = vld [vmem:[#allocation2 + $0xfc0] sm:$0xff]  ;;  %v814_v29 = vld [vmem:[#allocation2 + $0x1008] sm:$0xff]  ;;  %v807_v30 = vld [vmem:[#allocation2 + $0xfd0] sm:$0xff]  ;;  %v3237_v31 = vpack.c.bf16 %v817_v25, %v808_v24 }
  0x4e   : > { %3218 = vmatprep.subr.bf16.mxu0 %v3217_v34  ;;  %v816_v32 = vld [vmem:[#allocation2 + $0x1018] sm:$0xff]  ;;  %v833_v34 = vld [vmem:[#allocation2 + $0x10a0] sm:$0xff]  ;;  %v826_v35 = vld [vmem:[#allocation2 + $0x1068] sm:$0xff]  ;;  %v3175_v37 = vpack.c.bf16 %v814_v29, %v805_v28 }
  0x4f   : > { %3160 = vmatpush1.bf16.msra.mxu1 %v3159_v52  ;;  %v824_v33 = vld [vmem:[#allocation2 + $0x1058] sm:$0xff]  ;;  %v835_v36 = vld [vmem:[#allocation2 + $0x10b0] sm:$0xff]  ;;  %v3239_v38 = vpack.c.bf16 %v816_v32, %v807_v30  ;;  %v825_v42 = vld [vmem:[#allocation2 + $0x1060] sm:$0xff] }
  0x50   : > { %3162 = vmatprep.subr.bf16.mxu1 %v3161_v54  ;;  %v3177_v39 = vpack.c.bf16 %v833_v34, %v824_v33  ;;  %v823_v40 = vld [vmem:[#allocation2 + $0x1050] sm:$0xff]  ;;  %v3241_v43 = vpack.c.bf16 %v835_v36, %v826_v35  ;;  %v834_v44 = vld [vmem:[#allocation2 + $0x10a8] sm:$0xff]  ;;  %v844_v47 = vld [vmem:[#allocation2 + $0x10f8] sm:$0xff] }
  0x51   : > { %3220 = vmatpush1.bf16.msra.mxu0 %v3219_v41  ;;  %v832_v41 = vld [vmem:[#allocation2 + $0x1098] sm:$0xff]  ;;  %v842_v45 = vld [vmem:[#allocation2 + $0x10e8] sm:$0xff]  ;;  %v853_v48 = vld [vmem:[#allocation2 + $0x1140] sm:$0xff]  ;;  %v3243_v50 = vpack.c.bf16 %v834_v44, %v825_v42 }
  0x52   : > { %3222 = vmatprep.subr.bf16.mxu0 %v3221_v46  ;;  %v851_v46 = vld [vmem:[#allocation2 + $0x1130] sm:$0xff]  ;;  %v3179_v49 = vpack.c.bf16 %v832_v41, %v823_v40  ;;  %v841_v52 = vld [vmem:[#allocation2 + $0x10e0] sm:$0xff]  ;;  %v3245_v54 = vpack.c.bf16 %v853_v48, %v844_v47  ;;  %v852_v56 = vld [vmem:[#allocation2 + $0x1138] sm:$0xff] }
  0x53   : > { %3164 = vmatpush1.bf16.msra.mxu1 %v3163_v1  ;;  %v3181_v51 = vpack.c.bf16 %v851_v46, %v842_v45  ;;  %v843_v55 = vld [vmem:[#allocation2 + $0x10f0] sm:$0xff]  ;;  %v860_v59 = vld [vmem:[#allocation2 + $0x1178] sm:$0xff]  ;;  %v869_v60 = vld [vmem:[#allocation2 + $0x11c0] sm:$0xff] }
  0x54   : > { %3166 = vmatprep.subr.bf16.mxu1 %v3165_v4  ;;  %v862_v61 = vld [vmem:[#allocation2 + $0x1188] sm:$0xff]  ;;  %v3185_v62 = vpack.c.bf16 %v869_v60, %v860_v59  ;;  %v871_v63 = vld [vmem:[#allocation2 + $0x11d0] sm:$0xff]  ;;  %v868_v2 = vld [vmem:[#allocation2 + $0x11b8] sm:$0xff] }
  0x55   : > { %3224 = vmatpush1.bf16.msra.mxu0 %v3223_v53  ;;  %v850_v53 = vld [vmem:[#allocation2 + $0x1128] sm:$0xff]  ;;  %v859_v1 = vld [vmem:[#allocation2 + $0x1170] sm:$0xff]  ;;  %v3249_v4 = vpack.c.bf16 %v871_v63, %v862_v61  ;;  %v861_v6 = vld [vmem:[#allocation2 + $0x1180] sm:$0xff] }
  0x56   : > { %3226 = vmatprep.subr.bf16.mxu0 %v3225_v58  ;;  %v3183_v57 = vpack.c.bf16 %v850_v53, %v841_v52  ;;  %v3247_v58 = vpack.c.bf16 %v852_v56, %v843_v55  ;;  %v3187_v5 = vpack.c.bf16 %v868_v2, %v859_v1  ;;  %v870_v7 = vld [vmem:[#allocation2 + $0x11c8] sm:$0xff]  ;;  %v603_v10 = vld [vmem:[#allocation2 + $0x970] sm:$0xff]  ;;  %v596_v11 = vld [vmem:[#allocation2 + $0x938] sm:$0xff] }
  0x57   : > { %3168 = vmatpush1.bf16.msra.mxu1 %v3167_v14  ;;  %v594_v9 = vld [vmem:[#allocation2 + $0x928] sm:$0xff]  ;;  %v605_v13 = vld [vmem:[#allocation2 + $0x980] sm:$0xff]  ;;  %v595_v19 = vld [vmem:[#allocation2 + $0x930] sm:$0xff] }
  0x58   : > { %3170 = vmatprep.subr.bf16.mxu1 %v3169_v16  ;;  %v3253_v12 = vpack.c.bf16 %v603_v10, %v594_v9  ;;  %v3317_v14 = vpack.c.bf16 %v605_v13, %v596_v11  ;;  %v593_v16 = vld [vmem:[#allocation2 + $0x920] sm:$0xff]  ;;  %v602_v18 = vld [vmem:[#allocation2 + $0x968] sm:$0xff]  ;;  %v612_v21 = vld [vmem:[#allocation2 + $0x9b8] sm:$0xff] }
  0x59   : > { %3228 = vmatpush1.bf16.msra.mxu0 %v3227_v3  ;;  %v189_v3 = vld [vmem:[%s4533_s0 + $0x18] sm:$0xff]  ;;  %v621_v22 = vld [vmem:[#allocation2 + $0xa00] sm:$0xff]  ;;  %v614_v23 = vld [vmem:[#allocation2 + $0x9c8] sm:$0xff] }
  0x5a   : > { %3230 = vmatprep.subr.bf16.mxu0 %v3229_v8  ;;  %2981 = vmatmul.mubr.msk.f32.gmra.mrb[6].mxu0 %vm193_vm1, %v189_v3  ;;  %v3251_v8 = vpack.c.bf16 %v870_v7, %v861_v6  ;;  %v623_v24 = vld [vmem:[#allocation2 + $0xa10] sm:$0xff]  ;;  %v620_v28 = vld [vmem:[#allocation2 + $0x9f8] sm:$0xff]  ;;  %v613_v30 = vld [vmem:[#allocation2 + $0x9c0] sm:$0xff]  ;;  %v3257_v33 = vpack.c.bf16 %v621_v22, %v612_v21 }
  0x5b   : > { %3172 = vmatpush1.bf16.msra.mxu1 %v3171_v26  ;;  %v3255_v26 = vpack.c.bf16 %v602_v18, %v593_v16  ;;  %v630_v32 = vld [vmem:[#allocation2 + $0xa48] sm:$0xff]  ;;  %v3321_v34 = vpack.c.bf16 %v623_v24, %v614_v23  ;;  %v639_v35 = vld [vmem:[#allocation2 + $0xa90] sm:$0xff]  ;;  %v632_v36 = vld [vmem:[#allocation2 + $0xa58] sm:$0xff] }
  0x5c   : > { %3174 = vmatprep.subr.bf16.mxu1 %v3173_v27  ;;  %v611_v27 = vld [vmem:[#allocation2 + $0x9b0] sm:$0xff]  ;;  %v629_v40 = vld [vmem:[#allocation2 + $0xa40] sm:$0xff]  ;;  %v638_v41 = vld [vmem:[#allocation2 + $0xa88] sm:$0xff]  ;;  %v3261_v42 = vpack.c.bf16 %v639_v35, %v630_v32 }
  0x5d   : > { %3232 = vmatpush1.bf16.msra.mxu0 %v3231_v15  ;;  %v631_v44 = vld [vmem:[#allocation2 + $0xa50] sm:$0xff]  ;;  %v640_v45 = vld [vmem:[#allocation2 + $0xa98] sm:$0xff]  ;;  %v657_v47 = vld [vmem:[#allocation2 + $0xb20] sm:$0xff] }
  0x5e   : > { %3234 = vmatprep.subr.bf16.mxu0 %v3233_v20  ;;  %v604_v20 = vld [vmem:[#allocation2 + $0x978] sm:$0xff]  ;;  %v650_v48 = vld [vmem:[#allocation2 + $0xae8] sm:$0xff]  ;;  %v647_v52 = vld [vmem:[#allocation2 + $0xad0] sm:$0xff] }
  0x5f   : > { %3176 = vmatpush1.bf16.msra.mxu1 %v3175_v37  ;;  %v641_v37 = vld [vmem:[#allocation2 + $0xaa0] sm:$0xff]  ;;  %v648_v46 = vld [vmem:[#allocation2 + $0xad8] sm:$0xff]  ;;  %v675_v59 = vld [vmem:[#allocation2 + $0xbb0] sm:$0xff] }
  0x60   : > { %3178 = vmatprep.subr.bf16.mxu1 %v3177_v39  ;;  %v656_v53 = vld [vmem:[#allocation2 + $0xb18] sm:$0xff]  ;;  %v649_v56 = vld [vmem:[#allocation2 + $0xae0] sm:$0xff]  ;;  %v674_v2 = vld [vmem:[#allocation2 + $0xba8] sm:$0xff] }
  0x61   : > { %3236 = vmatpush1.bf16.msra.mxu0 %v3235_v0  ;;  %v3319_v0 = vpack.c.bf16 %v604_v20, %v595_v19  ;;  %v668_v60 = vld [vmem:[#allocation2 + $0xb78] sm:$0xff]  ;;  %v677_v61 = vld [vmem:[#allocation2 + $0xbc0] sm:$0xff]  ;;  %v686_v9 = vld [vmem:[#allocation2 + $0xc08] sm:$0xff] }
  0x62   : > { %3238 = vmatprep.subr.bf16.mxu0 %v3237_v31  ;;  %v622_v31 = vld [vmem:[#allocation2 + $0xa08] sm:$0xff]  ;;  %v665_v1 = vld [vmem:[#allocation2 + $0xb60] sm:$0xff]  ;;  %v676_v6 = vld [vmem:[#allocation2 + $0xbb8] sm:$0xff] }
  0x63   : > { %3180 = vmatpush1.bf16.msra.mxu1 %v3179_v49  ;;  %v3323_v39 = vpack.c.bf16 %v622_v31, %v613_v30  ;;  %v659_v49 = vld [vmem:[#allocation2 + $0xb30] sm:$0xff]  ;;  %v684_v7 = vld [vmem:[#allocation2 + $0xbf8] sm:$0xff]  ;;  %v3271_v11 = vpack.c.bf16 %v674_v2, %v665_v1  ;;  %v685_v19 = vld [vmem:[#allocation2 + $0xc00] sm:$0xff] }
  0x64   : > { %3182 = vmatprep.subr.bf16.mxu1 %v3181_v51  ;;  %v3327_v51 = vpack.c.bf16 %v640_v45, %v631_v44  ;;  %v3329_v55 = vpack.c.bf16 %v659_v49, %v650_v48  ;;  %v695_v10 = vld [vmem:[#allocation2 + $0xc50] sm:$0xff]  ;;  %v694_v20 = vld [vmem:[#allocation2 + $0xc48] sm:$0xff]  ;;  %v704_v23 = vld [vmem:[#allocation2 + $0xc98] sm:$0xff] }
  0x65   : > { %3240 = vmatpush1.bf16.msra.mxu0 %v3239_v38  ;;  %v3259_v38 = vpack.c.bf16 %v620_v28, %v611_v27  ;;  %v683_v13 = vld [vmem:[#allocation2 + $0xbf0] sm:$0xff]  ;;  %v3337_v18 = vpack.c.bf16 %v695_v10, %v686_v9  ;;  %v702_v21 = vld [vmem:[#allocation2 + $0xc88] sm:$0xff]  ;;  %v713_v24 = vld [vmem:[#allocation2 + $0xce0] sm:$0xff] }
  0x66   : > { %3242 = vmatprep.subr.bf16.mxu0 %v3241_v43  ;;  %v3325_v43 = vpack.c.bf16 %v641_v37, %v632_v36  ;;  %v711_v22 = vld [vmem:[#allocation2 + $0xcd0] sm:$0xff]  ;;  %v701_v27 = vld [vmem:[#allocation2 + $0xc80] sm:$0xff]  ;;  %v710_v28 = vld [vmem:[#allocation2 + $0xcc8] sm:$0xff]  ;;  %v3341_v31 = vpack.c.bf16 %v713_v24, %v704_v23 }
  0x67   : > { %3184 = vmatpush1.bf16.msra.mxu1 %v3183_v57  ;;  %v658_v57 = vld [vmem:[#allocation2 + $0xb28] sm:$0xff]  ;;  %v3277_v30 = vpack.c.bf16 %v711_v22, %v702_v21  ;;  %v703_v32 = vld [vmem:[#allocation2 + $0xc90] sm:$0xff]  ;;  %v729_v35 = vld [vmem:[#allocation2 + $0xd60] sm:$0xff] }
  0x68   : > { %3186 = vmatprep.subr.bf16.mxu1 %v3185_v62  ;;  %v3267_v62 = vpack.c.bf16 %v656_v53, %v647_v52  ;;  %v3331_v63 = vpack.c.bf16 %v658_v57, %v649_v56  ;;  %v722_v36 = vld [vmem:[#allocation2 + $0xd28] sm:$0xff]  ;;  %v731_v37 = vld [vmem:[#allocation2 + $0xd70] sm:$0xff]  ;;  %v721_v44 = vld [vmem:[#allocation2 + $0xd20] sm:$0xff] }
  0x69   : > { %3244 = vmatpush1.bf16.msra.mxu0 %v3243_v50  ;;  %v3263_v50 = vpack.c.bf16 %v638_v41, %v629_v40  ;;  %v719_v40 = vld [vmem:[#allocation2 + $0xd10] sm:$0xff]  ;;  %v728_v41 = vld [vmem:[#allocation2 + $0xd58] sm:$0xff]  ;;  %v730_v45 = vld [vmem:[#allocation2 + $0xd68] sm:$0xff] }
  0x6a   : > { %3246 = vmatprep.subr.bf16.mxu0 %v3245_v54  ;;  %v3265_v54 = vpack.c.bf16 %v657_v47, %v648_v46  ;;  %v738_v46 = vld [vmem:[#allocation2 + $0xda8] sm:$0xff]  ;;  %v747_v47 = vld [vmem:[#allocation2 + $0xdf0] sm:$0xff]  ;;  %v740_v48 = vld [vmem:[#allocation2 + $0xdb8] sm:$0xff] }
  0x6b   : > { %3188 = vmatpush1.bf16.msra.mxu1 %v3187_v5  ;;  %v667_v5 = vld [vmem:[#allocation2 + $0xb70] sm:$0xff]  ;;  %v749_v49 = vld [vmem:[#allocation2 + $0xe00] sm:$0xff]  ;;  %v746_v53 = vld [vmem:[#allocation2 + $0xde8] sm:$0xff] }
  0x6c   : > { %3254 = vmatprep.subr.bf16.mxu1 %v3253_v12  ;;  %v3335_v12 = vpack.c.bf16 %v676_v6, %v667_v5  ;;  %v737_v52 = vld [vmem:[#allocation2 + $0xda0] sm:$0xff]  ;;  %v739_v56 = vld [vmem:[#allocation2 + $0xdb0] sm:$0xff]  ;;  %v748_v57 = vld [vmem:[#allocation2 + $0xdf8] sm:$0xff] }
  0x6d   : > { %3248 = vmatpush1.bf16.msra.mxu0 %v3247_v58  ;;  %v666_v58 = vld [vmem:[#allocation2 + $0xb68] sm:$0xff]  ;;  %v755_v1 = vld [vmem:[#allocation2 + $0xe30] sm:$0xff]  ;;  %v764_v2 = vld [vmem:[#allocation2 + $0xe78] sm:$0xff] }
  0x6e   : > { %3250 = vmatprep.subr.bf16.mxu0 %v3249_v4  ;;  %v3269_v3 = vpack.c.bf16 %v675_v59, %v666_v58  ;;  %v3333_v4 = vpack.c.bf16 %v677_v61, %v668_v60  ;;  %v756_v58 = vld [vmem:[#allocation2 + $0xe38] sm:$0xff]  ;;  %v765_v59 = vld [vmem:[#allocation2 + $0xe80] sm:$0xff]  ;;  %v758_v60 = vld [vmem:[#allocation2 + $0xe48] sm:$0xff] }
  0x6f   : > { %v767_v61 = vld [vmem:[#allocation2 + $0xe90] sm:$0xff]  ;;  %v757_v5 = vld [vmem:[#allocation2 + $0xe40] sm:$0xff]  ;;  %v766_v6 = vld [vmem:[#allocation2 + $0xe88] sm:$0xff] }
  0x70   : > { %v776_v9 = vld [vmem:[#allocation2 + $0xed8] sm:$0xff]  ;;  %v785_v10 = vld [vmem:[#allocation2 + $0xf20] sm:$0xff]  ;;  %v794_v23 = vld [vmem:[#allocation2 + $0xf68] sm:$0xff] }
  0x71   : > { %3252 = vmatpush1.bf16.msra.mxu0 %v3251_v8  ;;  %v693_v8 = vld [vmem:[#allocation2 + $0xc40] sm:$0xff]  ;;  %v792_v21 = vld [vmem:[#allocation2 + $0xf58] sm:$0xff]  ;;  %v803_v24 = vld [vmem:[#allocation2 + $0xfb0] sm:$0xff] }
  0x72   : > { %3318 = vmatprep.subr.bf16.mxu0 %v3317_v14  ;;  %v692_v14 = vld [vmem:[#allocation2 + $0xc38] sm:$0xff]  ;;  %v3273_v16 = vpack.c.bf16 %v693_v8, %v684_v7  ;;  %v774_v7 = vld [vmem:[#allocation2 + $0xec8] sm:$0xff]  ;;  %v783_v8 = vld [vmem:[#allocation2 + $0xf10] sm:$0xff] }
  0x73   : > { %v801_v22 = vld [vmem:[#allocation2 + $0xfa0] sm:$0xff] }
 0x107   : > { %v4464_v15 = vpop.f32.mrb[0].mxu0 }
 0x108   : > { %v4466_v17 = vpop.f32.mrb[1].mxu0 }
 0x10b   : > { %v4468_v25 = vpop.f32.mrb[2].mxu0 }
 0x10c   : > { %v4470_v29 = vpop.f32.mrb[3].mxu0 }
 0x10d   : > { %941 = vmatprep.mubr.f32.mxu1 %v4470_v29  ;;  %1012 = vmatprep.mubr.f32.mxu0 %v4470_v29 }
 0x10e   : > { %942 = vmatmul.mubr.f32.vlgmr.msra.gmra.mrb[0].mxu1 %v4468_v25  ;;  %1013 = vmatmul.mubr.f32.vlgmr.msra.gmra.mrb[8].mxu0 %v4468_v25 }
 0x10f   : > { %3256 = vmatpush1.bf16.msra.mxu1 %v3255_v26  ;;  %3320 = vmatpush1.bf16.msra.mxu0 %v3319_v0  ;;  %v3275_v26 = vpack.c.bf16 %v692_v14, %v683_v13  ;;  %v3339_v0 = vpack.c.bf16 %v694_v20, %v685_v19  ;;  %v773_v13 = vld [vmem:[#allocation2 + $0xec0] sm:$0xff]  ;;  %v782_v14 = vld [vmem:[#allocation2 + $0xf08] sm:$0xff]  ;;  %v775_v19 = vld [vmem:[#allocation2 + $0xed0] sm:$0xff] }
 0x110   : > { %1083 = vmatprep.mubr.f32.mxu1 %v4470_v29  ;;  %1154 = vmatprep.mubr.f32.mxu0 %v4470_v29  ;;  %v784_v20 = vld [vmem:[#allocation2 + $0xf18] sm:$0xff] }
 0x111   : > { %3258 = vmatprep.subr.bf16.mxu1 %v3257_v33  ;;  %3322 = vmatprep.subr.bf16.mxu0 %v3321_v34  ;;  %v712_v33 = vld [vmem:[#allocation2 + $0xcd8] sm:$0xff] }
 0x112   : > { %v720_v34 = vld [vmem:[#allocation2 + $0xd18] sm:$0xff] }
 0x113   : > { %3260 = vmatpush1.bf16.msra.mxu1 %v3259_v38  ;;  %3324 = vmatpush1.bf16.msra.mxu0 %v3323_v39  ;;  %v3279_v38 = vpack.c.bf16 %v710_v28, %v701_v27  ;;  %v3343_v39 = vpack.c.bf16 %v712_v33, %v703_v32  ;;  %v791_v27 = vld [vmem:[#allocation2 + $0xf50] sm:$0xff]  ;;  %v800_v28 = vld [vmem:[#allocation2 + $0xf98] sm:$0xff]  ;;  %v793_v32 = vld [vmem:[#allocation2 + $0xf60] sm:$0xff] }
 0x114   : > { %3262 = vmatprep.subr.bf16.mxu1 %v3261_v42  ;;  %3326 = vmatprep.subr.bf16.mxu0 %v3325_v43  ;;  %v3281_v42 = vpack.c.bf16 %v729_v35, %v720_v34  ;;  %v3345_v43 = vpack.c.bf16 %v731_v37, %v722_v36  ;;  %v802_v33 = vld [vmem:[#allocation2 + $0xfa8] sm:$0xff]  ;;  %v819_v35 = vld [vmem:[#allocation2 + $0x1030] sm:$0xff]  ;;  %v812_v36 = vld [vmem:[#allocation2 + $0xff8] sm:$0xff] }
 0x115   : > { %v810_v34 = vld [vmem:[#allocation2 + $0xfe8] sm:$0xff]  ;;  %v821_v37 = vld [vmem:[#allocation2 + $0x1040] sm:$0xff] }
 0x117   : > { %3264 = vmatpush1.bf16.msra.mxu1 %v3263_v50  ;;  %3328 = vmatpush1.bf16.msra.mxu0 %v3327_v51  ;;  %v3283_v50 = vpack.c.bf16 %v728_v41, %v719_v40  ;;  %v3347_v51 = vpack.c.bf16 %v730_v45, %v721_v44  ;;  %v809_v40 = vld [vmem:[#allocation2 + $0xfe0] sm:$0xff]  ;;  %v818_v41 = vld [vmem:[#allocation2 + $0x1028] sm:$0xff]  ;;  %v811_v44 = vld [vmem:[#allocation2 + $0xff0] sm:$0xff] }
 0x118   : > { %3266 = vmatprep.subr.bf16.mxu1 %v3265_v54  ;;  %3330 = vmatprep.subr.bf16.mxu0 %v3329_v55  ;;  %v3285_v54 = vpack.c.bf16 %v747_v47, %v738_v46  ;;  %v3349_v55 = vpack.c.bf16 %v749_v49, %v740_v48  ;;  %v820_v45 = vld [vmem:[#allocation2 + $0x1038] sm:$0xff]  ;;  %v837_v47 = vld [vmem:[#allocation2 + $0x10c0] sm:$0xff]  ;;  %v830_v48 = vld [vmem:[#allocation2 + $0x1088] sm:$0xff] }
 0x119   : > { %v828_v46 = vld [vmem:[#allocation2 + $0x1078] sm:$0xff]  ;;  %v839_v49 = vld [vmem:[#allocation2 + $0x10d0] sm:$0xff] }
 0x11b   : > { %3268 = vmatpush1.bf16.msra.mxu1 %v3267_v62  ;;  %3332 = vmatpush1.bf16.msra.mxu0 %v3331_v63  ;;  %v3287_v62 = vpack.c.bf16 %v746_v53, %v737_v52  ;;  %v3351_v63 = vpack.c.bf16 %v748_v57, %v739_v56  ;;  %v827_v52 = vld [vmem:[#allocation2 + $0x1070] sm:$0xff]  ;;  %v836_v53 = vld [vmem:[#allocation2 + $0x10b8] sm:$0xff]  ;;  %v829_v56 = vld [vmem:[#allocation2 + $0x1080] sm:$0xff] }
 0x11c   : > { %3270 = vmatprep.subr.bf16.mxu1 %v3269_v3  ;;  %3334 = vmatprep.subr.bf16.mxu0 %v3333_v4  ;;  %v3289_v3 = vpack.c.bf16 %v765_v59, %v756_v58  ;;  %v3353_v4 = vpack.c.bf16 %v767_v61, %v758_v60  ;;  %v838_v57 = vld [vmem:[#allocation2 + $0x10c8] sm:$0xff]  ;;  %v855_v59 = vld [vmem:[#allocation2 + $0x1150] sm:$0xff]  ;;  %v848_v60 = vld [vmem:[#allocation2 + $0x1118] sm:$0xff] }
 0x11d   : > { %v846_v58 = vld [vmem:[#allocation2 + $0x1108] sm:$0xff]  ;;  %v857_v61 = vld [vmem:[#allocation2 + $0x1160] sm:$0xff] }
 0x11f   : > { %3272 = vmatpush1.bf16.msra.mxu1 %v3271_v11  ;;  %3336 = vmatpush1.bf16.msra.mxu0 %v3335_v12  ;;  %v3291_v11 = vpack.c.bf16 %v764_v2, %v755_v1  ;;  %v3355_v12 = vpack.c.bf16 %v766_v6, %v757_v5  ;;  %v845_v1 = vld [vmem:[#allocation2 + $0x1100] sm:$0xff]  ;;  %v854_v2 = vld [vmem:[#allocation2 + $0x1148] sm:$0xff]  ;;  %v847_v5 = vld [vmem:[#allocation2 + $0x1110] sm:$0xff] }
 0x120   : > { %3274 = vmatprep.subr.bf16.mxu1 %v3273_v16  ;;  %3338 = vmatprep.subr.bf16.mxu0 %v3337_v18  ;;  %v3293_v16 = vpack.c.bf16 %v783_v8, %v774_v7  ;;  %v3357_v18 = vpack.c.bf16 %v785_v10, %v776_v9  ;;  %v856_v6 = vld [vmem:[#allocation2 + $0x1158] sm:$0xff]  ;;  %v873_v8 = vld [vmem:[#allocation2 + $0x11e0] sm:$0xff]  ;;  %v866_v9 = vld [vmem:[#allocation2 + $0x11a8] sm:$0xff] }
 0x121   : > { %v864_v7 = vld [vmem:[#allocation2 + $0x1198] sm:$0xff]  ;;  %v875_v10 = vld [vmem:[#allocation2 + $0x11f0] sm:$0xff] }
 0x123   : > { %3276 = vmatpush1.bf16.msra.mxu1 %v3275_v26  ;;  %3340 = vmatpush1.bf16.msra.mxu0 %v3339_v0  ;;  %v3295_v26 = vpack.c.bf16 %v782_v14, %v773_v13  ;;  %v3359_v0 = vpack.c.bf16 %v784_v20, %v775_v19  ;;  %v863_v13 = vld [vmem:[#allocation2 + $0x1190] sm:$0xff]  ;;  %v872_v14 = vld [vmem:[#allocation2 + $0x11d8] sm:$0xff]  ;;  %v865_v19 = vld [vmem:[#allocation2 + $0x11a0] sm:$0xff] }
 0x124   : > { %3278 = vmatprep.subr.bf16.mxu1 %v3277_v30  ;;  %3342 = vmatprep.subr.bf16.mxu0 %v3341_v31  ;;  %v3297_v30 = vpack.c.bf16 %v801_v22, %v792_v21  ;;  %v3361_v31 = vpack.c.bf16 %v803_v24, %v794_v23  ;;  %v874_v20 = vld [vmem:[#allocation2 + $0x11e8] sm:$0xff]  ;;  %v741_v21 = vld [vmem:[#allocation2 + $0xdc0] sm:$0xff]  ;;  %v303_v23 = vld [vmem:[#allocation2 + $0x18] sm:$0xff] }
 0x125   : > { %v750_v22 = vld [vmem:[#allocation2 + $0xe08] sm:$0xff]  ;;  %v312_v24 = vld [vmem:[#allocation2 + $0x60] sm:$0xff] }
 0x127   : > { %3280 = vmatpush1.bf16.msra.mxu1 %v3279_v38  ;;  %3344 = vmatpush1.bf16.msra.mxu0 %v3343_v39  ;;  %v3299_v38 = vpack.c.bf16 %v800_v28, %v791_v27  ;;  %v3363_v39 = vpack.c.bf16 %v802_v33, %v793_v32  ;;  %v3381_v27 = vpack.c.bf16 %v750_v22, %v741_v21  ;;  %v302_v32 = vld [vmem:[#allocation2 + $0x10] sm:$0xff]  ;;  %v311_v33 = vld [vmem:[#allocation2 + $0x58] sm:$0xff] }
 0x128   : > { %3282 = vmatprep.subr.bf16.mxu1 %v3281_v42  ;;  %3346 = vmatprep.subr.bf16.mxu0 %v3345_v43  ;;  %v3301_v42 = vpack.c.bf16 %v819_v35, %v810_v34  ;;  %v3365_v43 = vpack.c.bf16 %v821_v37, %v812_v36  ;;  %v3477_v28 = vpack.c.bf16 %v312_v24, %v303_v23  ;;  %v759_v34 = vld [vmem:[#allocation2 + $0xe50] sm:$0xff]  ;;  %v768_v35 = vld [vmem:[#allocation2 + $0xe98] sm:$0xff]  ;;  %v321_v36 = vld [vmem:[#allocation2 + $0xa8] sm:$0xff] }
 0x129   : > { %v330_v37 = vld [vmem:[#allocation2 + $0xf0] sm:$0xff]  ;;  %v840_v22 = vld [vmem:[#allocation2 + $0x10d8] sm:$0xff]  ;;  %v393_v24 = vld [vmem:[#allocation2 + $0x2e8] sm:$0xff] }
 0x12a   : > { %v831_v21 = vld [vmem:[#allocation2 + $0x1090] sm:$0xff] }
 0x12b   : > { %3284 = vmatpush1.bf16.msra.mxu1 %v3283_v50  ;;  %3348 = vmatpush1.bf16.msra.mxu0 %v3347_v51  ;;  %v3303_v50 = vpack.c.bf16 %v818_v41, %v809_v40  ;;  %v3367_v51 = vpack.c.bf16 %v820_v45, %v811_v44  ;;  %v615_v40 = vld [vmem:[#allocation2 + $0x9d0] sm:$0xff]  ;;  %v624_v41 = vld [vmem:[#allocation2 + $0xa18] sm:$0xff]  ;;  %v3481_v44 = vpack.c.bf16 %v330_v37, %v321_v36  ;;  %v329_v45 = vld [vmem:[#allocation2 + $0xe8] sm:$0xff] }
 0x12c   : > { %3286 = vmatprep.subr.bf16.mxu1 %v3285_v54  ;;  %3350 = vmatprep.subr.bf16.mxu0 %v3349_v55  ;;  %v3305_v54 = vpack.c.bf16 %v837_v47, %v828_v46  ;;  %v3369_v55 = vpack.c.bf16 %v839_v49, %v830_v48  ;;  %v777_v46 = vld [vmem:[#allocation2 + $0xee0] sm:$0xff]  ;;  %v786_v47 = vld [vmem:[#allocation2 + $0xf28] sm:$0xff]  ;;  %v339_v48 = vld [vmem:[#allocation2 + $0x138] sm:$0xff] }
 0x12d   : > { %v348_v49 = vld [vmem:[#allocation2 + $0x180] sm:$0xff]  ;;  %v858_v37 = vld [vmem:[#allocation2 + $0x1168] sm:$0xff] }
 0x12e   : > { %v849_v36 = vld [vmem:[#allocation2 + $0x1120] sm:$0xff] }
 0x12f   : > { %3288 = vmatpush1.bf16.msra.mxu1 %v3287_v62  ;;  %3352 = vmatpush1.bf16.msra.mxu0 %v3351_v63  ;;  %v3307_v62 = vpack.c.bf16 %v836_v53, %v827_v52  ;;  %v3371_v63 = vpack.c.bf16 %v838_v57, %v829_v56  ;;  %v3389_v52 = vpack.c.bf16 %v786_v47, %v777_v46  ;;  %v633_v53 = vld [vmem:[#allocation2 + $0xa60] sm:$0xff]  ;;  %v347_v57 = vld [vmem:[#allocation2 + $0x178] sm:$0xff]  ;;  %v410_v46 = vld [vmem:[#allocation2 + $0x370] sm:$0xff] }
 0x130   : > { %3290 = vmatprep.subr.bf16.mxu1 %v3289_v3  ;;  %3354 = vmatprep.subr.bf16.mxu0 %v3353_v4  ;;  %v3309_v3 = vpack.c.bf16 %v855_v59, %v846_v58  ;;  %v3373_v4 = vpack.c.bf16 %v857_v61, %v848_v60  ;;  %v3485_v56 = vpack.c.bf16 %v348_v49, %v339_v48  ;;  %v795_v58 = vld [vmem:[#allocation2 + $0xf70] sm:$0xff]  ;;  %v804_v59 = vld [vmem:[#allocation2 + $0xfb8] sm:$0xff]  ;;  %v357_v60 = vld [vmem:[#allocation2 + $0x1c8] sm:$0xff] }
 0x131   : > { %v366_v61 = vld [vmem:[#allocation2 + $0x210] sm:$0xff]  ;;  %v419_v48 = vld [vmem:[#allocation2 + $0x3b8] sm:$0xff] }
 0x132   : > { %v867_v49 = vld [vmem:[#allocation2 + $0x11b0] sm:$0xff] }
 0x133   : > { %3292 = vmatpush1.bf16.msra.mxu1 %v3291_v11  ;;  %3356 = vmatpush1.bf16.msra.mxu0 %v3355_v12  ;;  %v3311_v11 = vpack.c.bf16 %v854_v2, %v845_v1  ;;  %v3375_v12 = vpack.c.bf16 %v856_v6, %v847_v5  ;;  %v651_v1 = vld [vmem:[#allocation2 + $0xaf0] sm:$0xff]  ;;  %v660_v2 = vld [vmem:[#allocation2 + $0xb38] sm:$0xff]  ;;  %v365_v5 = vld [vmem:[#allocation2 + $0x208] sm:$0xff] }
 0x134   : > { %3294 = vmatprep.subr.bf16.mxu1 %v3293_v16  ;;  %3358 = vmatprep.subr.bf16.mxu0 %v3357_v18  ;;  %v3313_v16 = vpack.c.bf16 %v873_v8, %v864_v7  ;;  %v3377_v18 = vpack.c.bf16 %v875_v10, %v866_v9  ;;  %v813_v6 = vld [vmem:[#allocation2 + $0x1000] sm:$0xff]  ;;  %v822_v7 = vld [vmem:[#allocation2 + $0x1048] sm:$0xff]  ;;  %v375_v8 = vld [vmem:[#allocation2 + $0x258] sm:$0xff]  ;;  %v3395_v10 = vpack.c.bf16 %v660_v2, %v651_v1 }
 0x135   : > { %v384_v9 = vld [vmem:[#allocation2 + $0x2a0] sm:$0xff] }
 0x137   : > { %3296 = vmatpush1.bf16.msra.mxu1 %v3295_v26  ;;  %3360 = vmatpush1.bf16.msra.mxu0 %v3359_v0  ;;  %v3315_v26 = vpack.c.bf16 %v872_v14, %v863_v13  ;;  %v3379_v0 = vpack.c.bf16 %v874_v20, %v865_v19  ;;  %v669_v13 = vld [vmem:[#allocation2 + $0xb80] sm:$0xff]  ;;  %v678_v14 = vld [vmem:[#allocation2 + $0xbc8] sm:$0xff]  ;;  %v3493_v19 = vpack.c.bf16 %v384_v9, %v375_v8  ;;  %v383_v20 = vld [vmem:[#allocation2 + $0x298] sm:$0xff] }
 0x138   : > { %3298 = vmatprep.subr.bf16.mxu1 %v3297_v30  ;;  %3362 = vmatprep.subr.bf16.mxu0 %v3361_v31  ;;  %v597_v30 = vld [vmem:[#allocation2 + $0x940] sm:$0xff]  ;;  %v606_v31 = vld [vmem:[#allocation2 + $0x988] sm:$0xff]  ;;  %v455_v8 = vld [vmem:[#allocation2 + $0x4d8] sm:$0xff] }
 0x139   : > { %v319_v9 = vld [vmem:[#allocation2 + $0x98] sm:$0xff] }
 0x13b   : > { %3300 = vmatpush1.bf16.msra.mxu1 %v3299_v38  ;;  %3364 = vmatpush1.bf16.msra.mxu0 %v3363_v39  ;;  %v3383_v38 = vpack.c.bf16 %v606_v31, %v597_v30  ;;  %v3479_v39 = vpack.c.bf16 %v311_v33, %v302_v32  ;;  %v687_v30 = vld [vmem:[#allocation2 + $0xc10] sm:$0xff]  ;;  %v696_v31 = vld [vmem:[#allocation2 + $0xc58] sm:$0xff]  ;;  %v392_v32 = vld [vmem:[#allocation2 + $0x2e0] sm:$0xff] }
 0x13c   : > { %3302 = vmatprep.subr.bf16.mxu1 %v3301_v42  ;;  %3366 = vmatprep.subr.bf16.mxu0 %v3365_v43  ;;  %v320_v42 = vld [vmem:[#allocation2 + $0xa0] sm:$0xff]  ;;  %v3385_v43 = vpack.c.bf16 %v768_v35, %v759_v34  ;;  %v401_v35 = vld [vmem:[#allocation2 + $0x328] sm:$0xff] }
 0x13f   : > { %3304 = vmatpush1.bf16.msra.mxu1 %v3303_v50  ;;  %3368 = vmatpush1.bf16.msra.mxu0 %v3367_v51  ;;  %v3387_v50 = vpack.c.bf16 %v624_v41, %v615_v40  ;;  %v3483_v51 = vpack.c.bf16 %v329_v45, %v320_v42  ;;  %v420_v40 = vld [vmem:[#allocation2 + $0x3c0] sm:$0xff]  ;;  %v3403_v41 = vpack.c.bf16 %v696_v31, %v687_v30  ;;  %v714_v45 = vld [vmem:[#allocation2 + $0xce8] sm:$0xff] }
 0x140   : > { %3306 = vmatprep.subr.bf16.mxu1 %v3305_v54  ;;  %3370 = vmatprep.subr.bf16.mxu0 %v3369_v55  ;;  %v642_v54 = vld [vmem:[#allocation2 + $0xaa8] sm:$0xff]  ;;  %v338_v55 = vld [vmem:[#allocation2 + $0x130] sm:$0xff]  ;;  %v3499_v42 = vpack.c.bf16 %v401_v35, %v392_v32 }
 0x141   : > { %v345_v35 = vld [vmem:[#allocation2 + $0x168] sm:$0xff] }
 0x143   : > { %3308 = vmatpush1.bf16.msra.mxu1 %v3307_v62  ;;  %3372 = vmatpush1.bf16.msra.mxu0 %v3371_v63  ;;  %v3391_v62 = vpack.c.bf16 %v642_v54, %v633_v53  ;;  %v3393_v63 = vpack.c.bf16 %v804_v59, %v795_v58  ;;  %v3503_v54 = vpack.c.bf16 %v419_v48, %v410_v46  ;;  %v428_v58 = vld [vmem:[#allocation2 + $0x400] sm:$0xff]  ;;  %v354_v46 = vld [vmem:[#allocation2 + $0x1b0] sm:$0xff] }
 0x144   : > { %3310 = vmatprep.subr.bf16.mxu1 %v3309_v3  ;;  %3374 = vmatprep.subr.bf16.mxu0 %v3373_v4  ;;  %v356_v3 = vld [vmem:[#allocation2 + $0x1c0] sm:$0xff]  ;;  %v3489_v4 = vpack.c.bf16 %v366_v61, %v357_v60  ;;  %v437_v60 = vld [vmem:[#allocation2 + $0x448] sm:$0xff] }
 0x145   : > { %v301_v61 = vld [vmem:[#allocation2 + $0x8] sm:$0xff]  ;;  %v3507_v2 = vpack.c.bf16 %v437_v60, %v428_v58  ;;  %v500_v48 = vld [vmem:[#allocation2 + $0x640] sm:$0xff]  ;;  %v518_v60 = vld [vmem:[#allocation2 + $0x6d0] sm:$0xff] }
 0x146   : > { %v372_v58 = vld [vmem:[#allocation2 + $0x240] sm:$0xff] }
 0x147   : > { %3312 = vmatpush1.bf16.msra.mxu1 %v3311_v11  ;;  %3376 = vmatpush1.bf16.msra.mxu0 %v3375_v12  ;;  %v3491_v11 = vpack.c.bf16 %v365_v5, %v356_v3  ;;  %v3397_v12 = vpack.c.bf16 %v822_v7, %v813_v6  ;;  %v309_v5 = vld [vmem:[#allocation2 + $0x48] sm:$0xff]  ;;  %v446_v6 = vld [vmem:[#allocation2 + $0x490] sm:$0xff] }
 0x148   : > { %3314 = vmatprep.subr.bf16.mxu1 %v3313_v16  ;;  %3378 = vmatprep.subr.bf16.mxu0 %v3377_v18  ;;  %v374_v16 = vld [vmem:[#allocation2 + $0x250] sm:$0xff]  ;;  %v4482_v18 = vpop.f32.mrb[4].mxu0 }
 0x149   : > { %v4484_v23 = vpop.f32.mrb[5].mxu0 }
 0x14a   : > { %v4486_v33 = vpop.f32.mrb[6].mxu0 }
 0x14b   : > { %3316 = vmatpush1.bf16.msra.mxu1 %v3315_v26  ;;  %3380 = vmatpush1.bf16.msra.mxu0 %v3379_v0  ;;  %v402_v26 = vld [vmem:[#allocation2 + $0x330] sm:$0xff]  ;;  %v3399_v0 = vpack.c.bf16 %v678_v14, %v669_v13  ;;  %v3511_v14 = vpack.c.bf16 %v455_v8, %v446_v6  ;;  %v536_v8 = vld [vmem:[#allocation2 + $0x760] sm:$0xff] }
 0x14c   : > { %3382 = vmatprep.subr.bf16.mxu1 %v3381_v27  ;;  %3478 = vmatprep.subr.bf16.mxu0 %v3477_v28  ;;  %v3495_v27 = vpack.c.bf16 %v383_v20, %v374_v16  ;;  %v3401_v28 = vpack.c.bf16 %v840_v22, %v831_v21  ;;  %v3497_v34 = vpack.c.bf16 %v402_v26, %v393_v24  ;;  %v327_v20 = vld [vmem:[#allocation2 + $0xd8] sm:$0xff]  ;;  %v464_v21 = vld [vmem:[#allocation2 + $0x520] sm:$0xff]  ;;  %v473_v24 = vld [vmem:[#allocation2 + $0x568] sm:$0xff] }
 0x14d   : > { %v337_v26 = vld [vmem:[#allocation2 + $0x128] sm:$0xff]  ;;  %v3515_v31 = vpack.c.bf16 %v473_v24, %v464_v21  ;;  %v390_v6 = vld [vmem:[#allocation2 + $0x2d0] sm:$0xff]  ;;  %v408_v21 = vld [vmem:[#allocation2 + $0x360] sm:$0xff] }
 0x14e   : > { %1084 = vmatmul.mubr.f32.vlgmr.msra.gmra.mrb[2].mxu1 %v4468_v25  ;;  %1155 = vmatmul.mubr.f32.vlgmr.msra.gmra.mrb[10].mxu0 %v4468_v25  ;;  %v554_v24 = vld [vmem:[#allocation2 + $0x7f0] sm:$0xff] }
 0x14f   : > { %3384 = vmatpush3.bf16.msra.mxu1 %v3383_v38  ;;  %1225 = vmatprep.mubr.f32.mxu1 %v4470_v29  ;;  %v3487_v29 = vpack.c.bf16 %v347_v57, %v338_v55  ;;  %v4488_v38 = vpop.f32.mrb[7].mxu0  ;;  %v732_v57 = vld [vmem:[#allocation2 + $0xd78] sm:$0xff] }
 0x150   : > { %3480 = vmatpush1.bf16.msra.mxu0 %v3479_v39  ;;  %1366 = vmatprep.mubr.f32.mxu0 %v4466_v17  ;;  %v411_v39 = vld [vmem:[#allocation2 + $0x378] sm:$0xff] }
 0x151   : > { %3386 = vmatprep.subr.bf16.mxu1 %v3385_v43  ;;  %3482 = vmatprep.subr.bf16.mxu0 %v3481_v44  ;;  %v3405_v43 = vpack.c.bf16 %v858_v37, %v849_v36  ;;  %v705_v44 = vld [vmem:[#allocation2 + $0xca0] sm:$0xff]  ;;  %v3501_v47 = vpack.c.bf16 %v420_v40, %v411_v39  ;;  %v482_v36 = vld [vmem:[#allocation2 + $0x5b0] sm:$0xff]  ;;  %v491_v39 = vld [vmem:[#allocation2 + $0x5f8] sm:$0xff] }
 0x152   : > { %v3407_v53 = vpack.c.bf16 %v714_v45, %v705_v44  ;;  %v355_v40 = vld [vmem:[#allocation2 + $0x1b8] sm:$0xff]  ;;  %v3519_v44 = vpack.c.bf16 %v491_v39, %v482_v36  ;;  %v426_v36 = vld [vmem:[#allocation2 + $0x3f0] sm:$0xff]  ;;  %v572_v39 = vld [vmem:[#allocation2 + $0x880] sm:$0xff] }
 0x153   : > { %3388 = vmatpush3.bf16.msra.mxu1 %v3387_v50  ;;  %v876_v50 = vld [vmem:[#allocation2 + $0x11f8] sm:$0xff] }
 0x154   : > { %3484 = vmatpush1.bf16.msra.mxu0 %v3483_v51  ;;  %3390 = vmatprep.subr.bf16.mxu1 %v3389_v52  ;;  %v429_v51 = vld [vmem:[#allocation2 + $0x408] sm:$0xff]  ;;  %v438_v52 = vld [vmem:[#allocation2 + $0x450] sm:$0xff]  ;;  %v3409_v55 = vpack.c.bf16 %v876_v50, %v867_v49 }
 0x155   : > { %3486 = vmatprep.subr.bf16.mxu0 %v3485_v56  ;;  %v723_v56 = vld [vmem:[#allocation2 + $0xd30] sm:$0xff]  ;;  %v3505_v59 = vpack.c.bf16 %v438_v52, %v429_v51  ;;  %v509_v50 = vld [vmem:[#allocation2 + $0x688] sm:$0xff] }
 0x156   : > { %v3411_v1 = vpack.c.bf16 %v732_v57, %v723_v56  ;;  %v373_v51 = vld [vmem:[#allocation2 + $0x248] sm:$0xff]  ;;  %v382_v52 = vld [vmem:[#allocation2 + $0x290] sm:$0xff]  ;;  %v3523_v56 = vpack.c.bf16 %v509_v50, %v500_v48  ;;  %v444_v48 = vld [vmem:[#allocation2 + $0x480] sm:$0xff] }
 0x157   : > { %3392 = vmatpush3.bf16.msra.mxu1 %v3391_v62  ;;  %v310_v62 = vld [vmem:[#allocation2 + $0x50] sm:$0xff]  ;;  %v3429_v57 = vpack.c.bf16 %v382_v52, %v373_v51  ;;  %v315_v52 = vld [vmem:[#allocation2 + $0x78] sm:$0xff] }
 0x158   : > { %3488 = vmatpush1.bf16.msra.mxu0 %v3487_v29  ;;  %3394 = vmatprep.subr.bf16.mxu1 %v3393_v63  ;;  %v447_v29 = vld [vmem:[#allocation2 + $0x498] sm:$0xff]  ;;  %v456_v63 = vld [vmem:[#allocation2 + $0x4e0] sm:$0xff]  ;;  %v3413_v3 = vpack.c.bf16 %v310_v62, %v301_v61  ;;  %v306_v51 = vld [vmem:[#allocation2 + $0x30] sm:$0xff] }
 0x159   : > { %3490 = vmatprep.subr.bf16.mxu0 %v3489_v4  ;;  %v300_v4 = vld [vmem:[#allocation2] sm:$0xff]  ;;  %v3509_v7 = vpack.c.bf16 %v456_v63, %v447_v29  ;;  %v527_v62 = vld [vmem:[#allocation2 + $0x718] sm:$0xff] }
 0x15a   : > { %v3415_v13 = vpack.c.bf16 %v309_v5, %v300_v4  ;;  %v391_v29 = vld [vmem:[#allocation2 + $0x2d8] sm:$0xff]  ;;  %v400_v63 = vld [vmem:[#allocation2 + $0x320] sm:$0xff]  ;;  %v3527_v4 = vpack.c.bf16 %v527_v62, %v518_v60 }
 0x15b   : > { %3396 = vmatpush3.bf16.msra.mxu1 %v3395_v10  ;;  %v328_v10 = vld [vmem:[#allocation2 + $0xe0] sm:$0xff]  ;;  %v3433_v5 = vpack.c.bf16 %v400_v63, %v391_v29  ;;  %v471_v60 = vld [vmem:[#allocation2 + $0x558] sm:$0xff]  ;;  %v333_v63 = vld [vmem:[#allocation2 + $0x108] sm:$0xff] }
 0x15c   : > { %3492 = vmatpush1.bf16.msra.mxu0 %v3491_v11  ;;  %3398 = vmatprep.subr.bf16.mxu1 %v3397_v12  ;;  %v465_v11 = vld [vmem:[#allocation2 + $0x528] sm:$0xff]  ;;  %v474_v12 = vld [vmem:[#allocation2 + $0x570] sm:$0xff]  ;;  %v3417_v16 = vpack.c.bf16 %v328_v10, %v319_v9 }
 0x15d   : > { %3494 = vmatprep.subr.bf16.mxu0 %v3493_v19  ;;  %v318_v19 = vld [vmem:[#allocation2 + $0x90] sm:$0xff]  ;;  %v3513_v22 = vpack.c.bf16 %v474_v12, %v465_v11  ;;  %v545_v10 = vld [vmem:[#allocation2 + $0x7a8] sm:$0xff] }
 0x15e   : > { %v3419_v30 = vpack.c.bf16 %v327_v20, %v318_v19  ;;  %v409_v11 = vld [vmem:[#allocation2 + $0x368] sm:$0xff]  ;;  %v418_v12 = vld [vmem:[#allocation2 + $0x3b0] sm:$0xff]  ;;  %v3531_v19 = vpack.c.bf16 %v545_v10, %v536_v8  ;;  %v480_v8 = vld [vmem:[#allocation2 + $0x5a0] sm:$0xff] }
 0x15f   : > { %3400 = vmatpush3.bf16.msra.mxu1 %v3399_v0  ;;  %v346_v0 = vld [vmem:[#allocation2 + $0x170] sm:$0xff]  ;;  %v3437_v20 = vpack.c.bf16 %v418_v12, %v409_v11  ;;  %v351_v12 = vld [vmem:[#allocation2 + $0x198] sm:$0xff] }
 0x160   : > { %3496 = vmatpush1.bf16.msra.mxu0 %v3495_v27  ;;  %3402 = vmatprep.subr.bf16.mxu1 %v3401_v28  ;;  %v483_v27 = vld [vmem:[#allocation2 + $0x5b8] sm:$0xff]  ;;  %v492_v28 = vld [vmem:[#allocation2 + $0x600] sm:$0xff]  ;;  %v3421_v32 = vpack.c.bf16 %v346_v0, %v337_v26  ;;  %v342_v10 = vld [vmem:[#allocation2 + $0x150] sm:$0xff] }
 0x161   : > { %3498 = vmatprep.subr.bf16.mxu0 %v3497_v34  ;;  %v336_v34 = vld [vmem:[#allocation2 + $0x120] sm:$0xff]  ;;  %v3517_v37 = vpack.c.bf16 %v492_v28, %v483_v27  ;;  %v563_v0 = vld [vmem:[#allocation2 + $0x838] sm:$0xff] }
 0x162   : > { %v427_v27 = vld [vmem:[#allocation2 + $0x3f8] sm:$0xff]  ;;  %v436_v28 = vld [vmem:[#allocation2 + $0x440] sm:$0xff] }
 0x163   : > { %3404 = vmatpush3.bf16.msra.mxu1 %v3403_v41  ;;  %v364_v41 = vld [vmem:[#allocation2 + $0x200] sm:$0xff] }
 0x164   : > { %3500 = vmatpush1.bf16.msra.mxu0 %v3499_v42  ;;  %3406 = vmatprep.subr.bf16.mxu1 %v3405_v43  ;;  %v501_v42 = vld [vmem:[#allocation2 + $0x648] sm:$0xff]  ;;  %v3423_v43 = vpack.c.bf16 %v345_v35, %v336_v34  ;;  %v3425_v45 = vpack.c.bf16 %v364_v41, %v355_v40  ;;  %v3535_v34 = vpack.c.bf16 %v563_v0, %v554_v24  ;;  %v498_v24 = vld [vmem:[#allocation2 + $0x630] sm:$0xff]  ;;  %v360_v0 = vld [vmem:[#allocation2 + $0x1e0] sm:$0xff] }
 0x165   : > { %3502 = vmatprep.subr.bf16.mxu0 %v3501_v47  ;;  %v363_v47 = vld [vmem:[#allocation2 + $0x1f8] sm:$0xff]  ;;  %v3441_v35 = vpack.c.bf16 %v436_v28, %v427_v27  ;;  %v581_v41 = vld [vmem:[#allocation2 + $0x8c8] sm:$0xff] }
 0x166   : > { %v369_v28 = vld [vmem:[#allocation2 + $0x228] sm:$0xff] }
 0x167   : > { %3408 = vmatpush3.bf16.msra.mxu1 %v3407_v53  ;;  %v519_v53 = vld [vmem:[#allocation2 + $0x6d8] sm:$0xff] }
 0x168   : > { %3504 = vmatpush1.bf16.msra.mxu0 %v3503_v54  ;;  %3410 = vmatprep.subr.bf16.mxu1 %v3409_v55  ;;  %v528_v54 = vld [vmem:[#allocation2 + $0x720] sm:$0xff]  ;;  %v3427_v55 = vpack.c.bf16 %v363_v47, %v354_v46  ;;  %v3539_v46 = vpack.c.bf16 %v581_v41, %v572_v39  ;;  %v378_v41 = vld [vmem:[#allocation2 + $0x270] sm:$0xff] }
 0x169   : > { %3506 = vmatprep.subr.bf16.mxu0 %v3505_v59  ;;  %v381_v59 = vld [vmem:[#allocation2 + $0x288] sm:$0xff]  ;;  %v3525_v61 = vpack.c.bf16 %v528_v54, %v519_v53  ;;  %v463_v53 = vld [vmem:[#allocation2 + $0x518] sm:$0xff]  ;;  %v472_v54 = vld [vmem:[#allocation2 + $0x560] sm:$0xff] }
 0x16a   : > { %v3449_v62 = vpack.c.bf16 %v472_v54, %v463_v53  ;;  %v516_v39 = vld [vmem:[#allocation2 + $0x6c0] sm:$0xff]  ;;  %v405_v54 = vld [vmem:[#allocation2 + $0x348] sm:$0xff] }
 0x16b   : > { %3412 = vmatpush3.bf16.msra.mxu1 %v3411_v1  ;;  %v537_v1 = vld [vmem:[#allocation2 + $0x768] sm:$0xff] }
 0x16c   : > { %3508 = vmatpush1.bf16.msra.mxu0 %v3507_v2  ;;  %3414 = vmatprep.subr.bf16.mxu1 %v3413_v3  ;;  %v546_v2 = vld [vmem:[#allocation2 + $0x7b0] sm:$0xff]  ;;  %v3431_v3 = vpack.c.bf16 %v381_v59, %v372_v58  ;;  %v3607_v58 = vpack.c.bf16 %v315_v52, %v306_v51  ;;  %v543_v51 = vld [vmem:[#allocation2 + $0x798] sm:$0xff]  ;;  %v396_v52 = vld [vmem:[#allocation2 + $0x300] sm:$0xff] }
 0x16d   : > { %3510 = vmatprep.subr.bf16.mxu0 %v3509_v7  ;;  %v399_v7 = vld [vmem:[#allocation2 + $0x318] sm:$0xff]  ;;  %v3529_v9 = vpack.c.bf16 %v546_v2, %v537_v1  ;;  %v462_v59 = vld [vmem:[#allocation2 + $0x510] sm:$0xff]  ;;  %v481_v1 = vld [vmem:[#allocation2 + $0x5a8] sm:$0xff] }
 0x16e   : > { %1226 = vmatmul.mubr.f32.vlgmr.msra.gmra.mrb[4].mxu1 %v4468_v25  ;;  %v510_v25 = vld [vmem:[#allocation2 + $0x690] sm:$0xff] }
 0x16f   : > { %3416 = vmatpush1.bf16.msra.mxu1 %v3415_v13  ;;  %1295 = vmatprep.mubr.f32.mxu1 %v4466_v17  ;;  %v3521_v49 = vpack.c.bf16 %v510_v25, %v501_v42  ;;  %v555_v13 = vld [vmem:[#allocation2 + $0x7f8] sm:$0xff]  ;;  %v445_v42 = vld [vmem:[#allocation2 + $0x488] sm:$0xff]  ;;  %v454_v25 = vld [vmem:[#allocation2 + $0x4d0] sm:$0xff] }
 0x170   : > { %3512 = vmatpush1.bf16.msra.mxu0 %v3511_v14  ;;  %3418 = vmatprep.subr.bf16.mxu1 %v3417_v16  ;;  %v564_v14 = vld [vmem:[#allocation2 + $0x840] sm:$0xff]  ;;  %v3435_v16 = vpack.c.bf16 %v399_v7, %v390_v6  ;;  %v3445_v47 = vpack.c.bf16 %v454_v25, %v445_v42  ;;  %v490_v2 = vld [vmem:[#allocation2 + $0x5f0] sm:$0xff]  ;;  %v387_v25 = vld [vmem:[#allocation2 + $0x2b8] sm:$0xff] }
 0x171   : > { %3514 = vmatprep.subr.bf16.mxu0 %v3513_v22  ;;  %v417_v22 = vld [vmem:[#allocation2 + $0x3a8] sm:$0xff]  ;;  %v3533_v26 = vpack.c.bf16 %v564_v14, %v555_v13  ;;  %v3453_v7 = vpack.c.bf16 %v490_v2, %v481_v1  ;;  %v499_v13 = vld [vmem:[#allocation2 + $0x638] sm:$0xff]  ;;  %v508_v14 = vld [vmem:[#allocation2 + $0x680] sm:$0xff] }
 0x172   : > { %v423_v2 = vld [vmem:[#allocation2 + $0x3d8] sm:$0xff] }
 0x173   : > { %3420 = vmatpush1.bf16.msra.mxu1 %v3419_v30  ;;  %v573_v30 = vld [vmem:[#allocation2 + $0x888] sm:$0xff] }
 0x174   : > { %3516 = vmatpush1.bf16.msra.mxu0 %v3515_v31  ;;  %3422 = vmatprep.subr.bf16.mxu1 %v3421_v32  ;;  %v582_v31 = vld [vmem:[#allocation2 + $0x8d0] sm:$0xff]  ;;  %v3439_v32 = vpack.c.bf16 %v417_v22, %v408_v21  ;;  %v3615_v21 = vpack.c.bf16 %v351_v12, %v342_v10  ;;  %v3457_v22 = vpack.c.bf16 %v508_v14, %v499_v13  ;;  %v432_v12 = vld [vmem:[#allocation2 + $0x420] sm:$0xff]  ;;  %v441_v14 = vld [vmem:[#allocation2 + $0x468] sm:$0xff] }
 0x175   : > { %3518 = vmatprep.subr.bf16.mxu0 %v3517_v37  ;;  %v435_v37 = vld [vmem:[#allocation2 + $0x438] sm:$0xff]  ;;  %v3537_v40 = vpack.c.bf16 %v582_v31, %v573_v30  ;;  %v517_v30 = vld [vmem:[#allocation2 + $0x6c8] sm:$0xff]  ;;  %v526_v31 = vld [vmem:[#allocation2 + $0x710] sm:$0xff] }
 0x176   : > { %v570_v10 = vld [vmem:[#allocation2 + $0x870] sm:$0xff] }
 0x177   : > { %3424 = vmatpush1.bf16.msra.mxu1 %v3423_v43  ;;  %v307_v43 = vld [vmem:[#allocation2 + $0x38] sm:$0xff] }
 0x178   : > { %3520 = vmatpush1.bf16.msra.mxu0 %v3519_v44  ;;  %3426 = vmatprep.subr.bf16.mxu1 %v3425_v45  ;;  %v316_v44 = vld [vmem:[#allocation2 + $0x80] sm:$0xff]  ;;  %v3443_v45 = vpack.c.bf16 %v435_v37, %v426_v36  ;;  %v3619_v36 = vpack.c.bf16 %v369_v28, %v360_v0  ;;  %v3461_v37 = vpack.c.bf16 %v526_v31, %v517_v30  ;;  %v450_v28 = vld [vmem:[#allocation2 + $0x4b0] sm:$0xff]  ;;  %v459_v31 = vld [vmem:[#allocation2 + $0x4f8] sm:$0xff] }
 0x179   : > { %3522 = vmatprep.subr.bf16.mxu0 %v3521_v49  ;;  %v453_v49 = vld [vmem:[#allocation2 + $0x4c8] sm:$0xff]  ;;  %v3605_v50 = vpack.c.bf16 %v316_v44, %v307_v43  ;;  %v535_v43 = vld [vmem:[#allocation2 + $0x758] sm:$0xff]  ;;  %v544_v44 = vld [vmem:[#allocation2 + $0x7a0] sm:$0xff] }
 0x17a   : > { %v304_v0 = vld [vmem:[#allocation2 + $0x20] sm:$0xff] }
 0x17b   : > { %3428 = vmatpush1.bf16.msra.mxu1 %v3427_v55  ;;  %v325_v55 = vld [vmem:[#allocation2 + $0xc8] sm:$0xff] }
 0x17c   : > { %3524 = vmatpush1.bf16.msra.mxu0 %v3523_v56  ;;  %3430 = vmatprep.subr.bf16.mxu1 %v3429_v57  ;;  %v334_v56 = vld [vmem:[#allocation2 + $0x110] sm:$0xff]  ;;  %v3447_v57 = vpack.c.bf16 %v453_v49, %v444_v48  ;;  %v3623_v48 = vpack.c.bf16 %v387_v25, %v378_v41  ;;  %v3465_v49 = vpack.c.bf16 %v544_v44, %v535_v43  ;;  %v468_v25 = vld [vmem:[#allocation2 + $0x540] sm:$0xff]  ;;  %v477_v44 = vld [vmem:[#allocation2 + $0x588] sm:$0xff] }
 0x17d   : > { %3526 = vmatprep.subr.bf16.mxu0 %v3525_v61  ;;  %v324_v61 = vld [vmem:[#allocation2 + $0xc0] sm:$0xff]  ;;  %v3609_v29 = vpack.c.bf16 %v334_v56, %v325_v55  ;;  %v553_v55 = vld [vmem:[#allocation2 + $0x7e8] sm:$0xff]  ;;  %v562_v56 = vld [vmem:[#allocation2 + $0x830] sm:$0xff] }
 0x17e   : > { %v3611_v6 = vpack.c.bf16 %v333_v63, %v324_v61  ;;  %v3469_v61 = vpack.c.bf16 %v562_v56, %v553_v55  ;;  %v414_v63 = vld [vmem:[#allocation2 + $0x390] sm:$0xff]  ;;  %v495_v56 = vld [vmem:[#allocation2 + $0x618] sm:$0xff] }
 0x17f   : > { %3432 = vmatpush1.bf16.msra.mxu1 %v3431_v3  ;;  %v343_v3 = vld [vmem:[#allocation2 + $0x158] sm:$0xff]  ;;  %v322_v41 = vld [vmem:[#allocation2 + $0xb0] sm:$0xff] }
 0x180   : > { %3528 = vmatpush1.bf16.msra.mxu0 %v3527_v4  ;;  %3434 = vmatprep.subr.bf16.mxu1 %v3433_v5  ;;  %v352_v4 = vld [vmem:[#allocation2 + $0x1a0] sm:$0xff]  ;;  %v3451_v5 = vpack.c.bf16 %v471_v60, %v462_v59  ;;  %v3627_v60 = vpack.c.bf16 %v405_v54, %v396_v52  ;;  %v486_v54 = vld [vmem:[#allocation2 + $0x5d0] sm:$0xff] }
 0x181   : > { %3530 = vmatprep.subr.bf16.mxu0 %v3529_v9  ;;  %v489_v9 = vld [vmem:[#allocation2 + $0x5e8] sm:$0xff]  ;;  %v3613_v11 = vpack.c.bf16 %v352_v4, %v343_v3  ;;  %v571_v3 = vld [vmem:[#allocation2 + $0x878] sm:$0xff]  ;;  %v580_v4 = vld [vmem:[#allocation2 + $0x8c0] sm:$0xff] }
 0x182   : > { %v340_v52 = vld [vmem:[#allocation2 + $0x140] sm:$0xff] }
 0x183   : > { %3436 = vmatpush1.bf16.msra.mxu1 %v3435_v16  ;;  %v361_v16 = vld [vmem:[#allocation2 + $0x1e8] sm:$0xff] }
 0x184   : > { %3532 = vmatpush1.bf16.msra.mxu0 %v3531_v19  ;;  %3438 = vmatprep.subr.bf16.mxu1 %v3437_v20  ;;  %v370_v19 = vld [vmem:[#allocation2 + $0x230] sm:$0xff]  ;;  %v3455_v20 = vpack.c.bf16 %v489_v9, %v480_v8  ;;  %v3631_v8 = vpack.c.bf16 %v423_v2, %v414_v63  ;;  %v3473_v9 = vpack.c.bf16 %v580_v4, %v571_v3  ;;  %v504_v2 = vld [vmem:[#allocation2 + $0x660] sm:$0xff]  ;;  %v513_v4 = vld [vmem:[#allocation2 + $0x6a8] sm:$0xff] }
 0x185   : > { %3534 = vmatprep.subr.bf16.mxu0 %v3533_v26  ;;  %v507_v26 = vld [vmem:[#allocation2 + $0x678] sm:$0xff]  ;;  %v3617_v27 = vpack.c.bf16 %v370_v19, %v361_v16  ;;  %v305_v16 = vld [vmem:[#allocation2 + $0x28] sm:$0xff]  ;;  %v314_v19 = vld [vmem:[#allocation2 + $0x70] sm:$0xff] }
 0x186   : > { %v358_v63 = vld [vmem:[#allocation2 + $0x1d0] sm:$0xff] }
 0x187   : > { %3440 = vmatpush1.bf16.msra.mxu1 %v3439_v32  ;;  %v379_v32 = vld [vmem:[#allocation2 + $0x278] sm:$0xff] }
 0x188   : > { %3536 = vmatpush1.bf16.msra.mxu0 %v3535_v34  ;;  %3442 = vmatprep.subr.bf16.mxu1 %v3441_v35  ;;  %v388_v34 = vld [vmem:[#allocation2 + $0x2c0] sm:$0xff]  ;;  %v3459_v35 = vpack.c.bf16 %v507_v26, %v498_v24  ;;  %v3635_v24 = vpack.c.bf16 %v441_v14, %v432_v12  ;;  %v3541_v26 = vpack.c.bf16 %v314_v19, %v305_v16  ;;  %v522_v14 = vld [vmem:[#allocation2 + $0x6f0] sm:$0xff]  ;;  %v531_v19 = vld [vmem:[#allocation2 + $0x738] sm:$0xff] }
 0x189   : > { %3538 = vmatprep.subr.bf16.mxu0 %v3537_v40  ;;  %v525_v40 = vld [vmem:[#allocation2 + $0x708] sm:$0xff]  ;;  %v3621_v42 = vpack.c.bf16 %v388_v34, %v379_v32  ;;  %v323_v32 = vld [vmem:[#allocation2 + $0xb8] sm:$0xff]  ;;  %v332_v34 = vld [vmem:[#allocation2 + $0x100] sm:$0xff] }
 0x18a   : > { %v376_v12 = vld [vmem:[#allocation2 + $0x260] sm:$0xff] }
 0x18b   : > { %3444 = vmatpush1.bf16.msra.mxu1 %v3443_v45  ;;  %v397_v45 = vld [vmem:[#allocation2 + $0x308] sm:$0xff] }
 0x18c   : > { %3540 = vmatpush1.bf16.msra.mxu0 %v3539_v46  ;;  %3446 = vmatprep.subr.bf16.mxu1 %v3445_v47  ;;  %v406_v46 = vld [vmem:[#allocation2 + $0x350] sm:$0xff]  ;;  %v3463_v47 = vpack.c.bf16 %v525_v40, %v516_v39  ;;  %v3639_v39 = vpack.c.bf16 %v459_v31, %v450_v28  ;;  %v3545_v40 = vpack.c.bf16 %v332_v34, %v323_v32  ;;  %v540_v31 = vld [vmem:[#allocation2 + $0x780] sm:$0xff]  ;;  %v549_v34 = vld [vmem:[#allocation2 + $0x7c8] sm:$0xff] }
 0x18d   : > { %3606 = vmatprep.subr.bf16.mxu0 %v3605_v50  ;;  %v534_v50 = vld [vmem:[#allocation2 + $0x750] sm:$0xff]  ;;  %v3625_v53 = vpack.c.bf16 %v406_v46, %v397_v45  ;;  %v341_v45 = vld [vmem:[#allocation2 + $0x148] sm:$0xff] }
 0x18e   : > { %v3467_v59 = vpack.c.bf16 %v543_v51, %v534_v50  ;;  %v350_v46 = vld [vmem:[#allocation2 + $0x190] sm:$0xff]  ;;  %v3643_v50 = vpack.c.bf16 %v477_v44, %v468_v25  ;;  %v412_v25 = vld [vmem:[#allocation2 + $0x380] sm:$0xff] }
 0x18f   : > { %1367 = vmatmul.mubr.f32.vlgmr.msra.gmra.mrb[8].mxu0 %v4464_v15  ;;  %3448 = vmatpush1.bf16.msra.mxu1 %v3447_v57  ;;  %v415_v57 = vld [vmem:[#allocation2 + $0x398] sm:$0xff]  ;;  %v3549_v51 = vpack.c.bf16 %v350_v46, %v341_v45  ;;  %v394_v28 = vld [vmem:[#allocation2 + $0x2f0] sm:$0xff] }
 0x190   : > { %3608 = vmatpush1.bf16.msra.mxu0 %v3607_v58  ;;  %1508 = vmatprep.mubr.f32.mxu0 %v4466_v17  ;;  %v424_v58 = vld [vmem:[#allocation2 + $0x3e0] sm:$0xff]  ;;  %v558_v44 = vld [vmem:[#allocation2 + $0x810] sm:$0xff]  ;;  %v567_v46 = vld [vmem:[#allocation2 + $0x858] sm:$0xff] }
 0x191   : > { %3450 = vmatprep.subr.bf16.mxu1 %v3449_v62  ;;  %3610 = vmatprep.subr.bf16.mxu0 %v3609_v29  ;;  %v552_v62 = vld [vmem:[#allocation2 + $0x7e0] sm:$0xff]  ;;  %v561_v29 = vld [vmem:[#allocation2 + $0x828] sm:$0xff]  ;;  %v3629_v1 = vpack.c.bf16 %v424_v58, %v415_v57  ;;  %v359_v57 = vld [vmem:[#allocation2 + $0x1d8] sm:$0xff] }
 0x192   : > { %v368_v58 = vld [vmem:[#allocation2 + $0x220] sm:$0xff] }
 0x193   : > { %3452 = vmatpush1.bf16.msra.mxu1 %v3451_v5  ;;  %v433_v5 = vld [vmem:[#allocation2 + $0x428] sm:$0xff] }
 0x194   : > { %3612 = vmatpush1.bf16.msra.mxu0 %v3611_v6  ;;  %3454 = vmatprep.subr.bf16.mxu1 %v3453_v7  ;;  %v442_v6 = vld [vmem:[#allocation2 + $0x470] sm:$0xff]  ;;  %v3471_v7 = vpack.c.bf16 %v561_v29, %v552_v62  ;;  %v3647_v62 = vpack.c.bf16 %v495_v56, %v486_v54  ;;  %v3553_v29 = vpack.c.bf16 %v368_v58, %v359_v57  ;;  %v576_v56 = vld [vmem:[#allocation2 + $0x8a0] sm:$0xff]  ;;  %v585_v58 = vld [vmem:[#allocation2 + $0x8e8] sm:$0xff] }
 0x195   : > { %3614 = vmatprep.subr.bf16.mxu0 %v3613_v11  ;;  %v579_v11 = vld [vmem:[#allocation2 + $0x8b8] sm:$0xff]  ;;  %v3633_v13 = vpack.c.bf16 %v442_v6, %v433_v5  ;;  %v377_v5 = vld [vmem:[#allocation2 + $0x268] sm:$0xff]  ;;  %v386_v6 = vld [vmem:[#allocation2 + $0x2b0] sm:$0xff] }
 0x196   : > { %v430_v54 = vld [vmem:[#allocation2 + $0x410] sm:$0xff] }
 0x197   : > { %3456 = vmatpush1.bf16.msra.mxu1 %v3455_v20  ;;  %v451_v20 = vld [vmem:[#allocation2 + $0x4b8] sm:$0xff] }
 0x198   : > { %3616 = vmatpush1.bf16.msra.mxu0 %v3615_v21  ;;  %3458 = vmatprep.subr.bf16.mxu1 %v3457_v22  ;;  %v460_v21 = vld [vmem:[#allocation2 + $0x500] sm:$0xff]  ;;  %v3475_v22 = vpack.c.bf16 %v579_v11, %v570_v10  ;;  %v3651_v10 = vpack.c.bf16 %v513_v4, %v504_v2  ;;  %v3557_v11 = vpack.c.bf16 %v386_v6, %v377_v5  ;;  %v317_v6 = vld [vmem:[#allocation2 + $0x88] sm:$0xff] }
 0x199   : > { %3618 = vmatprep.subr.bf16.mxu0 %v3617_v27  ;;  %v313_v27 = vld [vmem:[#allocation2 + $0x68] sm:$0xff]  ;;  %v3637_v30 = vpack.c.bf16 %v460_v21, %v451_v20  ;;  %v395_v20 = vld [vmem:[#allocation2 + $0x2f8] sm:$0xff]  ;;  %v404_v21 = vld [vmem:[#allocation2 + $0x340] sm:$0xff] }
 0x19a   : > { %v448_v2 = vld [vmem:[#allocation2 + $0x4a0] sm:$0xff] }
 0x19b   : > { %3460 = vmatpush1.bf16.msra.mxu1 %v3459_v35  ;;  %v469_v35 = vld [vmem:[#allocation2 + $0x548] sm:$0xff]  ;;  %v308_v5 = vld [vmem:[#allocation2 + $0x40] sm:$0xff] }
 0x19c   : > { %3620 = vmatpush1.bf16.msra.mxu0 %v3619_v36  ;;  %3462 = vmatprep.subr.bf16.mxu1 %v3461_v37  ;;  %v478_v36 = vld [vmem:[#allocation2 + $0x590] sm:$0xff]  ;;  %v3543_v37 = vpack.c.bf16 %v313_v27, %v304_v0  ;;  %v3655_v0 = vpack.c.bf16 %v531_v19, %v522_v14  ;;  %v3561_v27 = vpack.c.bf16 %v404_v21, %v395_v20  ;;  %v475_v14 = vld [vmem:[#allocation2 + $0x578] sm:$0xff] }
 0x19d   : > { %3622 = vmatprep.subr.bf16.mxu0 %v3621_v42  ;;  %v331_v42 = vld [vmem:[#allocation2 + $0xf8] sm:$0xff]  ;;  %v3641_v43 = vpack.c.bf16 %v478_v36, %v469_v35  ;;  %v413_v35 = vld [vmem:[#allocation2 + $0x388] sm:$0xff]  ;;  %v422_v36 = vld [vmem:[#allocation2 + $0x3d0] sm:$0xff] }
 0x19e   : > { %v335_v21 = vld [vmem:[#allocation2 + $0x118] sm:$0xff] }
 0x19f   : > { %3464 = vmatpush1.bf16.msra.mxu1 %v3463_v47  ;;  %v487_v47 = vld [vmem:[#allocation2 + $0x5d8] sm:$0xff] }
 0x1a0   : > { %3624 = vmatpush1.bf16.msra.mxu0 %v3623_v48  ;;  %3466 = vmatprep.subr.bf16.mxu1 %v3465_v49  ;;  %v496_v48 = vld [vmem:[#allocation2 + $0x620] sm:$0xff]  ;;  %v3547_v49 = vpack.c.bf16 %v331_v42, %v322_v41  ;;  %v3659_v41 = vpack.c.bf16 %v549_v34, %v540_v31  ;;  %v3565_v42 = vpack.c.bf16 %v422_v36, %v413_v35  ;;  %v353_v36 = vld [vmem:[#allocation2 + $0x1a8] sm:$0xff] }
 0x1a1   : > { %3626 = vmatprep.subr.bf16.mxu0 %v3625_v53  ;;  %v349_v53 = vld [vmem:[#allocation2 + $0x188] sm:$0xff]  ;;  %v3645_v55 = vpack.c.bf16 %v496_v48, %v487_v47  ;;  %v431_v47 = vld [vmem:[#allocation2 + $0x418] sm:$0xff]  ;;  %v440_v48 = vld [vmem:[#allocation2 + $0x460] sm:$0xff] }
 0x1a2   : > { %v484_v31 = vld [vmem:[#allocation2 + $0x5c0] sm:$0xff] }
 0x1a3   : > { %3468 = vmatpush1.bf16.msra.mxu1 %v3467_v59  ;;  %v505_v59 = vld [vmem:[#allocation2 + $0x668] sm:$0xff]  ;;  %v344_v34 = vld [vmem:[#allocation2 + $0x160] sm:$0xff] }
 0x1a4   : > { %3628 = vmatpush1.bf16.msra.mxu0 %v3627_v60  ;;  %3470 = vmatprep.subr.bf16.mxu1 %v3469_v61  ;;  %v514_v60 = vld [vmem:[#allocation2 + $0x6b0] sm:$0xff]  ;;  %v3551_v61 = vpack.c.bf16 %v349_v53, %v340_v52  ;;  %v3663_v52 = vpack.c.bf16 %v567_v46, %v558_v44  ;;  %v3569_v53 = vpack.c.bf16 %v440_v48, %v431_v47  ;;  %v511_v44 = vld [vmem:[#allocation2 + $0x698] sm:$0xff]  ;;  %v521_v48 = vld [vmem:[#allocation2 + $0x6e8] sm:$0xff] }
 0x1a5   : > { %3630 = vmatprep.subr.bf16.mxu0 %v3629_v1  ;;  %v367_v1 = vld [vmem:[#allocation2 + $0x218] sm:$0xff]  ;;  %v3649_v3 = vpack.c.bf16 %v514_v60, %v505_v59  ;;  %v449_v59 = vld [vmem:[#allocation2 + $0x4a8] sm:$0xff]  ;;  %v458_v60 = vld [vmem:[#allocation2 + $0x4f0] sm:$0xff] }
 0x1a6   : > { %v371_v47 = vld [vmem:[#allocation2 + $0x238] sm:$0xff] }
 0x1a7   : > { %3472 = vmatpush1.bf16.msra.mxu1 %v3471_v7  ;;  %v523_v7 = vld [vmem:[#allocation2 + $0x6f8] sm:$0xff] }
 0x1a8   : > { %3632 = vmatpush1.bf16.msra.mxu0 %v3631_v8  ;;  %3474 = vmatprep.subr.bf16.mxu1 %v3473_v9  ;;  %v532_v8 = vld [vmem:[#allocation2 + $0x740] sm:$0xff]  ;;  %v3555_v9 = vpack.c.bf16 %v367_v1, %v358_v63  ;;  %v3667_v63 = vpack.c.bf16 %v585_v58, %v576_v56  ;;  %v3573_v1 = vpack.c.bf16 %v458_v60, %v449_v59  ;;  %v529_v56 = vld [vmem:[#allocation2 + $0x728] sm:$0xff]  ;;  %v539_v60 = vld [vmem:[#allocation2 + $0x778] sm:$0xff] }
 0x1a9   : > { %3634 = vmatprep.subr.bf16.mxu0 %v3633_v13  ;;  %v385_v13 = vld [vmem:[#allocation2 + $0x2a8] sm:$0xff]  ;;  %v3653_v16 = vpack.c.bf16 %v532_v8, %v523_v7  ;;  %v467_v7 = vld [vmem:[#allocation2 + $0x538] sm:$0xff]  ;;  %v476_v8 = vld [vmem:[#allocation2 + $0x580] sm:$0xff] }
 0x1aa   : > { %v3577_v19 = vpack.c.bf16 %v476_v8, %v467_v7  ;;  %v389_v59 = vld [vmem:[#allocation2 + $0x2c8] sm:$0xff]  ;;  %v407_v7 = vld [vmem:[#allocation2 + $0x358] sm:$0xff] }
 0x1ab   : > { %3476 = vmatpush1.bf16.msra.mxu1 %v3475_v22  ;;  %v541_v22 = vld [vmem:[#allocation2 + $0x788] sm:$0xff] }
 0x1ac   : > { %3636 = vmatpush1.bf16.msra.mxu0 %v3635_v24  ;;  %3542 = vmatprep.subr.bf16.mxu1 %v3541_v26  ;;  %v550_v24 = vld [vmem:[#allocation2 + $0x7d0] sm:$0xff]  ;;  %v3559_v26 = vpack.c.bf16 %v385_v13, %v376_v12  ;;  %v3671_v12 = vpack.c.bf16 %v317_v6, %v308_v5  ;;  %v557_v8 = vld [vmem:[#allocation2 + $0x808] sm:$0xff] }
 0x1ad   : > { %3638 = vmatprep.subr.bf16.mxu0 %v3637_v30  ;;  %v403_v30 = vld [vmem:[#allocation2 + $0x338] sm:$0xff]  ;;  %v3657_v32 = vpack.c.bf16 %v550_v24, %v541_v22  ;;  %v466_v13 = vld [vmem:[#allocation2 + $0x530] sm:$0xff]  ;;  %v485_v22 = vld [vmem:[#allocation2 + $0x5c8] sm:$0xff] }
 0x1ae   : > { %1296 = vmatmul.mubr.f32.vlgmr.msra.gmra.mrb[0].mxu1 %v4464_v15  ;;  %v494_v24 = vld [vmem:[#allocation2 + $0x610] sm:$0xff] }
 0x1af   : > { %3544 = vmatpush1.bf16.msra.mxu1 %v3543_v37  ;;  %1437 = vmatprep.mubr.f32.mxu1 %v4466_v17  ;;  %v559_v37 = vld [vmem:[#allocation2 + $0x818] sm:$0xff]  ;;  %v398_v5 = vld [vmem:[#allocation2 + $0x310] sm:$0xff] }
 0x1b0   : > { %3640 = vmatpush1.bf16.msra.mxu0 %v3639_v39  ;;  %3546 = vmatprep.subr.bf16.mxu1 %v3545_v40  ;;  %v568_v39 = vld [vmem:[#allocation2 + $0x860] sm:$0xff]  ;;  %v3563_v40 = vpack.c.bf16 %v403_v30, %v394_v28  ;;  %v3581_v30 = vpack.c.bf16 %v494_v24, %v485_v22  ;;  %v425_v22 = vld [vmem:[#allocation2 + $0x3e8] sm:$0xff]  ;;  %v575_v24 = vld [vmem:[#allocation2 + $0x898] sm:$0xff] }
 0x1b1   : > { %3642 = vmatprep.subr.bf16.mxu0 %v3641_v43  ;;  %v421_v43 = vld [vmem:[#allocation2 + $0x3c8] sm:$0xff]  ;;  %v3661_v45 = vpack.c.bf16 %v568_v39, %v559_v37  ;;  %v503_v37 = vld [vmem:[#allocation2 + $0x658] sm:$0xff]  ;;  %v512_v39 = vld [vmem:[#allocation2 + $0x6a0] sm:$0xff] }
 0x1b3   : > { %3548 = vmatpush1.bf16.msra.mxu1 %v3547_v49  ;;  %v577_v49 = vld [vmem:[#allocation2 + $0x8a8] sm:$0xff] }
 0x1b4   : > { %3644 = vmatpush1.bf16.msra.mxu0 %v3643_v50  ;;  %3550 = vmatprep.subr.bf16.mxu1 %v3549_v51  ;;  %v586_v50 = vld [vmem:[#allocation2 + $0x8f0] sm:$0xff]  ;;  %v3567_v51 = vpack.c.bf16 %v421_v43, %v412_v25  ;;  %v3679_v25 = vpack.c.bf16 %v353_v36, %v344_v34  ;;  %v3585_v43 = vpack.c.bf16 %v512_v39, %v503_v37  ;;  %v583_v34 = vld [vmem:[#allocation2 + $0x8d8] sm:$0xff]  ;;  %v1587_v39 = vld [vmem:[#allocation2 + $0x1208] sm:$0xff] }
 0x1b5   : > { %3646 = vmatprep.subr.bf16.mxu0 %v3645_v55  ;;  %v439_v55 = vld [vmem:[#allocation2 + $0x458] sm:$0xff]  ;;  %v3665_v57 = vpack.c.bf16 %v586_v50, %v577_v49  ;;  %v530_v49 = vld [vmem:[#allocation2 + $0x730] sm:$0xff]  ;;  %v524_v50 = vld [vmem:[#allocation2 + $0x700] sm:$0xff] }
 0x1b6   : > { %v443_v37 = vld [vmem:[#allocation2 + $0x478] sm:$0xff] }
 0x1b7   : > { %3552 = vmatpush1.bf16.msra.mxu1 %v3551_v61  ;;  %v452_v61 = vld [vmem:[#allocation2 + $0x4c0] sm:$0xff] }
 0x1b8   : > { %3648 = vmatpush1.bf16.msra.mxu0 %v3647_v62  ;;  %3554 = vmatprep.subr.bf16.mxu1 %v3553_v29  ;;  %v461_v62 = vld [vmem:[#allocation2 + $0x508] sm:$0xff]  ;;  %v3571_v29 = vpack.c.bf16 %v439_v55, %v430_v54  ;;  %v3589_v54 = vpack.c.bf16 %v530_v49, %v521_v48  ;;  %v520_v55 = vld [vmem:[#allocation2 + $0x6e0] sm:$0xff]  ;;  %v1597_v48 = vld [vmem:[#allocation2 + $0x1258] sm:$0xff] }
 0x1b9   : > { %3650 = vmatprep.subr.bf16.mxu0 %v3649_v3  ;;  %v457_v3 = vld [vmem:[#allocation2 + $0x4e8] sm:$0xff]  ;;  %v3669_v4 = vpack.c.bf16 %v461_v62, %v452_v61  ;;  %v548_v61 = vld [vmem:[#allocation2 + $0x7c0] sm:$0xff]  ;;  %v542_v62 = vld [vmem:[#allocation2 + $0x790] sm:$0xff] }
 0x1ba   : > { %v1605_v49 = vld [vmem:[#allocation2 + $0x1298] sm:$0xff] }
 0x1bb   : > { %3556 = vmatpush1.bf16.msra.mxu1 %v3555_v9  ;;  %v470_v9 = vld [vmem:[#allocation2 + $0x550] sm:$0xff] }
 0x1bc   : > { %3652 = vmatpush1.bf16.msra.mxu0 %v3651_v10  ;;  %3558 = vmatprep.subr.bf16.mxu1 %v3557_v11  ;;  %v479_v10 = vld [vmem:[#allocation2 + $0x598] sm:$0xff]  ;;  %v3575_v11 = vpack.c.bf16 %v457_v3, %v448_v2  ;;  %v3593_v2 = vpack.c.bf16 %v548_v61, %v539_v60  ;;  %v538_v3 = vld [vmem:[#allocation2 + $0x770] sm:$0xff]  ;;  %v1623_v60 = vld [vmem:[#allocation2 + $0x1328] sm:$0xff] }
 0x1bd   : > { %3654 = vmatprep.subr.bf16.mxu0 %v3653_v16  ;;  %v326_v16 = vld [vmem:[#allocation2 + $0xd0] sm:$0xff]  ;;  %v3673_v20 = vpack.c.bf16 %v479_v10, %v470_v9  ;;  %v560_v10 = vld [vmem:[#allocation2 + $0x820] sm:$0xff] }
 0x1be   : > { %v3675_v28 = vpack.c.bf16 %v335_v21, %v326_v16  ;;  %v566_v9 = vld [vmem:[#allocation2 + $0x850] sm:$0xff]  ;;  %v556_v16 = vld [vmem:[#allocation2 + $0x800] sm:$0xff] }
 0x1bf   : > { %3560 = vmatpush1.bf16.msra.mxu1 %v3559_v26  ;;  %v488_v26 = vld [vmem:[#allocation2 + $0x5e0] sm:$0xff]  ;;  %v1632_v61 = vld [vmem:[#allocation2 + $0x1370] sm:$0xff] }
 0x1c0   : > { %3656 = vmatpush1.bf16.msra.mxu0 %v3655_v0  ;;  %3562 = vmatprep.subr.bf16.mxu1 %v3561_v27  ;;  %v497_v0 = vld [vmem:[#allocation2 + $0x628] sm:$0xff]  ;;  %v3579_v27 = vpack.c.bf16 %v475_v14, %v466_v13  ;;  %v3691_v13 = vpack.c.bf16 %v407_v7, %v398_v5  ;;  %v3597_v14 = vpack.c.bf16 %v566_v9, %v557_v8  ;;  %v1633_v8 = vld [vmem:[#allocation2 + $0x1378] sm:$0xff] }
 0x1c1   : > { %3658 = vmatprep.subr.bf16.mxu0 %v3657_v32  ;;  %v493_v32 = vld [vmem:[#allocation2 + $0x608] sm:$0xff]  ;;  %v3677_v35 = vpack.c.bf16 %v497_v0, %v488_v26  ;;  %v584_v26 = vld [vmem:[#allocation2 + $0x8e0] sm:$0xff]  ;;  %v578_v0 = vld [vmem:[#allocation2 + $0x8b0] sm:$0xff] }
 0x1c2   : > { %v1631_v5 = vld [vmem:[#allocation2 + $0x1368] sm:$0xff]  ;;  %v1641_v9 = vld [vmem:[#allocation2 + $0x13b8] sm:$0xff] }
 0x1c3   : > { %3564 = vmatpush1.bf16.msra.mxu1 %v3563_v40  ;;  %v506_v40 = vld [vmem:[#allocation2 + $0x670] sm:$0xff] }
 0x1c4   : > { %3660 = vmatpush1.bf16.msra.mxu0 %v3659_v41  ;;  %3566 = vmatprep.subr.bf16.mxu1 %v3565_v42  ;;  %v515_v41 = vld [vmem:[#allocation2 + $0x6b8] sm:$0xff]  ;;  %v3583_v42 = vpack.c.bf16 %v493_v32, %v484_v31  ;;  %v3601_v31 = vpack.c.bf16 %v584_v26, %v575_v24  ;;  %v574_v32 = vld [vmem:[#allocation2 + $0x890] sm:$0xff]  ;;  %v1659_v24 = vld [vmem:[#allocation2 + $0x1448] sm:$0xff] }
 0x1c5   : > { %3662 = vmatprep.subr.bf16.mxu0 %v3661_v45  ;;  %v362_v45 = vld [vmem:[#allocation2 + $0x1f0] sm:$0xff]  ;;  %v3681_v46 = vpack.c.bf16 %v515_v41, %v506_v40  ;;  %v1589_v41 = vld [vmem:[#allocation2 + $0x1218] sm:$0xff] }
 0x1c6   : > { %v1596_v40 = vld [vmem:[#allocation2 + $0x1250] sm:$0xff] }
 0x1c7   : > { %3568 = vmatpush1.bf16.msra.mxu1 %v3567_v51  ;;  %v533_v51 = vld [vmem:[#allocation2 + $0x748] sm:$0xff]  ;;  %v1668_v26 = vld [vmem:[#allocation2 + $0x1490] sm:$0xff] }
 0x1c8   : > { %3664 = vmatpush1.bf16.msra.mxu0 %v3663_v52  ;;  %3570 = vmatprep.subr.bf16.mxu1 %v3569_v53  ;;  %v3683_v53 = vpack.c.bf16 %v371_v47, %v362_v45  ;;  %v3685_v58 = vpack.c.bf16 %v533_v51, %v524_v50  ;;  %v1595_v45 = vld [vmem:[#allocation2 + $0x1248] sm:$0xff]  ;;  %v1588_v47 = vld [vmem:[#allocation2 + $0x1210] sm:$0xff]  ;;  %v1614_v50 = vld [vmem:[#allocation2 + $0x12e0] sm:$0xff] }
 0x1c9   : > { %3666 = vmatprep.subr.bf16.mxu0 %v3665_v57  ;;  %v380_v57 = vld [vmem:[#allocation2 + $0x280] sm:$0xff] }
 0x1cb   : > { %3572 = vmatpush1.bf16.msra.mxu1 %v3571_v29  ;;  %v551_v29 = vld [vmem:[#allocation2 + $0x7d8] sm:$0xff] }
 0x1cc   : > { %3668 = vmatpush1.bf16.msra.mxu0 %v3667_v63  ;;  %3574 = vmatprep.subr.bf16.mxu1 %v3573_v1  ;;  %v3591_v63 = vpack.c.bf16 %v529_v56, %v520_v55  ;;  %v3687_v1 = vpack.c.bf16 %v389_v59, %v380_v57  ;;  %v3689_v6 = vpack.c.bf16 %v551_v29, %v542_v62  ;;  %v1604_v55 = vld [vmem:[#allocation2 + $0x1290] sm:$0xff]  ;;  %v1613_v56 = vld [vmem:[#allocation2 + $0x12d8] sm:$0xff]  ;;  %v1606_v57 = vld [vmem:[#allocation2 + $0x12a0] sm:$0xff] }
 0x1cd   : > { %3670 = vmatprep.subr.bf16.mxu0 %v3669_v4  ;;  %v547_v4 = vld [vmem:[#allocation2 + $0x7b8] sm:$0xff]  ;;  %v1615_v59 = vld [vmem:[#allocation2 + $0x12e8] sm:$0xff] }
 0x1ce   : > { %v1625_v29 = vld [vmem:[#allocation2 + $0x1338] sm:$0xff] }
 0x1cf   : > { %1509 = vmatmul.mubr.f32.vlgmr.msra.gmra.mrb[10].mxu0 %v4464_v15  ;;  %3576 = vmatpush1.bf16.msra.mxu1 %v3575_v11  ;;  %v569_v11 = vld [vmem:[#allocation2 + $0x868] sm:$0xff] }
 0x1d0   : > { %3672 = vmatpush3.bf16.msra.mxu0 %v3671_v12  ;;  %1579 = vmatprep.mubr.f32.mxu0 %v4466_v17  ;;  %v502_v17 = vld [vmem:[#allocation2 + $0x650] sm:$0xff]  ;;  %v3595_v12 = vpack.c.bf16 %v547_v4, %v538_v3  ;;  %v3693_v21 = vpack.c.bf16 %v569_v11, %v560_v10  ;;  %v3709_v3 = vpack.c.bf16 %v1632_v61, %v1623_v60  ;;  %v1622_v4 = vld [vmem:[#allocation2 + $0x1320] sm:$0xff]  ;;  %v1643_v11 = vld [vmem:[#allocation2 + $0x13c8] sm:$0xff] }
 0x1d1   : > { %3578 = vmatprep.subr.bf16.mxu1 %v3577_v19  ;;  %3674 = vmatprep.subr.bf16.mxu0 %v3673_v20  ;;  %v3587_v52 = vpack.c.bf16 %v511_v44, %v502_v17  ;;  %v565_v19 = vld [vmem:[#allocation2 + $0x848] sm:$0xff]  ;;  %v416_v20 = vld [vmem:[#allocation2 + $0x3a0] sm:$0xff]  ;;  %v3701_v17 = vpack.c.bf16 %v1596_v40, %v1587_v39  ;;  %v1677_v39 = vld [vmem:[#allocation2 + $0x14d8] sm:$0xff] }
 0x1d2   : > { %v1586_v44 = vld [vmem:[#allocation2 + $0x1200] sm:$0xff]  ;;  %v1705_v60 = vld [vmem:[#allocation2 + $0x15b8] sm:$0xff] }
 0x1d3   : > { %3580 = vmatpush1.bf16.msra.mxu1 %v3579_v27  ;;  %v587_v27 = vld [vmem:[#allocation2 + $0x8f8] sm:$0xff]  ;;  %v3703_v51 = vpack.c.bf16 %v1595_v45, %v1586_v44  ;;  %v1650_v10 = vld [vmem:[#allocation2 + $0x1400] sm:$0xff]  ;;  %v1676_v44 = vld [vmem:[#allocation2 + $0x14d0] sm:$0xff] }
 0x1d4   : > { %3676 = vmatpush3.bf16.msra.mxu0 %v3675_v28  ;;  %3582 = vmatprep.subr.bf16.mxu1 %v3581_v30  ;;  %v3599_v28 = vpack.c.bf16 %v565_v19, %v556_v16  ;;  %v3695_v30 = vpack.c.bf16 %v425_v22, %v416_v20  ;;  %v3697_v36 = vpack.c.bf16 %v587_v27, %v578_v0  ;;  %v1640_v16 = vld [vmem:[#allocation2 + $0x13b0] sm:$0xff]  ;;  %v1649_v19 = vld [vmem:[#allocation2 + $0x13f8] sm:$0xff]  ;;  %v1642_v20 = vld [vmem:[#allocation2 + $0x13c0] sm:$0xff] }
 0x1d5   : > { %3678 = vmatprep.subr.bf16.mxu0 %v3677_v35  ;;  %v434_v35 = vld [vmem:[#allocation2 + $0x430] sm:$0xff]  ;;  %v1651_v22 = vld [vmem:[#allocation2 + $0x1408] sm:$0xff]  ;;  %v1661_v0 = vld [vmem:[#allocation2 + $0x1458] sm:$0xff] }
 0x1d6   : > { %v1670_v27 = vld [vmem:[#allocation2 + $0x14a0] sm:$0xff]  ;;  %v1685_v45 = vld [vmem:[#allocation2 + $0x1518] sm:$0xff] }
 0x1d7   : > { %3584 = vmatpush1.bf16.msra.mxu1 %v3583_v42  ;;  %v1598_v42 = vld [vmem:[#allocation2 + $0x1260] sm:$0xff]  ;;  %v1713_v61 = vld [vmem:[#allocation2 + $0x15f8] sm:$0xff] }
 0x1d8   : > { %3680 = vmatpush3.bf16.msra.mxu0 %v3679_v25  ;;  %3586 = vmatprep.subr.bf16.mxu1 %v3585_v43  ;;  %v3603_v25 = vpack.c.bf16 %v583_v34, %v574_v32  ;;  %v3699_v43 = vpack.c.bf16 %v443_v37, %v434_v35  ;;  %v1658_v32 = vld [vmem:[#allocation2 + $0x1440] sm:$0xff]  ;;  %v1667_v34 = vld [vmem:[#allocation2 + $0x1488] sm:$0xff]  ;;  %v1660_v35 = vld [vmem:[#allocation2 + $0x1450] sm:$0xff] }
 0x1d9   : > { %3682 = vmatprep.subr.bf16.mxu0 %v3681_v46  ;;  %v3765_v46 = vpack.c.bf16 %v1598_v42, %v1589_v41  ;;  %v1669_v37 = vld [vmem:[#allocation2 + $0x1498] sm:$0xff]  ;;  %v1686_v40 = vld [vmem:[#allocation2 + $0x1520] sm:$0xff]  ;;  %v1679_v41 = vld [vmem:[#allocation2 + $0x14e8] sm:$0xff] }
 0x1da   : > { %v1688_v42 = vld [vmem:[#allocation2 + $0x1530] sm:$0xff] }
 0x1db   : > { %3588 = vmatpush1.bf16.msra.mxu1 %v3587_v52  ;;  %v1607_v52 = vld [vmem:[#allocation2 + $0x12a8] sm:$0xff] }
 0x1dc   : > { %3684 = vmatpush3.bf16.msra.mxu0 %v3683_v53  ;;  %3590 = vmatprep.subr.bf16.mxu1 %v3589_v54  ;;  %v1616_v53 = vld [vmem:[#allocation2 + $0x12f0] sm:$0xff]  ;;  %v3767_v54 = vpack.c.bf16 %v1597_v48, %v1588_v47  ;;  %v3785_v47 = vpack.c.bf16 %v1688_v42, %v1679_v41  ;;  %v1687_v48 = vld [vmem:[#allocation2 + $0x1528] sm:$0xff]  ;;  %v1769_v41 = vld [vmem:[#allocation2 + $0x17b8] sm:$0xff] }
 0x1dd   : > { %3686 = vmatprep.subr.bf16.mxu0 %v3685_v58  ;;  %v3705_v58 = vpack.c.bf16 %v1614_v50, %v1605_v49  ;;  %v3769_v62 = vpack.c.bf16 %v1616_v53, %v1607_v52  ;;  %v1695_v49 = vld [vmem:[#allocation2 + $0x1568] sm:$0xff]  ;;  %v1704_v50 = vld [vmem:[#allocation2 + $0x15b0] sm:$0xff]  ;;  %v1706_v52 = vld [vmem:[#allocation2 + $0x15c0] sm:$0xff]  ;;  %v3723_v53 = vpack.c.bf16 %v1685_v45, %v1676_v44 }
 0x1de   : > { %v1778_v42 = vld [vmem:[#allocation2 + $0x1800] sm:$0xff]  ;;  %v1775_v45 = vld [vmem:[#allocation2 + $0x17e8] sm:$0xff] }
 0x1df   : > { %3592 = vmatpush1.bf16.msra.mxu1 %v3591_v63  ;;  %v1634_v63 = vld [vmem:[#allocation2 + $0x1380] sm:$0xff] }
 0x1e0   : > { %3688 = vmatpush3.bf16.msra.mxu0 %v3687_v1  ;;  %3594 = vmatprep.subr.bf16.mxu1 %v3593_v2  ;;  %v3707_v1 = vpack.c.bf16 %v1613_v56, %v1604_v55  ;;  %v3771_v2 = vpack.c.bf16 %v1615_v59, %v1606_v57  ;;  %v3773_v7 = vpack.c.bf16 %v1634_v63, %v1625_v29  ;;  %v1694_v56 = vld [vmem:[#allocation2 + $0x1560] sm:$0xff]  ;;  %v1703_v57 = vld [vmem:[#allocation2 + $0x15a8] sm:$0xff]  ;;  %v1724_v63 = vld [vmem:[#allocation2 + $0x1650] sm:$0xff] }
 0x1e1   : > { %3690 = vmatprep.subr.bf16.mxu0 %v3689_v6  ;;  %v1624_v6 = vld [vmem:[#allocation2 + $0x1330] sm:$0xff]  ;;  %v3725_v55 = vpack.c.bf16 %v1704_v50, %v1695_v49  ;;  %v1715_v29 = vld [vmem:[#allocation2 + $0x1608] sm:$0xff]  ;;  %v1766_v44 = vld [vmem:[#allocation2 + $0x17a0] sm:$0xff] }
 0x1e2   : > { %v1785_v49 = vld [vmem:[#allocation2 + $0x1838] sm:$0xff]  ;;  %v1794_v50 = vld [vmem:[#allocation2 + $0x1880] sm:$0xff] }
 0x1e3   : > { %3596 = vmatpush1.bf16.msra.mxu1 %v3595_v12  ;;  %v3711_v12 = vpack.c.bf16 %v1631_v5, %v1622_v4  ;;  %v1712_v4 = vld [vmem:[#allocation2 + $0x15f0] sm:$0xff]  ;;  %v1721_v5 = vld [vmem:[#allocation2 + $0x1638] sm:$0xff] }
 0x1e4   : > { %3692 = vmatpush3.bf16.msra.mxu0 %v3691_v13  ;;  %3598 = vmatprep.subr.bf16.mxu1 %v3597_v14  ;;  %v3775_v13 = vpack.c.bf16 %v1633_v8, %v1624_v6  ;;  %v3713_v14 = vpack.c.bf16 %v1650_v10, %v1641_v9  ;;  %v1714_v6 = vld [vmem:[#allocation2 + $0x1600] sm:$0xff]  ;;  %v1723_v8 = vld [vmem:[#allocation2 + $0x1648] sm:$0xff]  ;;  %v1740_v10 = vld [vmem:[#allocation2 + $0x16d0] sm:$0xff] }
 0x1e5   : > { %3694 = vmatprep.subr.bf16.mxu0 %v3693_v21  ;;  %v1731_v9 = vld [vmem:[#allocation2 + $0x1688] sm:$0xff] }
 0x1e7   : > { %3600 = vmatpush1.bf16.msra.mxu1 %v3599_v28  ;;  %v3715_v28 = vpack.c.bf16 %v1649_v19, %v1640_v16  ;;  %v1730_v16 = vld [vmem:[#allocation2 + $0x1680] sm:$0xff]  ;;  %v1739_v19 = vld [vmem:[#allocation2 + $0x16c8] sm:$0xff] }
 0x1e8   : > { %3696 = vmatpush3.bf16.msra.mxu0 %v3695_v30  ;;  %3602 = vmatprep.subr.bf16.mxu1 %v3601_v31  ;;  %v3779_v30 = vpack.c.bf16 %v1651_v22, %v1642_v20  ;;  %v3717_v31 = vpack.c.bf16 %v1668_v26, %v1659_v24  ;;  %v1732_v20 = vld [vmem:[#allocation2 + $0x1690] sm:$0xff]  ;;  %v1741_v22 = vld [vmem:[#allocation2 + $0x16d8] sm:$0xff]  ;;  %v1758_v26 = vld [vmem:[#allocation2 + $0x1760] sm:$0xff] }
 0x1e9   : > { %3698 = vmatprep.subr.bf16.mxu0 %v3697_v36  ;;  %v3781_v36 = vpack.c.bf16 %v1670_v27, %v1661_v0  ;;  %v1749_v24 = vld [vmem:[#allocation2 + $0x1718] sm:$0xff]  ;;  %v1751_v0 = vld [vmem:[#allocation2 + $0x1728] sm:$0xff]  ;;  %v1760_v27 = vld [vmem:[#allocation2 + $0x1770] sm:$0xff] }
 0x1eb   : > { %3604 = vmatpush1.bf16.msra.mxu1 %v3603_v25  ;;  %v3719_v25 = vpack.c.bf16 %v1667_v34, %v1658_v32  ;;  %v1748_v32 = vld [vmem:[#allocation2 + $0x1710] sm:$0xff]  ;;  %v1757_v34 = vld [vmem:[#allocation2 + $0x1758] sm:$0xff] }
 0x1ec   : > { %3700 = vmatpush3.bf16.msra.mxu0 %v3699_v43  ;;  %3702 = vmatprep.subr.bf16.mxu1 %v3701_v17  ;;  %v3783_v43 = vpack.c.bf16 %v1669_v37, %v1660_v35  ;;  %v3721_v17 = vpack.c.bf16 %v1686_v40, %v1677_v39  ;;  %v1750_v35 = vld [vmem:[#allocation2 + $0x1720] sm:$0xff]  ;;  %v1759_v37 = vld [vmem:[#allocation2 + $0x1768] sm:$0xff]  ;;  %v1776_v40 = vld [vmem:[#allocation2 + $0x17f0] sm:$0xff] }
 0x1ed   : > { %3766 = vmatprep.subr.bf16.mxu0 %v3765_v46  ;;  %v1678_v46 = vld [vmem:[#allocation2 + $0x14e0] sm:$0xff]  ;;  %v1767_v39 = vld [vmem:[#allocation2 + $0x17a8] sm:$0xff] }
 0x1ee   : > { %1438 = vmatmul.mubr.f32.vlgmr.msra.gmra.mrb[2].mxu1 %v4464_v15 }
 0x1ef   : > { %1580 = vmatmul.mubr.f32.vlgmr.msra.gmra.mrb[12].mxu0 %v4464_v15  ;;  %3704 = vmatpush1.bf16.msra.mxu1 %v3703_v51  ;;  %v1652_v15 = vld [vmem:[#allocation2 + $0x1410] sm:$0xff]  ;;  %v1697_v51 = vld [vmem:[#allocation2 + $0x1578] sm:$0xff] }
 0x1f0   : > { %1938 = vmatprep.mubr.f32.mxu1 %v4484_v23  ;;  %3768 = vmatpush1.bf16.msra.mxu0 %v3767_v54  ;;  %v3777_v21 = vpack.c.bf16 %v1652_v15, %v1643_v11  ;;  %v3787_v54 = vpack.c.bf16 %v1687_v48, %v1678_v46  ;;  %v3789_v59 = vpack.c.bf16 %v1706_v52, %v1697_v51  ;;  %v1733_v11 = vld [vmem:[#allocation2 + $0x1698] sm:$0xff]  ;;  %v1742_v15 = vld [vmem:[#allocation2 + $0x16e0] sm:$0xff]  ;;  %v1768_v46 = vld [vmem:[#allocation2 + $0x17b0] sm:$0xff] }
 0x1f1   : > { %2009 = vmatprep.mubr.f32.mxu0 %v4484_v23  ;;  %3706 = vmatprep.subr.bf16.mxu1 %v3705_v58  ;;  %v1696_v58 = vld [vmem:[#allocation2 + $0x1570] sm:$0xff]  ;;  %v1777_v48 = vld [vmem:[#allocation2 + $0x17f8] sm:$0xff]  ;;  %v1787_v51 = vld [vmem:[#allocation2 + $0x1848] sm:$0xff] }
 0x1f2   : > { %3770 = vmatprep.subr.bf16.mxu0 %v3769_v62  ;;  %v1722_v62 = vld [vmem:[#allocation2 + $0x1640] sm:$0xff]  ;;  %v1796_v52 = vld [vmem:[#allocation2 + $0x1890] sm:$0xff] }
 0x1f3   : > { %3708 = vmatpush1.bf16.msra.mxu1 %v3707_v1  ;;  %v3727_v1 = vpack.c.bf16 %v1703_v57, %v1694_v56  ;;  %v1784_v56 = vld [vmem:[#allocation2 + $0x1830] sm:$0xff]  ;;  %v1793_v57 = vld [vmem:[#allocation2 + $0x1878] sm:$0xff] }
 0x1f4   : > { %3772 = vmatpush1.bf16.msra.mxu0 %v3771_v2  ;;  %3710 = vmatprep.subr.bf16.mxu1 %v3709_v3  ;;  %v3791_v2 = vpack.c.bf16 %v1705_v60, %v1696_v58  ;;  %v3729_v3 = vpack.c.bf16 %v1722_v62, %v1713_v61  ;;  %v1786_v58 = vld [vmem:[#allocation2 + $0x1840] sm:$0xff]  ;;  %v1795_v60 = vld [vmem:[#allocation2 + $0x1888] sm:$0xff]  ;;  %v1812_v62 = vld [vmem:[#allocation2 + $0x1910] sm:$0xff] }
 0x1f5   : > { %3774 = vmatprep.subr.bf16.mxu0 %v3773_v7  ;;  %v3793_v7 = vpack.c.bf16 %v1724_v63, %v1715_v29  ;;  %v1803_v61 = vld [vmem:[#allocation2 + $0x18c8] sm:$0xff]  ;;  %v1805_v29 = vld [vmem:[#allocation2 + $0x18d8] sm:$0xff]  ;;  %v1814_v63 = vld [vmem:[#allocation2 + $0x1920] sm:$0xff] }
 0x1f7   : > { %3712 = vmatpush1.bf16.msra.mxu1 %v3711_v12  ;;  %v3731_v12 = vpack.c.bf16 %v1721_v5, %v1712_v4  ;;  %v1802_v4 = vld [vmem:[#allocation2 + $0x18c0] sm:$0xff]  ;;  %v1811_v5 = vld [vmem:[#allocation2 + $0x1908] sm:$0xff] }
 0x1f8   : > { %3776 = vmatpush1.bf16.msra.mxu0 %v3775_v13  ;;  %3714 = vmatprep.subr.bf16.mxu1 %v3713_v14  ;;  %v3795_v13 = vpack.c.bf16 %v1723_v8, %v1714_v6  ;;  %v3733_v14 = vpack.c.bf16 %v1740_v10, %v1731_v9  ;;  %v1804_v6 = vld [vmem:[#allocation2 + $0x18d0] sm:$0xff]  ;;  %v1813_v8 = vld [vmem:[#allocation2 + $0x1918] sm:$0xff]  ;;  %v1830_v10 = vld [vmem:[#allocation2 + $0x19a0] sm:$0xff] }
 0x1f9   : > { %3778 = vmatprep.subr.bf16.mxu0 %v3777_v21  ;;  %v3797_v21 = vpack.c.bf16 %v1742_v15, %v1733_v11  ;;  %v1821_v9 = vld [vmem:[#allocation2 + $0x1958] sm:$0xff]  ;;  %v1823_v11 = vld [vmem:[#allocation2 + $0x1968] sm:$0xff]  ;;  %v1832_v15 = vld [vmem:[#allocation2 + $0x19b0] sm:$0xff] }
 0x1fb   : > { %3716 = vmatpush1.bf16.msra.mxu1 %v3715_v28  ;;  %v3735_v28 = vpack.c.bf16 %v1739_v19, %v1730_v16  ;;  %v1820_v16 = vld [vmem:[#allocation2 + $0x1950] sm:$0xff]  ;;  %v1829_v19 = vld [vmem:[#allocation2 + $0x1998] sm:$0xff] }
 0x1fc   : > { %3780 = vmatpush1.bf16.msra.mxu0 %v3779_v30  ;;  %3718 = vmatprep.subr.bf16.mxu1 %v3717_v31  ;;  %v3799_v30 = vpack.c.bf16 %v1741_v22, %v1732_v20  ;;  %v3737_v31 = vpack.c.bf16 %v1758_v26, %v1749_v24  ;;  %v1822_v20 = vld [vmem:[#allocation2 + $0x1960] sm:$0xff]  ;;  %v1831_v22 = vld [vmem:[#allocation2 + $0x19a8] sm:$0xff]  ;;  %v1848_v26 = vld [vmem:[#allocation2 + $0x1a30] sm:$0xff] }
 0x1fd   : > { %3782 = vmatprep.subr.bf16.mxu0 %v3781_v36  ;;  %v3801_v36 = vpack.c.bf16 %v1760_v27, %v1751_v0  ;;  %v1839_v24 = vld [vmem:[#allocation2 + $0x19e8] sm:$0xff]  ;;  %v1841_v0 = vld [vmem:[#allocation2 + $0x19f8] sm:$0xff]  ;;  %v1850_v27 = vld [vmem:[#allocation2 + $0x1a40] sm:$0xff] }
 0x1ff   : > { %3720 = vmatpush1.bf16.msra.mxu1 %v3719_v25  ;;  %v3739_v25 = vpack.c.bf16 %v1757_v34, %v1748_v32  ;;  %v1838_v32 = vld [vmem:[#allocation2 + $0x19e0] sm:$0xff]  ;;  %v1847_v34 = vld [vmem:[#allocation2 + $0x1a28] sm:$0xff] }
 0x200   : > { %3784 = vmatpush1.bf16.msra.mxu0 %v3783_v43  ;;  %3722 = vmatprep.subr.bf16.mxu1 %v3721_v17  ;;  %v3803_v43 = vpack.c.bf16 %v1759_v37, %v1750_v35  ;;  %v3741_v17 = vpack.c.bf16 %v1776_v40, %v1767_v39  ;;  %v1840_v35 = vld [vmem:[#allocation2 + $0x19f0] sm:$0xff]  ;;  %v1849_v37 = vld [vmem:[#allocation2 + $0x1a38] sm:$0xff]  ;;  %v1866_v40 = vld [vmem:[#allocation2 + $0x1ac0] sm:$0xff] }
 0x201   : > { %3786 = vmatprep.subr.bf16.mxu0 %v3785_v47  ;;  %v3805_v47 = vpack.c.bf16 %v1778_v42, %v1769_v41  ;;  %v1857_v39 = vld [vmem:[#allocation2 + $0x1a78] sm:$0xff]  ;;  %v1859_v41 = vld [vmem:[#allocation2 + $0x1a88] sm:$0xff]  ;;  %v1868_v42 = vld [vmem:[#allocation2 + $0x1ad0] sm:$0xff] }
 0x203   : > { %3724 = vmatpush1.bf16.msra.mxu1 %v3723_v53  ;;  %v3743_v53 = vpack.c.bf16 %v1775_v45, %v1766_v44  ;;  %v1856_v44 = vld [vmem:[#allocation2 + $0x1a70] sm:$0xff]  ;;  %v1865_v45 = vld [vmem:[#allocation2 + $0x1ab8] sm:$0xff] }
 0x204   : > { %3788 = vmatpush1.bf16.msra.mxu0 %v3787_v54  ;;  %3726 = vmatprep.subr.bf16.mxu1 %v3725_v55  ;;  %v3807_v54 = vpack.c.bf16 %v1777_v48, %v1768_v46  ;;  %v3745_v55 = vpack.c.bf16 %v1794_v50, %v1785_v49  ;;  %v1858_v46 = vld [vmem:[#allocation2 + $0x1a80] sm:$0xff]  ;;  %v1867_v48 = vld [vmem:[#allocation2 + $0x1ac8] sm:$0xff]  ;;  %v1600_v50 = vld [vmem:[#allocation2 + $0x1270] sm:$0xff] }
 0x205   : > { %3790 = vmatprep.subr.bf16.mxu0 %v3789_v59  ;;  %v3809_v59 = vpack.c.bf16 %v1796_v52, %v1787_v51  ;;  %v1591_v49 = vld [vmem:[#allocation2 + $0x1228] sm:$0xff]  ;;  %v1593_v51 = vld [vmem:[#allocation2 + $0x1238] sm:$0xff]  ;;  %v1602_v52 = vld [vmem:[#allocation2 + $0x1280] sm:$0xff] }
 0x207   : > { %3728 = vmatpush1.bf16.msra.mxu1 %v3727_v1  ;;  %v3747_v1 = vpack.c.bf16 %v1793_v57, %v1784_v56  ;;  %v1590_v56 = vld [vmem:[#allocation2 + $0x1220] sm:$0xff]  ;;  %v1599_v57 = vld [vmem:[#allocation2 + $0x1268] sm:$0xff] }
 0x208   : > { %3792 = vmatpush1.bf16.msra.mxu0 %v3791_v2  ;;  %3730 = vmatprep.subr.bf16.mxu1 %v3729_v3  ;;  %v3811_v2 = vpack.c.bf16 %v1795_v60, %v1786_v58  ;;  %v3749_v3 = vpack.c.bf16 %v1812_v62, %v1803_v61  ;;  %v3893_v58 = vpack.c.bf16 %v1602_v52, %v1593_v51  ;;  %v1601_v60 = vld [vmem:[#allocation2 + $0x1278] sm:$0xff]  ;;  %v1618_v62 = vld [vmem:[#allocation2 + $0x1300] sm:$0xff]  ;;  %v1683_v51 = vld [vmem:[#allocation2 + $0x1508] sm:$0xff] }
 0x209   : > { %3794 = vmatprep.subr.bf16.mxu0 %v3793_v7  ;;  %v3813_v7 = vpack.c.bf16 %v1814_v63, %v1805_v29  ;;  %v1609_v61 = vld [vmem:[#allocation2 + $0x12b8] sm:$0xff]  ;;  %v3831_v29 = vpack.c.bf16 %v1599_v57, %v1590_v56  ;;  %v1611_v63 = vld [vmem:[#allocation2 + $0x12c8] sm:$0xff]  ;;  %v1692_v52 = vld [vmem:[#allocation2 + $0x1550] sm:$0xff] }
 0x20a   : > { %v1680_v56 = vld [vmem:[#allocation2 + $0x14f0] sm:$0xff]  ;;  %v1689_v57 = vld [vmem:[#allocation2 + $0x1538] sm:$0xff] }
 0x20b   : > { %3732 = vmatpush1.bf16.msra.mxu1 %v3731_v12  ;;  %v3751_v12 = vpack.c.bf16 %v1811_v5, %v1802_v4  ;;  %v1617_v4 = vld [vmem:[#allocation2 + $0x12f8] sm:$0xff]  ;;  %v1610_v5 = vld [vmem:[#allocation2 + $0x12c0] sm:$0xff] }
 0x20c   : > { %3796 = vmatpush1.bf16.msra.mxu0 %v3795_v13  ;;  %3734 = vmatprep.subr.bf16.mxu1 %v3733_v14  ;;  %v3815_v13 = vpack.c.bf16 %v1813_v8, %v1804_v6  ;;  %v3753_v14 = vpack.c.bf16 %v1830_v10, %v1821_v9  ;;  %v3833_v6 = vpack.c.bf16 %v1618_v62, %v1609_v61  ;;  %v1627_v8 = vld [vmem:[#allocation2 + $0x1348] sm:$0xff]  ;;  %v1636_v9 = vld [vmem:[#allocation2 + $0x1390] sm:$0xff] }
 0x20d   : > { %3798 = vmatprep.subr.bf16.mxu0 %v3797_v21  ;;  %v3817_v21 = vpack.c.bf16 %v1832_v15, %v1823_v11  ;;  %v1629_v11 = vld [vmem:[#allocation2 + $0x1358] sm:$0xff]  ;;  %v1638_v15 = vld [vmem:[#allocation2 + $0x13a0] sm:$0xff]  ;;  %v1699_v61 = vld [vmem:[#allocation2 + $0x1588] sm:$0xff] }
 0x20e   : > { %v1708_v62 = vld [vmem:[#allocation2 + $0x15d0] sm:$0xff] }
 0x20f   : > { %3736 = vmatpush1.bf16.msra.mxu1 %v3735_v28  ;;  %v3755_v28 = vpack.c.bf16 %v1829_v19, %v1820_v16  ;;  %v1626_v16 = vld [vmem:[#allocation2 + $0x1340] sm:$0xff]  ;;  %v1635_v19 = vld [vmem:[#allocation2 + $0x1388] sm:$0xff] }
 0x210   : > { %3800 = vmatpush1.bf16.msra.mxu0 %v3799_v30  ;;  %3738 = vmatprep.subr.bf16.mxu1 %v3737_v31  ;;  %v3819_v30 = vpack.c.bf16 %v1831_v22, %v1822_v20  ;;  %v3757_v31 = vpack.c.bf16 %v1848_v26, %v1839_v24  ;;  %v1628_v20 = vld [vmem:[#allocation2 + $0x1350] sm:$0xff]  ;;  %v1637_v22 = vld [vmem:[#allocation2 + $0x1398] sm:$0xff]  ;;  %v1654_v26 = vld [vmem:[#allocation2 + $0x1420] sm:$0xff] }
 0x211   : > { %3802 = vmatprep.subr.bf16.mxu0 %v3801_v36  ;;  %v3821_v36 = vpack.c.bf16 %v1850_v27, %v1841_v0  ;;  %v1645_v24 = vld [vmem:[#allocation2 + $0x13d8] sm:$0xff]  ;;  %v1647_v0 = vld [vmem:[#allocation2 + $0x13e8] sm:$0xff]  ;;  %v1656_v27 = vld [vmem:[#allocation2 + $0x1430] sm:$0xff] }
 0x213   : > { %3740 = vmatpush1.bf16.msra.mxu1 %v3739_v25  ;;  %v3759_v25 = vpack.c.bf16 %v1847_v34, %v1838_v32  ;;  %v1644_v32 = vld [vmem:[#allocation2 + $0x13d0] sm:$0xff]  ;;  %v1653_v34 = vld [vmem:[#allocation2 + $0x1418] sm:$0xff] }
 0x214   : > { %3804 = vmatpush1.bf16.msra.mxu0 %v3803_v43  ;;  %3742 = vmatprep.subr.bf16.mxu1 %v3741_v17  ;;  %v3823_v43 = vpack.c.bf16 %v1849_v37, %v1840_v35  ;;  %v3761_v17 = vpack.c.bf16 %v1866_v40, %v1857_v39  ;;  %v1646_v35 = vld [vmem:[#allocation2 + $0x13e0] sm:$0xff]  ;;  %v1655_v37 = vld [vmem:[#allocation2 + $0x1428] sm:$0xff]  ;;  %v1672_v40 = vld [vmem:[#allocation2 + $0x14b0] sm:$0xff] }
 0x215   : > { %3806 = vmatprep.subr.bf16.mxu0 %v3805_v47  ;;  %v3825_v47 = vpack.c.bf16 %v1868_v42, %v1859_v41  ;;  %v1663_v39 = vld [vmem:[#allocation2 + $0x1468] sm:$0xff]  ;;  %v1665_v41 = vld [vmem:[#allocation2 + $0x1478] sm:$0xff]  ;;  %v1674_v42 = vld [vmem:[#allocation2 + $0x14c0] sm:$0xff] }
 0x217   : > { %3744 = vmatpush1.bf16.msra.mxu1 %v3743_v53  ;;  %v3763_v53 = vpack.c.bf16 %v1865_v45, %v1856_v44  ;;  %v1662_v44 = vld [vmem:[#allocation2 + $0x1460] sm:$0xff]  ;;  %v1671_v45 = vld [vmem:[#allocation2 + $0x14a8] sm:$0xff] }
 0x218   : > { %3808 = vmatpush1.bf16.msra.mxu0 %v3807_v54  ;;  %3746 = vmatprep.subr.bf16.mxu1 %v3745_v55  ;;  %v3827_v54 = vpack.c.bf16 %v1867_v48, %v1858_v46  ;;  %v3829_v55 = vpack.c.bf16 %v1600_v50, %v1591_v49  ;;  %v1664_v46 = vld [vmem:[#allocation2 + $0x1470] sm:$0xff]  ;;  %v1673_v48 = vld [vmem:[#allocation2 + $0x14b8] sm:$0xff]  ;;  %v1690_v50 = vld [vmem:[#allocation2 + $0x1540] sm:$0xff] }
 0x219   : > { %3810 = vmatprep.subr.bf16.mxu0 %v3809_v59  ;;  %v1592_v59 = vld [vmem:[#allocation2 + $0x1230] sm:$0xff]  ;;  %v1681_v49 = vld [vmem:[#allocation2 + $0x14f8] sm:$0xff] }
 0x21b   : > { %3748 = vmatpush1.bf16.msra.mxu1 %v3747_v1  ;;  %v1620_v1 = vld [vmem:[#allocation2 + $0x1310] sm:$0xff] }
 0x21c   : > { %3812 = vmatpush1.bf16.msra.mxu0 %v3811_v2  ;;  %3750 = vmatprep.subr.bf16.mxu1 %v3749_v3  ;;  %v3895_v2 = vpack.c.bf16 %v1601_v60, %v1592_v59  ;;  %v1608_v3 = vld [vmem:[#allocation2 + $0x12b0] sm:$0xff]  ;;  %v3897_v10 = vpack.c.bf16 %v1620_v1, %v1611_v63  ;;  %v3913_v59 = vpack.c.bf16 %v1692_v52, %v1683_v51  ;;  %v1691_v60 = vld [vmem:[#allocation2 + $0x1548] sm:$0xff]  ;;  %v1710_v63 = vld [vmem:[#allocation2 + $0x15e0] sm:$0xff] }
 0x21d   : > { %3814 = vmatprep.subr.bf16.mxu0 %v3813_v7  ;;  %v1619_v7 = vld [vmem:[#allocation2 + $0x1308] sm:$0xff]  ;;  %v3851_v1 = vpack.c.bf16 %v1689_v57, %v1680_v56 }
 0x21e   : > { %v1763_v51 = vld [vmem:[#allocation2 + $0x1788] sm:$0xff] }
 0x21f   : > { %3752 = vmatpush1.bf16.msra.mxu1 %v3751_v12  ;;  %v3835_v12 = vpack.c.bf16 %v1617_v4, %v1608_v3  ;;  %v3853_v3 = vpack.c.bf16 %v1708_v62, %v1699_v61  ;;  %v1698_v4 = vld [vmem:[#allocation2 + $0x1580] sm:$0xff]  ;;  %v1771_v52 = vld [vmem:[#allocation2 + $0x17c8] sm:$0xff]  ;;  %v1772_v61 = vld [vmem:[#allocation2 + $0x17d0] sm:$0xff] }
 0x220   : > { %3816 = vmatpush1.bf16.msra.mxu0 %v3815_v13  ;;  %3754 = vmatprep.subr.bf16.mxu1 %v3753_v14  ;;  %v3899_v13 = vpack.c.bf16 %v1619_v7, %v1610_v5  ;;  %v3837_v14 = vpack.c.bf16 %v1636_v9, %v1627_v8  ;;  %v1707_v5 = vld [vmem:[#allocation2 + $0x15c8] sm:$0xff]  ;;  %v1709_v9 = vld [vmem:[#allocation2 + $0x15d8] sm:$0xff] }
 0x221   : > { %3818 = vmatprep.subr.bf16.mxu0 %v3817_v21  ;;  %v3901_v21 = vpack.c.bf16 %v1638_v15, %v1629_v11  ;;  %v1726_v11 = vld [vmem:[#allocation2 + $0x1660] sm:$0xff] }
 0x223   : > { %3756 = vmatpush1.bf16.msra.mxu1 %v3755_v28  ;;  %v3839_v28 = vpack.c.bf16 %v1635_v19, %v1626_v16  ;;  %v3855_v16 = vpack.c.bf16 %v1707_v5, %v1698_v4 }
 0x224   : > { %3820 = vmatpush1.bf16.msra.mxu0 %v3819_v30  ;;  %3758 = vmatprep.subr.bf16.mxu1 %v3757_v31  ;;  %v3903_v30 = vpack.c.bf16 %v1637_v22, %v1628_v20  ;;  %v3841_v31 = vpack.c.bf16 %v1654_v26, %v1645_v24  ;;  %v1725_v22 = vld [vmem:[#allocation2 + $0x1658] sm:$0xff]  ;;  %v1718_v24 = vld [vmem:[#allocation2 + $0x1620] sm:$0xff] }
 0x225   : > { %3822 = vmatprep.subr.bf16.mxu0 %v3821_v36  ;;  %v3905_v36 = vpack.c.bf16 %v1656_v27, %v1647_v0  ;;  %v1727_v0 = vld [vmem:[#allocation2 + $0x1668] sm:$0xff] }
 0x226   : > { %v1735_v27 = vld [vmem:[#allocation2 + $0x16a8] sm:$0xff] }
 0x227   : > { %3760 = vmatpush1.bf16.msra.mxu1 %v3759_v25  ;;  %v3843_v25 = vpack.c.bf16 %v1653_v34, %v1644_v32  ;;  %v3923_v34 = vpack.c.bf16 %v1727_v0, %v1718_v24  ;;  %v1815_v24 = vld [vmem:[#allocation2 + $0x1928] sm:$0xff] }
 0x228   : > { %3824 = vmatpush1.bf16.msra.mxu0 %v3823_v43  ;;  %3762 = vmatprep.subr.bf16.mxu1 %v3761_v17  ;;  %v3907_v43 = vpack.c.bf16 %v1655_v37, %v1646_v35  ;;  %v3845_v17 = vpack.c.bf16 %v1672_v40, %v1663_v39  ;;  %v1743_v37 = vld [vmem:[#allocation2 + $0x16e8] sm:$0xff]  ;;  %v1736_v39 = vld [vmem:[#allocation2 + $0x16b0] sm:$0xff] }
 0x229   : > { %3826 = vmatprep.subr.bf16.mxu0 %v3825_v47  ;;  %v3909_v47 = vpack.c.bf16 %v1674_v42, %v1665_v41  ;;  %v1745_v41 = vld [vmem:[#allocation2 + $0x16f8] sm:$0xff] }
 0x22a   : > { %v1753_v42 = vld [vmem:[#allocation2 + $0x1738] sm:$0xff] }
 0x22b   : > { %3764 = vmatpush1.bf16.msra.mxu1 %v3763_v53  ;;  %v3847_v53 = vpack.c.bf16 %v1671_v45, %v1662_v44  ;;  %v3927_v45 = vpack.c.bf16 %v1745_v41, %v1736_v39  ;;  %v1833_v39 = vld [vmem:[#allocation2 + $0x19b8] sm:$0xff] }
 0x22c   : > { %3828 = vmatpush1.bf16.msra.mxu0 %v3827_v54  ;;  %3830 = vmatprep.subr.bf16.mxu1 %v3829_v55  ;;  %v3911_v54 = vpack.c.bf16 %v1673_v48, %v1664_v46  ;;  %v3849_v55 = vpack.c.bf16 %v1690_v50, %v1681_v49  ;;  %v1761_v48 = vld [vmem:[#allocation2 + $0x1778] sm:$0xff]  ;;  %v1754_v49 = vld [vmem:[#allocation2 + $0x1740] sm:$0xff] }
 0x22d   : > { %3894 = vmatprep.subr.bf16.mxu0 %v3893_v58  ;;  %v1682_v58 = vld [vmem:[#allocation2 + $0x1500] sm:$0xff]  ;;  %v3931_v57 = vpack.c.bf16 %v1763_v51, %v1754_v49  ;;  %v1851_v49 = vld [vmem:[#allocation2 + $0x1a48] sm:$0xff] }
 0x22e   : > { %1939 = vmatmul.mubr.f32.vlgmr.msra.gmra.mrb[0].mxu1 %v4482_v18 }
 0x22f   : > { %2010 = vmatmul.mubr.f32.vlgmr.msra.gmra.mrb[8].mxu0 %v4482_v18  ;;  %3832 = vmatpush1.bf16.msra.mxu1 %v3831_v29  ;;  %v1701_v29 = vld [vmem:[#allocation2 + $0x1598] sm:$0xff] }
 0x230   : > { %2080 = vmatprep.mubr.f32.mxu1 %v4484_v23  ;;  %3896 = vmatpush1.bf16.msra.mxu0 %v3895_v2  ;;  %v3915_v2 = vpack.c.bf16 %v1691_v60, %v1682_v58  ;;  %v3917_v8 = vpack.c.bf16 %v1710_v63, %v1701_v29  ;;  %v1779_v60 = vld [vmem:[#allocation2 + $0x1808] sm:$0xff]  ;;  %v1781_v29 = vld [vmem:[#allocation2 + $0x1818] sm:$0xff] }
 0x231   : > { %2151 = vmatprep.mubr.f32.mxu0 %v4484_v23  ;;  %3834 = vmatprep.subr.bf16.mxu1 %v3833_v6  ;;  %v1700_v6 = vld [vmem:[#allocation2 + $0x1590] sm:$0xff]  ;;  %v1789_v63 = vld [vmem:[#allocation2 + $0x1858] sm:$0xff]  ;;  %v3935_v5 = vpack.c.bf16 %v1781_v29, %v1772_v61 }
 0x232   : > { %3898 = vmatprep.subr.bf16.mxu0 %v3897_v10  ;;  %v1717_v10 = vld [vmem:[#allocation2 + $0x1618] sm:$0xff]  ;;  %v3919_v19 = vpack.c.bf16 %v1709_v9, %v1700_v6  ;;  %v1790_v9 = vld [vmem:[#allocation2 + $0x1860] sm:$0xff] }
 0x233   : > { %3836 = vmatpush1.bf16.msra.mxu1 %v3835_v12  ;;  %v1719_v12 = vld [vmem:[#allocation2 + $0x1628] sm:$0xff]  ;;  %v3857_v20 = vpack.c.bf16 %v1726_v11, %v1717_v10  ;;  %v1869_v61 = vld [vmem:[#allocation2 + $0x1ad8] sm:$0xff] }
 0x234   : > { %3900 = vmatpush1.bf16.msra.mxu0 %v3899_v13  ;;  %3838 = vmatprep.subr.bf16.mxu1 %v3837_v14  ;;  %v1728_v13 = vld [vmem:[#allocation2 + $0x1670] sm:$0xff]  ;;  %v1799_v11 = vld [vmem:[#allocation2 + $0x18a8] sm:$0xff] }
 0x235   : > { %3902 = vmatprep.subr.bf16.mxu0 %v3901_v21  ;;  %v1716_v21 = vld [vmem:[#allocation2 + $0x1610] sm:$0xff]  ;;  %v3921_v26 = vpack.c.bf16 %v1728_v13, %v1719_v12  ;;  %v1809_v13 = vld [vmem:[#allocation2 + $0x18f8] sm:$0xff] }
 0x236   : > { %v3859_v32 = vpack.c.bf16 %v1725_v22, %v1716_v21  ;;  %v1816_v12 = vld [vmem:[#allocation2 + $0x1930] sm:$0xff]  ;;  %v1806_v22 = vld [vmem:[#allocation2 + $0x18e0] sm:$0xff] }
 0x237   : > { %3840 = vmatpush1.bf16.msra.mxu1 %v3839_v28  ;;  %v1744_v28 = vld [vmem:[#allocation2 + $0x16f0] sm:$0xff] }
 0x238   : > { %3904 = vmatpush1.bf16.msra.mxu0 %v3903_v30  ;;  %3842 = vmatprep.subr.bf16.mxu1 %v3841_v31  ;;  %v1737_v30 = vld [vmem:[#allocation2 + $0x16b8] sm:$0xff]  ;;  %v1746_v31 = vld [vmem:[#allocation2 + $0x1700] sm:$0xff]  ;;  %v3861_v35 = vpack.c.bf16 %v1744_v28, %v1735_v27 }
 0x239   : > { %3906 = vmatprep.subr.bf16.mxu0 %v3905_v36  ;;  %v1734_v36 = vld [vmem:[#allocation2 + $0x16a0] sm:$0xff]  ;;  %v3925_v40 = vpack.c.bf16 %v1746_v31, %v1737_v30  ;;  %v1817_v27 = vld [vmem:[#allocation2 + $0x1938] sm:$0xff]  ;;  %v1827_v31 = vld [vmem:[#allocation2 + $0x1988] sm:$0xff] }
 0x23a   : > { %v3863_v44 = vpack.c.bf16 %v1743_v37, %v1734_v36  ;;  %v1825_v28 = vld [vmem:[#allocation2 + $0x1978] sm:$0xff]  ;;  %v1834_v30 = vld [vmem:[#allocation2 + $0x19c0] sm:$0xff]  ;;  %v1824_v37 = vld [vmem:[#allocation2 + $0x1970] sm:$0xff] }
 0x23b   : > { %3844 = vmatpush1.bf16.msra.mxu1 %v3843_v25  ;;  %v1762_v25 = vld [vmem:[#allocation2 + $0x1780] sm:$0xff]  ;;  %v3881_v36 = vpack.c.bf16 %v1834_v30, %v1825_v28  ;;  %v1783_v30 = vld [vmem:[#allocation2 + $0x1828] sm:$0xff] }
 0x23c   : > { %3908 = vmatpush1.bf16.msra.mxu0 %v3907_v43  ;;  %3846 = vmatprep.subr.bf16.mxu1 %v3845_v17  ;;  %v1755_v43 = vld [vmem:[#allocation2 + $0x1748] sm:$0xff]  ;;  %v1764_v17 = vld [vmem:[#allocation2 + $0x1790] sm:$0xff]  ;;  %v3865_v46 = vpack.c.bf16 %v1762_v25, %v1753_v42  ;;  %v1774_v28 = vld [vmem:[#allocation2 + $0x17e0] sm:$0xff] }
 0x23d   : > { %3910 = vmatprep.subr.bf16.mxu0 %v3909_v47  ;;  %v1752_v47 = vld [vmem:[#allocation2 + $0x1730] sm:$0xff]  ;;  %v3929_v50 = vpack.c.bf16 %v1764_v17, %v1755_v43  ;;  %v1835_v42 = vld [vmem:[#allocation2 + $0x19c8] sm:$0xff]  ;;  %v1845_v17 = vld [vmem:[#allocation2 + $0x1a18] sm:$0xff] }
 0x23e   : > { %v3867_v56 = vpack.c.bf16 %v1761_v48, %v1752_v47  ;;  %v1843_v25 = vld [vmem:[#allocation2 + $0x1a08] sm:$0xff]  ;;  %v1852_v43 = vld [vmem:[#allocation2 + $0x1a50] sm:$0xff]  ;;  %v1842_v48 = vld [vmem:[#allocation2 + $0x1a00] sm:$0xff] }
 0x23f   : > { %3848 = vmatpush1.bf16.msra.mxu1 %v3847_v53  ;;  %v1780_v53 = vld [vmem:[#allocation2 + $0x1810] sm:$0xff]  ;;  %v3885_v47 = vpack.c.bf16 %v1852_v43, %v1843_v25  ;;  %v2285_v25 = vld [vmem:[#allocation2 + $0x1c78] sm:$0xff] }
 0x240   : > { %3912 = vmatpush1.bf16.msra.mxu0 %v3911_v54  ;;  %3850 = vmatprep.subr.bf16.mxu1 %v3849_v55  ;;  %v1773_v54 = vld [vmem:[#allocation2 + $0x17d8] sm:$0xff]  ;;  %v1782_v55 = vld [vmem:[#allocation2 + $0x1820] sm:$0xff]  ;;  %v3869_v58 = vpack.c.bf16 %v1780_v53, %v1771_v52  ;;  %v1792_v43 = vld [vmem:[#allocation2 + $0x1870] sm:$0xff] }
 0x241   : > { %v3017_v7 = vpop.f32.mrb[4].mxu1  ;;  %3914 = vmatprep.subr.bf16.mxu0 %v3913_v59  ;;  %v1770_v59 = vld [vmem:[#allocation2 + $0x17c0] sm:$0xff]  ;;  %v3933_v62 = vpack.c.bf16 %v1782_v55, %v1773_v54  ;;  %v1853_v52 = vld [vmem:[#allocation2 + $0x1a58] sm:$0xff]  ;;  %v1863_v55 = vld [vmem:[#allocation2 + $0x1aa8] sm:$0xff] }
 0x242   : > { %v3018_v15 = vpop.f32.mrb[5].mxu1  ;;  %v3871_v4 = vpack.c.bf16 %v1779_v60, %v1770_v59  ;;  %v1861_v53 = vld [vmem:[#allocation2 + $0x1a98] sm:$0xff]  ;;  %v1870_v54 = vld [vmem:[#allocation2 + $0x1ae0] sm:$0xff]  ;;  %v1860_v60 = vld [vmem:[#allocation2 + $0x1a90] sm:$0xff] }
 0x243   : > { %v4506_v14 = vadd.f32 %v3018_v15, %v3017_v7  ;;  %3852 = vmatpush1.bf16.msra.mxu1 %v3851_v1  ;;  %v1798_v1 = vld [vmem:[#allocation2 + $0x18a0] sm:$0xff]  ;;  %v1788_v7 = vld [vmem:[#allocation2 + $0x1850] sm:$0xff]  ;;  %v1807_v15 = vld [vmem:[#allocation2 + $0x18e8] sm:$0xff]  ;;  %v3889_v59 = vpack.c.bf16 %v1870_v54, %v1861_v53 }
 0x244   : > { %3916 = vmatpush1.bf16.msra.mxu0 %v3915_v2  ;;  %3854 = vmatprep.subr.bf16.mxu1 %v3853_v3  ;;  %v1791_v2 = vld [vmem:[#allocation2 + $0x1868] sm:$0xff]  ;;  %v1800_v3 = vld [vmem:[#allocation2 + $0x18b0] sm:$0xff]  ;;  %v3873_v6 = vpack.c.bf16 %v1798_v1, %v1789_v63  ;;  %v3877_v21 = vpack.c.bf16 %v1816_v12, %v1807_v15  ;;  %v1738_v1 = vld [vmem:[#allocation2 + $0x16c0] sm:$0xff] }
 0x245   : > { %3918 = vmatprep.subr.bf16.mxu0 %v3917_v8  ;;  %v1797_v8 = vld [vmem:[#allocation2 + $0x1898] sm:$0xff]  ;;  %v3937_v10 = vpack.c.bf16 %v1800_v3, %v1791_v2  ;;  %v1871_v63 = vld [vmem:[#allocation2 + $0x1ae8] sm:$0xff]  ;;  %v1756_v12 = vld [vmem:[#allocation2 + $0x1750] sm:$0xff] }
 0x246   : > { %v1747_v2 = vld [vmem:[#allocation2 + $0x1708] sm:$0xff]  ;;  %v2241_v3 = vld [vmem:[#allocation2 + $0x1b18] sm:$0xff]  ;;  %v1810_v53 = vld [vmem:[#allocation2 + $0x1900] sm:$0xff] }
 0x247   : > { %3856 = vmatpush1.bf16.msra.mxu1 %v3855_v16  ;;  %v1818_v16 = vld [vmem:[#allocation2 + $0x1940] sm:$0xff]  ;;  %v2249_v15 = vld [vmem:[#allocation2 + $0x1b58] sm:$0xff]  ;;  %v1819_v54 = vld [vmem:[#allocation2 + $0x1948] sm:$0xff] }
 0x248   : > { %3920 = vmatpush1.bf16.msra.mxu0 %v3919_v19  ;;  %3858 = vmatprep.subr.bf16.mxu1 %v3857_v20  ;;  %v3875_v19 = vpack.c.bf16 %v1797_v8, %v1788_v7  ;;  %v3939_v20 = vpack.c.bf16 %v1799_v11, %v1790_v9  ;;  %v3941_v0 = vpack.c.bf16 %v1818_v16, %v1809_v13  ;;  %v1594_v8 = vld [vmem:[#allocation2 + $0x1240] sm:$0xff]  ;;  %v1603_v9 = vld [vmem:[#allocation2 + $0x1288] sm:$0xff]  ;;  %v2240_v11 = vld [vmem:[#allocation2 + $0x1b10] sm:$0xff] }
 0x249   : > { %3922 = vmatprep.subr.bf16.mxu0 %v3921_v26  ;;  %v1808_v26 = vld [vmem:[#allocation2 + $0x18f0] sm:$0xff]  ;;  %v3957_v7 = vpack.c.bf16 %v1747_v2, %v1738_v1  ;;  %v1765_v13 = vld [vmem:[#allocation2 + $0x1798] sm:$0xff]  ;;  %v3959_v16 = vpack.c.bf16 %v1603_v9, %v1594_v8 }
 0x24a   : > { %v1828_v1 = vld [vmem:[#allocation2 + $0x1990] sm:$0xff]  ;;  %v1837_v2 = vld [vmem:[#allocation2 + $0x19d8] sm:$0xff] }
 0x24b   : > { %3860 = vmatpush1.bf16.msra.mxu1 %v3859_v32  ;;  %v1836_v32 = vld [vmem:[#allocation2 + $0x19d0] sm:$0xff]  ;;  %v1693_v9 = vld [vmem:[#allocation2 + $0x1558] sm:$0xff] }
 0x24c   : > { %3924 = vmatpush1.bf16.msra.mxu0 %v3923_v34  ;;  %3862 = vmatprep.subr.bf16.mxu1 %v3861_v35  ;;  %v3879_v34 = vpack.c.bf16 %v1815_v24, %v1806_v22  ;;  %v3943_v35 = vpack.c.bf16 %v1817_v27, %v1808_v26  ;;  %v3945_v41 = vpack.c.bf16 %v1836_v32, %v1827_v31  ;;  %v1612_v22 = vld [vmem:[#allocation2 + $0x12d0] sm:$0xff]  ;;  %v1621_v24 = vld [vmem:[#allocation2 + $0x1318] sm:$0xff]  ;;  %v2258_v26 = vld [vmem:[#allocation2 + $0x1ba0] sm:$0xff] }
 0x24d   : > { %3926 = vmatprep.subr.bf16.mxu0 %v3925_v40  ;;  %v1826_v40 = vld [vmem:[#allocation2 + $0x1980] sm:$0xff]  ;;  %v2267_v27 = vld [vmem:[#allocation2 + $0x1be8] sm:$0xff]  ;;  %v2277_v32 = vld [vmem:[#allocation2 + $0x1c38] sm:$0xff] }
 0x24e   : > { %v1684_v8 = vld [vmem:[#allocation2 + $0x1510] sm:$0xff] }
 0x24f   : > { %3864 = vmatpush1.bf16.msra.mxu1 %v3863_v44  ;;  %v1854_v44 = vld [vmem:[#allocation2 + $0x1a60] sm:$0xff] }
 0x250   : > { %3928 = vmatpush1.bf16.msra.mxu0 %v3927_v45  ;;  %3866 = vmatprep.subr.bf16.mxu1 %v3865_v46  ;;  %v3883_v45 = vpack.c.bf16 %v1833_v39, %v1824_v37  ;;  %v3947_v46 = vpack.c.bf16 %v1835_v42, %v1826_v40  ;;  %v3949_v51 = vpack.c.bf16 %v1854_v44, %v1845_v17  ;;  %v1630_v39 = vld [vmem:[#allocation2 + $0x1360] sm:$0xff]  ;;  %v1639_v40 = vld [vmem:[#allocation2 + $0x13a8] sm:$0xff]  ;;  %v1801_v17 = vld [vmem:[#allocation2 + $0x18b8] sm:$0xff] }
 0x251   : > { %3930 = vmatprep.subr.bf16.mxu0 %v3929_v50  ;;  %v1844_v50 = vld [vmem:[#allocation2 + $0x1a10] sm:$0xff]  ;;  %v3965_v37 = vpack.c.bf16 %v1783_v30, %v1774_v28  ;;  %v2295_v44 = vld [vmem:[#allocation2 + $0x1cc8] sm:$0xff]  ;;  %v2357_v28 = vld [vmem:[#allocation2 + $0x1eb8] sm:$0xff] }
 0x252   : > { %v1864_v30 = vld [vmem:[#allocation2 + $0x1ab0] sm:$0xff] }
 0x253   : > { %3868 = vmatpush1.bf16.msra.mxu1 %v3867_v56  ;;  %v1872_v56 = vld [vmem:[#allocation2 + $0x1af0] sm:$0xff] }
 0x254   : > { %3932 = vmatpush1.bf16.msra.mxu0 %v3931_v57  ;;  %3870 = vmatprep.subr.bf16.mxu1 %v3869_v58  ;;  %v3887_v57 = vpack.c.bf16 %v1851_v49, %v1842_v48  ;;  %v3951_v58 = vpack.c.bf16 %v1853_v52, %v1844_v50  ;;  %v3953_v29 = vpack.c.bf16 %v1872_v56, %v1863_v55  ;;  %v1648_v48 = vld [vmem:[#allocation2 + $0x13f0] sm:$0xff]  ;;  %v1657_v49 = vld [vmem:[#allocation2 + $0x1438] sm:$0xff]  ;;  %v2294_v50 = vld [vmem:[#allocation2 + $0x1cc0] sm:$0xff] }
 0x255   : > { %3934 = vmatprep.subr.bf16.mxu0 %v3933_v62  ;;  %v1862_v62 = vld [vmem:[#allocation2 + $0x1aa0] sm:$0xff]  ;;  %v2303_v52 = vld [vmem:[#allocation2 + $0x1d08] sm:$0xff]  ;;  %v2313_v55 = vld [vmem:[#allocation2 + $0x1d58] sm:$0xff] }
 0x256   : > { %v2322_v56 = vld [vmem:[#allocation2 + $0x1da0] sm:$0xff] }
 0x257   : > { %3872 = vmatpush1.bf16.msra.mxu1 %v3871_v4  ;;  %v2250_v4 = vld [vmem:[#allocation2 + $0x1b60] sm:$0xff] }
 0x258   : > { %3936 = vmatpush1.bf16.msra.mxu0 %v3935_v5  ;;  %3874 = vmatprep.subr.bf16.mxu1 %v3873_v6  ;;  %v3891_v5 = vpack.c.bf16 %v1869_v61, %v1860_v60  ;;  %v3955_v6 = vpack.c.bf16 %v1871_v63, %v1862_v62  ;;  %v1666_v60 = vld [vmem:[#allocation2 + $0x1480] sm:$0xff]  ;;  %v1675_v61 = vld [vmem:[#allocation2 + $0x14c8] sm:$0xff]  ;;  %v2312_v62 = vld [vmem:[#allocation2 + $0x1d50] sm:$0xff] }
 0x259   : > { %3938 = vmatprep.subr.bf16.mxu0 %v3937_v10  ;;  %v4053_v10 = vpack.c.bf16 %v2250_v4, %v2241_v3  ;;  %v2321_v63 = vld [vmem:[#allocation2 + $0x1d98] sm:$0xff]  ;;  %v2331_v3 = vld [vmem:[#allocation2 + $0x1de8] sm:$0xff]  ;;  %v2340_v4 = vld [vmem:[#allocation2 + $0x1e30] sm:$0xff] }
 0x25b   : > { %3876 = vmatpush1.bf16.msra.mxu1 %v3875_v19  ;;  %v2259_v19 = vld [vmem:[#allocation2 + $0x1ba8] sm:$0xff] }
 0x25c   : > { %3940 = vmatpush1.bf16.msra.mxu0 %v3939_v20  ;;  %3878 = vmatprep.subr.bf16.mxu1 %v3877_v21  ;;  %v2268_v20 = vld [vmem:[#allocation2 + $0x1bf0] sm:$0xff]  ;;  %v4055_v21 = vpack.c.bf16 %v2249_v15, %v2240_v11  ;;  %v4073_v11 = vpack.c.bf16 %v2340_v4, %v2331_v3  ;;  %v2339_v15 = vld [vmem:[#allocation2 + $0x1e28] sm:$0xff]  ;;  %v2421_v3 = vld [vmem:[#allocation2 + $0x20b8] sm:$0xff] }
 0x25d   : > { %3942 = vmatprep.subr.bf16.mxu0 %v3941_v0  ;;  %v3961_v0 = vpack.c.bf16 %v1765_v13, %v1756_v12  ;;  %v4057_v31 = vpack.c.bf16 %v2268_v20, %v2259_v19  ;;  %v1846_v12 = vld [vmem:[#allocation2 + $0x1a20] sm:$0xff]  ;;  %v1855_v13 = vld [vmem:[#allocation2 + $0x1a68] sm:$0xff]  ;;  %v3979_v20 = vpack.c.bf16 %v1693_v9, %v1684_v8 }
 0x25e   : > { %v2358_v19 = vld [vmem:[#allocation2 + $0x1ec0] sm:$0xff]  ;;  %v2283_v9 = vld [vmem:[#allocation2 + $0x1c68] sm:$0xff] }
 0x25f   : > { %3880 = vmatpush1.bf16.msra.mxu1 %v3879_v34  ;;  %v2286_v34 = vld [vmem:[#allocation2 + $0x1c80] sm:$0xff] }
 0x260   : > { %3944 = vmatpush1.bf16.msra.mxu0 %v3943_v35  ;;  %3882 = vmatprep.subr.bf16.mxu1 %v3881_v36  ;;  %v3963_v35 = vpack.c.bf16 %v1621_v24, %v1612_v22  ;;  %v4059_v36 = vpack.c.bf16 %v2267_v27, %v2258_v26  ;;  %v4061_v42 = vpack.c.bf16 %v2286_v34, %v2277_v32  ;;  %v1702_v24 = vld [vmem:[#allocation2 + $0x15a0] sm:$0xff]  ;;  %v1711_v26 = vld [vmem:[#allocation2 + $0x15e8] sm:$0xff]  ;;  %v2376_v34 = vld [vmem:[#allocation2 + $0x1f50] sm:$0xff] }
 0x261   : > { %3946 = vmatprep.subr.bf16.mxu0 %v3945_v41  ;;  %v2276_v41 = vld [vmem:[#allocation2 + $0x1c30] sm:$0xff]  ;;  %v3981_v22 = vpack.c.bf16 %v1855_v13, %v1846_v12  ;;  %v2367_v32 = vld [vmem:[#allocation2 + $0x1f08] sm:$0xff]  ;;  %v2430_v4 = vld [vmem:[#allocation2 + $0x2100] sm:$0xff] }
 0x262   : > { %v2274_v8 = vld [vmem:[#allocation2 + $0x1c20] sm:$0xff]  ;;  %v2293_v12 = vld [vmem:[#allocation2 + $0x1cb8] sm:$0xff] }
 0x263   : > { %3884 = vmatpush1.bf16.msra.mxu1 %v3883_v45  ;;  %v2304_v45 = vld [vmem:[#allocation2 + $0x1d10] sm:$0xff]  ;;  %v2302_v13 = vld [vmem:[#allocation2 + $0x1d00] sm:$0xff] }
 0x264   : > { %3948 = vmatpush1.bf16.msra.mxu0 %v3947_v46  ;;  %3886 = vmatprep.subr.bf16.mxu1 %v3885_v47  ;;  %v3967_v46 = vpack.c.bf16 %v1639_v40, %v1630_v39  ;;  %v3969_v47 = vpack.c.bf16 %v1801_v17, %v1792_v43  ;;  %v1720_v39 = vld [vmem:[#allocation2 + $0x1630] sm:$0xff]  ;;  %v1729_v40 = vld [vmem:[#allocation2 + $0x1678] sm:$0xff]  ;;  %v2239_v43 = vld [vmem:[#allocation2 + $0x1b08] sm:$0xff] }
 0x265   : > { %3950 = vmatprep.subr.bf16.mxu0 %v3949_v51  ;;  %v4065_v51 = vpack.c.bf16 %v2304_v45, %v2295_v44  ;;  %v2248_v17 = vld [vmem:[#allocation2 + $0x1b50] sm:$0xff]  ;;  %v2385_v44 = vld [vmem:[#allocation2 + $0x1f98] sm:$0xff]  ;;  %v2394_v45 = vld [vmem:[#allocation2 + $0x1fe0] sm:$0xff] }
 0x267   : > { %3888 = vmatpush1.bf16.msra.mxu1 %v3887_v57  ;;  %v3971_v57 = vpack.c.bf16 %v1657_v49, %v1648_v48  ;;  %v2238_v48 = vld [vmem:[#allocation2 + $0x1b00] sm:$0xff]  ;;  %v2247_v49 = vld [vmem:[#allocation2 + $0x1b48] sm:$0xff] }
 0x268   : > { %3952 = vmatpush1.bf16.msra.mxu0 %v3951_v58  ;;  %3890 = vmatprep.subr.bf16.mxu1 %v3889_v59  ;;  %v4067_v58 = vpack.c.bf16 %v2303_v52, %v2294_v50  ;;  %v3973_v59 = vpack.c.bf16 %v1819_v54, %v1810_v53  ;;  %v2384_v50 = vld [vmem:[#allocation2 + $0x1f90] sm:$0xff]  ;;  %v2393_v52 = vld [vmem:[#allocation2 + $0x1fd8] sm:$0xff]  ;;  %v2266_v54 = vld [vmem:[#allocation2 + $0x1be0] sm:$0xff] }
 0x269   : > { %3954 = vmatprep.subr.bf16.mxu0 %v3953_v29  ;;  %v4069_v29 = vpack.c.bf16 %v2322_v56, %v2313_v55  ;;  %v2257_v53 = vld [vmem:[#allocation2 + $0x1b98] sm:$0xff]  ;;  %v2403_v55 = vld [vmem:[#allocation2 + $0x2028] sm:$0xff]  ;;  %v2412_v56 = vld [vmem:[#allocation2 + $0x2070] sm:$0xff] }
 0x26b   : > { %3892 = vmatpush1.bf16.msra.mxu1 %v3891_v5  ;;  %v3975_v5 = vpack.c.bf16 %v1675_v61, %v1666_v60  ;;  %v2256_v60 = vld [vmem:[#allocation2 + $0x1b90] sm:$0xff]  ;;  %v2265_v61 = vld [vmem:[#allocation2 + $0x1bd8] sm:$0xff] }
 0x26c   : > { %3956 = vmatpush1.bf16.msra.mxu0 %v3955_v6  ;;  %3958 = vmatprep.subr.bf16.mxu1 %v3957_v7  ;;  %v4071_v6 = vpack.c.bf16 %v2321_v63, %v2312_v62  ;;  %v3977_v7 = vpack.c.bf16 %v1837_v2, %v1828_v1  ;;  %v2402_v62 = vld [vmem:[#allocation2 + $0x2020] sm:$0xff]  ;;  %v2411_v63 = vld [vmem:[#allocation2 + $0x2068] sm:$0xff]  ;;  %v2284_v2 = vld [vmem:[#allocation2 + $0x1c70] sm:$0xff] }
 0x26d   : > { %4054 = vmatprep.subr.bf16.mxu0 %v4053_v10  ;;  %v2330_v10 = vld [vmem:[#allocation2 + $0x1de0] sm:$0xff]  ;;  %v2275_v1 = vld [vmem:[#allocation2 + $0x1c28] sm:$0xff] }
 0x26e   : > { %2081 = vmatmul.mubr.f32.vlgmr.msra.gmra.mrb[2].mxu1 %v4482_v18 }
 0x26f   : > { %2152 = vmatmul.mubr.f32.vlgmr.msra.gmra.mrb[10].mxu0 %v4482_v18  ;;  %3960 = vmatpush3.bf16.msra.mxu1 %v3959_v16  ;;  %v2349_v16 = vld [vmem:[#allocation2 + $0x1e78] sm:$0xff] }
 0x270   : > { %2222 = vmatprep.mubr.f32.mxu1 %v4484_v23  ;;  %4056 = vmatpush1.bf16.msra.mxu0 %v4055_v21  ;;  %v4063_v23 = vpack.c.bf16 %v2285_v25, %v2276_v41  ;;  %v4075_v21 = vpack.c.bf16 %v2339_v15, %v2330_v10  ;;  %v4077_v27 = vpack.c.bf16 %v2358_v19, %v2349_v16  ;;  %v2366_v41 = vld [vmem:[#allocation2 + $0x1f00] sm:$0xff]  ;;  %v2375_v25 = vld [vmem:[#allocation2 + $0x1f48] sm:$0xff]  ;;  %v2420_v10 = vld [vmem:[#allocation2 + $0x20b0] sm:$0xff] }
 0x271   : > { %2661 = vmatprep.mubr.f32.mxu0 %v4488_v38  ;;  %3962 = vmatprep.subr.bf16.mxu1 %v3961_v0  ;;  %v2348_v0 = vld [vmem:[#allocation2 + $0x1e70] sm:$0xff]  ;;  %v2429_v15 = vld [vmem:[#allocation2 + $0x20f8] sm:$0xff]  ;;  %v2439_v16 = vld [vmem:[#allocation2 + $0x2148] sm:$0xff]  ;;  %v3999_v19 = vpack.c.bf16 %v2283_v9, %v2274_v8 }
 0x272   : > { %4058 = vmatprep.subr.bf16.mxu0 %v4057_v31  ;;  %v1873_v31 = vld [vmem:[#allocation2 + $0x1af8] sm:$0xff]  ;;  %v2510_v9 = vld [vmem:[#allocation2 + $0x2380] sm:$0xff] }
 0x273   : > { %3964 = vmatpush3.bf16.msra.mxu1 %v3963_v35  ;;  %v3983_v35 = vpack.c.bf16 %v1711_v26, %v1702_v24  ;;  %v2301_v24 = vld [vmem:[#allocation2 + $0x1cf8] sm:$0xff]  ;;  %v2438_v26 = vld [vmem:[#allocation2 + $0x2140] sm:$0xff] }
 0x274   : > { %4060 = vmatpush1.bf16.msra.mxu0 %v4059_v36  ;;  %3966 = vmatprep.subr.bf16.mxu1 %v3965_v37  ;;  %v4079_v36 = vpack.c.bf16 %v2357_v28, %v2348_v0  ;;  %v3985_v37 = vpack.c.bf16 %v1873_v31, %v1864_v30  ;;  %v2311_v28 = vld [vmem:[#allocation2 + $0x1d48] sm:$0xff]  ;;  %v2320_v30 = vld [vmem:[#allocation2 + $0x1d90] sm:$0xff]  ;;  %v2457_v31 = vld [vmem:[#allocation2 + $0x21d8] sm:$0xff] }
 0x275   : > { %4062 = vmatprep.subr.bf16.mxu0 %v4061_v42  ;;  %v4081_v42 = vpack.c.bf16 %v2376_v34, %v2367_v32  ;;  %v2466_v32 = vld [vmem:[#allocation2 + $0x2220] sm:$0xff]  ;;  %v2373_v8 = vld [vmem:[#allocation2 + $0x1f38] sm:$0xff] }
 0x277   : > { %3968 = vmatpush3.bf16.msra.mxu1 %v3967_v46  ;;  %v3987_v46 = vpack.c.bf16 %v1729_v40, %v1720_v39  ;;  %v2319_v39 = vld [vmem:[#allocation2 + $0x1d88] sm:$0xff]  ;;  %v2456_v40 = vld [vmem:[#allocation2 + $0x21d0] sm:$0xff] }
 0x278   : > { %4064 = vmatpush1.bf16.msra.mxu0 %v4063_v23  ;;  %3970 = vmatprep.subr.bf16.mxu1 %v3969_v47  ;;  %v4083_v23 = vpack.c.bf16 %v2375_v25, %v2366_v41  ;;  %v3989_v47 = vpack.c.bf16 %v2248_v17, %v2239_v43  ;;  %v4101_v41 = vpack.c.bf16 %v2466_v32, %v2457_v31  ;;  %v2329_v25 = vld [vmem:[#allocation2 + $0x1dd8] sm:$0xff]  ;;  %v2338_v43 = vld [vmem:[#allocation2 + $0x1e20] sm:$0xff]  ;;  %v2475_v17 = vld [vmem:[#allocation2 + $0x2268] sm:$0xff] }
 0x279   : > { %4066 = vmatprep.subr.bf16.mxu0 %v4065_v51  ;;  %v4085_v51 = vpack.c.bf16 %v2394_v45, %v2385_v44  ;;  %v2484_v44 = vld [vmem:[#allocation2 + $0x22b0] sm:$0xff] }
 0x27a   : > { %v2272_v31 = vld [vmem:[#allocation2 + $0x1c10] sm:$0xff] }
 0x27b   : > { %3972 = vmatpush3.bf16.msra.mxu1 %v3971_v57  ;;  %v3991_v57 = vpack.c.bf16 %v2247_v49, %v2238_v48  ;;  %v2337_v48 = vld [vmem:[#allocation2 + $0x1e18] sm:$0xff]  ;;  %v2474_v49 = vld [vmem:[#allocation2 + $0x2260] sm:$0xff] }
 0x27c   : > { %4068 = vmatpush1.bf16.msra.mxu0 %v4067_v58  ;;  %3974 = vmatprep.subr.bf16.mxu1 %v3973_v59  ;;  %v4087_v58 = vpack.c.bf16 %v2393_v52, %v2384_v50  ;;  %v3993_v59 = vpack.c.bf16 %v2266_v54, %v2257_v53  ;;  %v4105_v50 = vpack.c.bf16 %v2484_v44, %v2475_v17  ;;  %v2347_v52 = vld [vmem:[#allocation2 + $0x1e68] sm:$0xff]  ;;  %v2356_v53 = vld [vmem:[#allocation2 + $0x1eb0] sm:$0xff]  ;;  %v2493_v54 = vld [vmem:[#allocation2 + $0x22f8] sm:$0xff] }
 0x27d   : > { %4070 = vmatprep.subr.bf16.mxu0 %v4069_v29  ;;  %v4089_v29 = vpack.c.bf16 %v2412_v56, %v2403_v55  ;;  %v2502_v55 = vld [vmem:[#allocation2 + $0x2340] sm:$0xff] }
 0x27e   : > { %v2290_v17 = vld [vmem:[#allocation2 + $0x1ca0] sm:$0xff] }
 0x27f   : > { %3976 = vmatpush3.bf16.msra.mxu1 %v3975_v5  ;;  %v3995_v5 = vpack.c.bf16 %v2265_v61, %v2256_v60  ;;  %v2355_v60 = vld [vmem:[#allocation2 + $0x1ea8] sm:$0xff]  ;;  %v2492_v61 = vld [vmem:[#allocation2 + $0x22f0] sm:$0xff] }
 0x280   : > { %4072 = vmatpush1.bf16.msra.mxu0 %v4071_v6  ;;  %3978 = vmatprep.subr.bf16.mxu1 %v3977_v7  ;;  %v4091_v6 = vpack.c.bf16 %v2411_v63, %v2402_v62  ;;  %v3997_v7 = vpack.c.bf16 %v2284_v2, %v2275_v1  ;;  %v4109_v62 = vpack.c.bf16 %v2502_v55, %v2493_v54  ;;  %v2365_v63 = vld [vmem:[#allocation2 + $0x1ef8] sm:$0xff]  ;;  %v2374_v1 = vld [vmem:[#allocation2 + $0x1f40] sm:$0xff]  ;;  %v2511_v2 = vld [vmem:[#allocation2 + $0x2388] sm:$0xff] }
 0x281   : > { %4074 = vmatprep.subr.bf16.mxu0 %v4073_v11  ;;  %v4093_v11 = vpack.c.bf16 %v2430_v4, %v2421_v3  ;;  %v2520_v3 = vld [vmem:[#allocation2 + $0x23d0] sm:$0xff] }
 0x282   : > { %v2308_v54 = vld [vmem:[#allocation2 + $0x1d30] sm:$0xff] }
 0x283   : > { %3980 = vmatpush3.bf16.msra.mxu1 %v3979_v20  ;;  %v4095_v20 = vpack.c.bf16 %v2429_v15, %v2420_v10  ;;  %v4113_v10 = vpack.c.bf16 %v2520_v3, %v2511_v2  ;;  %v2383_v15 = vld [vmem:[#allocation2 + $0x1f88] sm:$0xff]  ;;  %v2326_v2 = vld [vmem:[#allocation2 + $0x1dc0] sm:$0xff] }
 0x284   : > { %4076 = vmatpush1.bf16.msra.mxu0 %v4075_v21  ;;  %3982 = vmatprep.subr.bf16.mxu1 %v3981_v22  ;;  %v4001_v21 = vpack.c.bf16 %v2302_v13, %v2293_v12  ;;  %v2292_v22 = vld [vmem:[#allocation2 + $0x1cb0] sm:$0xff]  ;;  %v2245_v13 = vld [vmem:[#allocation2 + $0x1b38] sm:$0xff] }
 0x285   : > { %4078 = vmatprep.subr.bf16.mxu0 %v4077_v27  ;;  %v2447_v27 = vld [vmem:[#allocation2 + $0x2188] sm:$0xff]  ;;  %v4003_v34 = vpack.c.bf16 %v2301_v24, %v2292_v22  ;;  %v2392_v12 = vld [vmem:[#allocation2 + $0x1fd0] sm:$0xff] }
 0x286   : > { %v2391_v22 = vld [vmem:[#allocation2 + $0x1fc8] sm:$0xff] }
 0x287   : > { %3984 = vmatpush3.bf16.msra.mxu1 %v3983_v35  ;;  %v4099_v35 = vpack.c.bf16 %v2447_v27, %v2438_v26  ;;  %v2244_v26 = vld [vmem:[#allocation2 + $0x1b30] sm:$0xff]  ;;  %v2401_v27 = vld [vmem:[#allocation2 + $0x2018] sm:$0xff] }
 0x288   : > { %4080 = vmatpush1.bf16.msra.mxu0 %v4079_v36  ;;  %3986 = vmatprep.subr.bf16.mxu1 %v3985_v37  ;;  %v4005_v36 = vpack.c.bf16 %v2320_v30, %v2311_v28  ;;  %v2310_v37 = vld [vmem:[#allocation2 + $0x1d40] sm:$0xff]  ;;  %v2263_v30 = vld [vmem:[#allocation2 + $0x1bc8] sm:$0xff] }
 0x289   : > { %4082 = vmatprep.subr.bf16.mxu0 %v4081_v42  ;;  %v2465_v42 = vld [vmem:[#allocation2 + $0x2218] sm:$0xff]  ;;  %v4007_v45 = vpack.c.bf16 %v2319_v39, %v2310_v37  ;;  %v2410_v28 = vld [vmem:[#allocation2 + $0x2060] sm:$0xff] }
 0x28a   : > { %v2262_v37 = vld [vmem:[#allocation2 + $0x1bc0] sm:$0xff]  ;;  %v4025_v39 = vpack.c.bf16 %v2410_v28, %v2401_v27  ;;  %v2500_v27 = vld [vmem:[#allocation2 + $0x2330] sm:$0xff]  ;;  %v2353_v28 = vld [vmem:[#allocation2 + $0x1e98] sm:$0xff] }
 0x28b   : > { %3988 = vmatpush3.bf16.msra.mxu1 %v3987_v46  ;;  %v4103_v46 = vpack.c.bf16 %v2465_v42, %v2456_v40  ;;  %v4185_v40 = vpack.c.bf16 %v2272_v31, %v2263_v30  ;;  %v2419_v42 = vld [vmem:[#allocation2 + $0x20a8] sm:$0xff]  ;;  %v2362_v30 = vld [vmem:[#allocation2 + $0x1ee0] sm:$0xff] }
 0x28c   : > { %4084 = vmatpush1.bf16.msra.mxu0 %v4083_v23  ;;  %3990 = vmatprep.subr.bf16.mxu1 %v3989_v47  ;;  %v4009_v23 = vpack.c.bf16 %v2338_v43, %v2329_v25  ;;  %v2328_v47 = vld [vmem:[#allocation2 + $0x1dd0] sm:$0xff]  ;;  %v2281_v43 = vld [vmem:[#allocation2 + $0x1c58] sm:$0xff] }
 0x28d   : > { %4086 = vmatprep.subr.bf16.mxu0 %v4085_v51  ;;  %v2483_v51 = vld [vmem:[#allocation2 + $0x22a8] sm:$0xff]  ;;  %v4011_v56 = vpack.c.bf16 %v2337_v48, %v2328_v47  ;;  %v2428_v25 = vld [vmem:[#allocation2 + $0x20f0] sm:$0xff] }
 0x28e   : > { %2223 = vmatmul.mubr.f32.vlgmr.msra.gmra.mrb[6].mxu1 %v4482_v18  ;;  %v2448_v18 = vld [vmem:[#allocation2 + $0x2190] sm:$0xff]  ;;  %v2427_v47 = vld [vmem:[#allocation2 + $0x20e8] sm:$0xff] }
 0x28f   : > { %3992 = vmatpush1.bf16.msra.mxu1 %v3991_v57  ;;  %2590 = vmatprep.mubr.f32.mxu1 %v4488_v38  ;;  %v4097_v0 = vpack.c.bf16 %v2448_v18, %v2439_v16  ;;  %v4107_v57 = vpack.c.bf16 %v2483_v51, %v2474_v49  ;;  %v2254_v16 = vld [vmem:[#allocation2 + $0x1b80] sm:$0xff]  ;;  %v2280_v48 = vld [vmem:[#allocation2 + $0x1c50] sm:$0xff]  ;;  %v4189_v49 = vpack.c.bf16 %v2290_v17, %v2281_v43  ;;  %v2437_v51 = vld [vmem:[#allocation2 + $0x2138] sm:$0xff] }
 0x290   : > { %4088 = vmatpush1.bf16.msra.mxu0 %v4087_v58  ;;  %3994 = vmatprep.subr.bf16.mxu1 %v3993_v59  ;;  %v4013_v58 = vpack.c.bf16 %v2356_v53, %v2347_v52  ;;  %v2346_v59 = vld [vmem:[#allocation2 + $0x1e60] sm:$0xff]  ;;  %v4181_v24 = vpack.c.bf16 %v2254_v16, %v2245_v13  ;;  %v2299_v53 = vld [vmem:[#allocation2 + $0x1ce8] sm:$0xff]  ;;  %v2344_v13 = vld [vmem:[#allocation2 + $0x1e50] sm:$0xff] }
 0x291   : > { %4090 = vmatprep.subr.bf16.mxu0 %v4089_v29  ;;  %v2501_v29 = vld [vmem:[#allocation2 + $0x2338] sm:$0xff]  ;;  %v4015_v4 = vpack.c.bf16 %v2355_v60, %v2346_v59  ;;  %v2446_v52 = vld [vmem:[#allocation2 + $0x2180] sm:$0xff]  ;;  %v2371_v43 = vld [vmem:[#allocation2 + $0x1f28] sm:$0xff] }
 0x292   : > { %v2445_v59 = vld [vmem:[#allocation2 + $0x2178] sm:$0xff]  ;;  %v2298_v60 = vld [vmem:[#allocation2 + $0x1ce0] sm:$0xff]  ;;  %v2380_v17 = vld [vmem:[#allocation2 + $0x1f70] sm:$0xff] }
 0x293   : > { %3996 = vmatpush1.bf16.msra.mxu1 %v3995_v5  ;;  %v4111_v5 = vpack.c.bf16 %v2501_v29, %v2492_v61  ;;  %v4193_v61 = vpack.c.bf16 %v2308_v54, %v2299_v53  ;;  %v2455_v29 = vld [vmem:[#allocation2 + $0x21c8] sm:$0xff]  ;;  %v2252_v54 = vld [vmem:[#allocation2 + $0x1b70] sm:$0xff] }
 0x294   : > { %4092 = vmatpush1.bf16.msra.mxu0 %v4091_v6  ;;  %3998 = vmatprep.subr.bf16.mxu1 %v3997_v7  ;;  %v4017_v6 = vpack.c.bf16 %v2374_v1, %v2365_v63  ;;  %v2364_v7 = vld [vmem:[#allocation2 + $0x1ef0] sm:$0xff]  ;;  %v2317_v1 = vld [vmem:[#allocation2 + $0x1d78] sm:$0xff]  ;;  %v2243_v53 = vld [vmem:[#allocation2 + $0x1b28] sm:$0xff] }
 0x295   : > { %4094 = vmatprep.subr.bf16.mxu0 %v4093_v11  ;;  %v2519_v11 = vld [vmem:[#allocation2 + $0x23c8] sm:$0xff]  ;;  %v4019_v18 = vpack.c.bf16 %v2373_v8, %v2364_v7  ;;  %v2464_v63 = vld [vmem:[#allocation2 + $0x2210] sm:$0xff] }
 0x296   : > { %v2463_v7 = vld [vmem:[#allocation2 + $0x2208] sm:$0xff]  ;;  %v2316_v8 = vld [vmem:[#allocation2 + $0x1d70] sm:$0xff] }
 0x297   : > { %4000 = vmatpush1.bf16.msra.mxu1 %v3999_v19  ;;  %v4115_v19 = vpack.c.bf16 %v2519_v11, %v2510_v9  ;;  %v4197_v9 = vpack.c.bf16 %v2326_v2, %v2317_v1  ;;  %v2473_v11 = vld [vmem:[#allocation2 + $0x2258] sm:$0xff] }
 0x298   : > { %4096 = vmatpush1.bf16.msra.mxu0 %v4095_v20  ;;  %4002 = vmatprep.subr.bf16.mxu1 %v4001_v21  ;;  %v4021_v20 = vpack.c.bf16 %v2392_v12, %v2383_v15  ;;  %v2382_v21 = vld [vmem:[#allocation2 + $0x1f80] sm:$0xff]  ;;  %v2335_v12 = vld [vmem:[#allocation2 + $0x1e08] sm:$0xff]  ;;  %v2397_v1 = vld [vmem:[#allocation2 + $0x1ff8] sm:$0xff] }
 0x299   : > { %4098 = vmatprep.subr.bf16.mxu0 %v4097_v0  ;;  %v2253_v0 = vld [vmem:[#allocation2 + $0x1b78] sm:$0xff]  ;;  %v4023_v32 = vpack.c.bf16 %v2391_v22, %v2382_v21  ;;  %v2482_v15 = vld [vmem:[#allocation2 + $0x22a0] sm:$0xff] }
 0x29a   : > { %v2481_v21 = vld [vmem:[#allocation2 + $0x2298] sm:$0xff]  ;;  %v2334_v22 = vld [vmem:[#allocation2 + $0x1e00] sm:$0xff] }
 0x29b   : > { %4004 = vmatpush1.bf16.msra.mxu1 %v4003_v34  ;;  %v4183_v34 = vpack.c.bf16 %v2253_v0, %v2244_v26  ;;  %v2343_v26 = vld [vmem:[#allocation2 + $0x1e48] sm:$0xff]  ;;  %v2261_v2 = vld [vmem:[#allocation2 + $0x1bb8] sm:$0xff] }
 0x29c   : > { %4100 = vmatpush1.bf16.msra.mxu0 %v4099_v35  ;;  %4006 = vmatprep.subr.bf16.mxu1 %v4005_v36  ;;  %v2400_v35 = vld [vmem:[#allocation2 + $0x2010] sm:$0xff]  ;;  %v2409_v36 = vld [vmem:[#allocation2 + $0x2058] sm:$0xff]  ;;  %v2491_v0 = vld [vmem:[#allocation2 + $0x22e8] sm:$0xff] }
 0x29d   : > { %4102 = vmatprep.subr.bf16.mxu0 %v4101_v41  ;;  %v2271_v41 = vld [vmem:[#allocation2 + $0x1c08] sm:$0xff]  ;;  %v4027_v44 = vpack.c.bf16 %v2409_v36, %v2400_v35  ;;  %v2490_v35 = vld [vmem:[#allocation2 + $0x22e0] sm:$0xff] }
 0x29e   : > { %v2499_v36 = vld [vmem:[#allocation2 + $0x2328] sm:$0xff] }
 0x29f   : > { %4008 = vmatpush1.bf16.msra.mxu1 %v4007_v45  ;;  %v4187_v45 = vpack.c.bf16 %v2271_v41, %v2262_v37  ;;  %v2352_v37 = vld [vmem:[#allocation2 + $0x1e90] sm:$0xff]  ;;  %v2509_v41 = vld [vmem:[#allocation2 + $0x2378] sm:$0xff] }
 0x2a0   : > { %4104 = vmatpush1.bf16.msra.mxu0 %v4103_v46  ;;  %4010 = vmatprep.subr.bf16.mxu1 %v4009_v23  ;;  %v4029_v46 = vpack.c.bf16 %v2428_v25, %v2419_v42  ;;  %v2418_v23 = vld [vmem:[#allocation2 + $0x20a0] sm:$0xff] }
 0x2a1   : > { %4106 = vmatprep.subr.bf16.mxu0 %v4105_v50  ;;  %v2289_v50 = vld [vmem:[#allocation2 + $0x1c98] sm:$0xff]  ;;  %v4031_v55 = vpack.c.bf16 %v2427_v47, %v2418_v23  ;;  %v2518_v42 = vld [vmem:[#allocation2 + $0x23c0] sm:$0xff] }
 0x2a2   : > { %v4049_v47 = vpack.c.bf16 %v2518_v42, %v2509_v41  ;;  %v2451_v42 = vld [vmem:[#allocation2 + $0x21a8] sm:$0xff] }
 0x2a3   : > { %4012 = vmatpush1.bf16.msra.mxu1 %v4011_v56  ;;  %v4191_v56 = vpack.c.bf16 %v2289_v50, %v2280_v48  ;;  %v2508_v48 = vld [vmem:[#allocation2 + $0x2370] sm:$0xff]  ;;  %v2370_v50 = vld [vmem:[#allocation2 + $0x1f20] sm:$0xff] }
 0x2a4   : > { %4108 = vmatpush1.bf16.msra.mxu0 %v4107_v57  ;;  %4014 = vmatprep.subr.bf16.mxu1 %v4013_v58  ;;  %v4033_v57 = vpack.c.bf16 %v2446_v52, %v2437_v51  ;;  %v2436_v58 = vld [vmem:[#allocation2 + $0x2130] sm:$0xff]  ;;  %v4209_v51 = vpack.c.bf16 %v2380_v17, %v2371_v43  ;;  %v2379_v52 = vld [vmem:[#allocation2 + $0x1f68] sm:$0xff]  ;;  %v2461_v17 = vld [vmem:[#allocation2 + $0x21f8] sm:$0xff] }
 0x2a5   : > { %4110 = vmatprep.subr.bf16.mxu0 %v4109_v62  ;;  %v2307_v62 = vld [vmem:[#allocation2 + $0x1d28] sm:$0xff]  ;;  %v4035_v3 = vpack.c.bf16 %v2445_v59, %v2436_v58  ;;  %v4211_v59 = vpack.c.bf16 %v2379_v52, %v2370_v50  ;;  %v2324_v43 = vld [vmem:[#allocation2 + $0x1db0] sm:$0xff]  ;;  %v2333_v52 = vld [vmem:[#allocation2 + $0x1df8] sm:$0xff] }
 0x2a7   : > { %4016 = vmatpush1.bf16.msra.mxu1 %v4015_v4  ;;  %v4195_v4 = vpack.c.bf16 %v2307_v62, %v2298_v60  ;;  %v4117_v60 = vpack.c.bf16 %v2252_v54, %v2243_v53  ;;  %v2251_v62 = vld [vmem:[#allocation2 + $0x1b68] sm:$0xff]  ;;  %v2342_v53 = vld [vmem:[#allocation2 + $0x1e40] sm:$0xff] }
 0x2a8   : > { %4112 = vmatpush1.bf16.msra.mxu0 %v4111_v5  ;;  %4018 = vmatprep.subr.bf16.mxu1 %v4017_v6  ;;  %v4037_v5 = vpack.c.bf16 %v2464_v63, %v2455_v29  ;;  %v2454_v6 = vld [vmem:[#allocation2 + $0x21c0] sm:$0xff]  ;;  %v2388_v29 = vld [vmem:[#allocation2 + $0x1fb0] sm:$0xff]  ;;  %v2479_v54 = vld [vmem:[#allocation2 + $0x2288] sm:$0xff] }
 0x2a9   : > { %4114 = vmatprep.subr.bf16.mxu0 %v4113_v10  ;;  %v2325_v10 = vld [vmem:[#allocation2 + $0x1db8] sm:$0xff]  ;;  %v4039_v16 = vpack.c.bf16 %v2463_v7, %v2454_v6  ;;  %v4215_v6 = vpack.c.bf16 %v2397_v1, %v2388_v29  ;;  %v2351_v1 = vld [vmem:[#allocation2 + $0x1e88] sm:$0xff] }
 0x2ab   : > { %4020 = vmatpush1.bf16.msra.mxu1 %v4019_v18  ;;  %v4199_v18 = vpack.c.bf16 %v2325_v10, %v2316_v8  ;;  %v2260_v8 = vld [vmem:[#allocation2 + $0x1bb0] sm:$0xff]  ;;  %v2406_v10 = vld [vmem:[#allocation2 + $0x2040] sm:$0xff] }
 0x2ac   : > { %4116 = vmatpush1.bf16.msra.mxu0 %v4115_v19  ;;  %4022 = vmatprep.subr.bf16.mxu1 %v4021_v20  ;;  %v4041_v19 = vpack.c.bf16 %v2482_v15, %v2473_v11  ;;  %v2472_v20 = vld [vmem:[#allocation2 + $0x2250] sm:$0xff]  ;;  %v2415_v15 = vld [vmem:[#allocation2 + $0x2088] sm:$0xff] }
 0x2ad   : > { %4182 = vmatprep.subr.bf16.mxu0 %v4181_v24  ;;  %v4201_v24 = vpack.c.bf16 %v2344_v13, %v2335_v12  ;;  %v4043_v31 = vpack.c.bf16 %v2481_v21, %v2472_v20  ;;  %v2279_v12 = vld [vmem:[#allocation2 + $0x1c48] sm:$0xff]  ;;  %v2288_v13 = vld [vmem:[#allocation2 + $0x1c90] sm:$0xff]  ;;  %v4219_v20 = vpack.c.bf16 %v2415_v15, %v2406_v10  ;;  %v2369_v15 = vld [vmem:[#allocation2 + $0x1f18] sm:$0xff] }
 0x2ae   : > { %v4125_v21 = vpack.c.bf16 %v2288_v13, %v2279_v12  ;;  %v2378_v12 = vld [vmem:[#allocation2 + $0x1f60] sm:$0xff]  ;;  %v2515_v13 = vld [vmem:[#allocation2 + $0x23a8] sm:$0xff] }
 0x2af   : > { %2662 = vmatmul.mubr.f32.vlgmr.msra.gmra.mrb[8].mxu0 %v4486_v33  ;;  %4024 = vmatpush1.bf16.msra.mxu1 %v4023_v32  ;;  %v4203_v32 = vpack.c.bf16 %v2343_v26, %v2334_v22  ;;  %v2278_v22 = vld [vmem:[#allocation2 + $0x1c40] sm:$0xff]  ;;  %v2424_v26 = vld [vmem:[#allocation2 + $0x20d0] sm:$0xff] }
 0x2b0   : > { %4184 = vmatpush1.bf16.msra.mxu0 %v4183_v34  ;;  %2803 = vmatprep.mubr.f32.mxu0 %v4488_v38  ;;  %v4045_v34 = vpack.c.bf16 %v2500_v27, %v2491_v0  ;;  %v2433_v27 = vld [vmem:[#allocation2 + $0x2118] sm:$0xff] }
 0x2b1   : > { %4026 = vmatprep.subr.bf16.mxu1 %v4025_v39  ;;  %4186 = vmatprep.subr.bf16.mxu0 %v4185_v40  ;;  %v4205_v39 = vpack.c.bf16 %v2362_v30, %v2353_v28  ;;  %v2361_v40 = vld [vmem:[#allocation2 + $0x1ed8] sm:$0xff]  ;;  %v2306_v30 = vld [vmem:[#allocation2 + $0x1d20] sm:$0xff] }
 0x2b2   : > { %v4207_v23 = vpack.c.bf16 %v2361_v40, %v2352_v37  ;;  %v2297_v28 = vld [vmem:[#allocation2 + $0x1cd8] sm:$0xff]  ;;  %v2296_v37 = vld [vmem:[#allocation2 + $0x1cd0] sm:$0xff]  ;;  %v2442_v40 = vld [vmem:[#allocation2 + $0x2160] sm:$0xff] }
 0x2b3   : > { %4028 = vmatpush1.bf16.msra.mxu1 %v4027_v44 }
 0x2b4   : > { %4188 = vmatpush1.bf16.msra.mxu0 %v4187_v45  ;;  %4030 = vmatprep.subr.bf16.mxu1 %v4029_v46  ;;  %v4047_v45 = vpack.c.bf16 %v2499_v36, %v2490_v35  ;;  %v4223_v35 = vpack.c.bf16 %v2433_v27, %v2424_v26  ;;  %v4129_v36 = vpack.c.bf16 %v2306_v30, %v2297_v28  ;;  %v2387_v27 = vld [vmem:[#allocation2 + $0x1fa8] sm:$0xff]  ;;  %v2396_v28 = vld [vmem:[#allocation2 + $0x1ff0] sm:$0xff]  ;;  %v2390_v30 = vld [vmem:[#allocation2 + $0x1fc0] sm:$0xff] }
 0x2b5   : > { %4190 = vmatprep.subr.bf16.mxu0 %v4189_v49  ;;  %v2517_v49 = vld [vmem:[#allocation2 + $0x23b8] sm:$0xff] }
 0x2b6   : > { %v4051_v58 = vpack.c.bf16 %v2517_v49, %v2508_v48  ;;  %v2323_v48 = vld [vmem:[#allocation2 + $0x1da8] sm:$0xff]  ;;  %v2460_v49 = vld [vmem:[#allocation2 + $0x21f0] sm:$0xff] }
 0x2b7   : > { %4032 = vmatpush1.bf16.msra.mxu1 %v4031_v55 }
 0x2b8   : > { %4192 = vmatpush1.bf16.msra.mxu0 %v4191_v56  ;;  %4034 = vmatprep.subr.bf16.mxu1 %v4033_v57  ;;  %v2389_v56 = vld [vmem:[#allocation2 + $0x1fb8] sm:$0xff]  ;;  %v2398_v57 = vld [vmem:[#allocation2 + $0x2000] sm:$0xff] }
 0x2b9   : > { %4194 = vmatprep.subr.bf16.mxu0 %v4193_v61  ;;  %v2242_v61 = vld [vmem:[#allocation2 + $0x1b20] sm:$0xff]  ;;  %v4213_v63 = vpack.c.bf16 %v2398_v57, %v2389_v56  ;;  %v2488_v56 = vld [vmem:[#allocation2 + $0x22d0] sm:$0xff] }
 0x2ba   : > { %v4233_v29 = vpack.c.bf16 %v2488_v56, %v2479_v54  ;;  %v2435_v54 = vld [vmem:[#allocation2 + $0x2128] sm:$0xff] }
 0x2bb   : > { %4036 = vmatpush1.bf16.msra.mxu1 %v4035_v3  ;;  %v2270_v3 = vld [vmem:[#allocation2 + $0x1c00] sm:$0xff] }
 0x2bc   : > { %4196 = vmatpush1.bf16.msra.mxu0 %v4195_v4  ;;  %4038 = vmatprep.subr.bf16.mxu1 %v4037_v5  ;;  %v2407_v4 = vld [vmem:[#allocation2 + $0x2048] sm:$0xff]  ;;  %v2416_v5 = vld [vmem:[#allocation2 + $0x2090] sm:$0xff]  ;;  %v4121_v7 = vpack.c.bf16 %v2270_v3, %v2261_v2  ;;  %v2497_v3 = vld [vmem:[#allocation2 + $0x2318] sm:$0xff] }
 0x2bd   : > { %4198 = vmatprep.subr.bf16.mxu0 %v4197_v9  ;;  %v2269_v9 = vld [vmem:[#allocation2 + $0x1bf8] sm:$0xff]  ;;  %v4217_v11 = vpack.c.bf16 %v2416_v5, %v2407_v4  ;;  %v2360_v2 = vld [vmem:[#allocation2 + $0x1ed0] sm:$0xff]  ;;  %v2506_v4 = vld [vmem:[#allocation2 + $0x2360] sm:$0xff] }
 0x2be   : > { %v4237_v10 = vpack.c.bf16 %v2506_v4, %v2497_v3  ;;  %v2453_v3 = vld [vmem:[#allocation2 + $0x21b8] sm:$0xff] }
 0x2bf   : > { %4040 = vmatpush1.bf16.msra.mxu1 %v4039_v16  ;;  %v2425_v16 = vld [vmem:[#allocation2 + $0x20d8] sm:$0xff] }
 0x2c0   : > { %4200 = vmatpush1.bf16.msra.mxu0 %v4199_v18  ;;  %4042 = vmatprep.subr.bf16.mxu1 %v4041_v19  ;;  %v2434_v18 = vld [vmem:[#allocation2 + $0x2120] sm:$0xff]  ;;  %v4123_v19 = vpack.c.bf16 %v2269_v9, %v2260_v8  ;;  %v2359_v8 = vld [vmem:[#allocation2 + $0x1ec8] sm:$0xff]  ;;  %v2496_v9 = vld [vmem:[#allocation2 + $0x2310] sm:$0xff] }
 0x2c1   : > { %4202 = vmatprep.subr.bf16.mxu0 %v4201_v24  ;;  %v2287_v24 = vld [vmem:[#allocation2 + $0x1c88] sm:$0xff]  ;;  %v4221_v0 = vpack.c.bf16 %v2434_v18, %v2425_v16  ;;  %v2524_v16 = vld [vmem:[#allocation2 + $0x23f0] sm:$0xff] }
 0x2c2   : > { %v3052_v25 = vpop.f32.mrb[12].mxu0  ;;  %v4241_v26 = vpack.c.bf16 %v2524_v16, %v2515_v13 }
 0x2c3   : > { %v3053_v44 = vpop.f32.mrb[13].mxu0  ;;  %4044 = vmatpush1.bf16.msra.mxu1 %v4043_v31  ;;  %v2443_v31 = vld [vmem:[#allocation2 + $0x2168] sm:$0xff] }
 0x2c4   : > { %v3054_v46 = vadd.f32 %v3053_v44, %v3052_v25  ;;  %4204 = vmatpush1.bf16.msra.mxu0 %v4203_v32  ;;  %4046 = vmatprep.subr.bf16.mxu1 %v4045_v34  ;;  %v2452_v32 = vld [vmem:[#allocation2 + $0x21b0] sm:$0xff]  ;;  %v4127_v34 = vpack.c.bf16 %v2287_v24, %v2278_v22  ;;  %v2315_v25 = vld [vmem:[#allocation2 + $0x1d68] sm:$0xff]  ;;  %v2470_v44 = vld [vmem:[#allocation2 + $0x2240] sm:$0xff] }
 0x2c5   : > { %4206 = vmatprep.subr.bf16.mxu0 %v4205_v39  ;;  %v2305_v39 = vld [vmem:[#allocation2 + $0x1d18] sm:$0xff]  ;;  %v4225_v41 = vpack.c.bf16 %v2452_v32, %v2443_v31  ;;  %v4229_v50 = vpack.c.bf16 %v2470_v44, %v2461_v17  ;;  %v2514_v24 = vld [vmem:[#allocation2 + $0x23a0] sm:$0xff]  ;;  %v2399_v31 = vld [vmem:[#allocation2 + $0x2008] sm:$0xff] }
 0x2c6   : > { %v4517_v55 = vadd.f32 %v3054_v46, %v4506_v14  ;;  %v4119_v14 = vpack.c.bf16 %v2251_v62, %v2242_v61  ;;  %v4227_v46 = vpack.c.bf16 %v2451_v42, %v2442_v40  ;;  %v2341_v61 = vld [vmem:[#allocation2 + $0x1e38] sm:$0xff]  ;;  %v2478_v62 = vld [vmem:[#allocation2 + $0x2280] sm:$0xff] }
 0x2c7   : > { %4048 = vmatpush1.bf16.msra.mxu1 %v4047_v45  ;;  %v4131_v45 = vpack.c.bf16 %v2305_v39, %v2296_v37  ;;  %v2377_v22 = vld [vmem:[#allocation2 + $0x1f58] sm:$0xff]  ;;  %v2395_v37 = vld [vmem:[#allocation2 + $0x1fe8] sm:$0xff]  ;;  %v4245_v39 = vpack.c.bf16 %v2399_v31, %v2390_v30  ;;  %v2246_v40 = vld [vmem:[#allocation2 + $0x1b40] sm:$0xff] }
 0x2c8   : > { %4208 = vmatpush1.bf16.msra.mxu0 %v4207_v23  ;;  %4050 = vmatprep.subr.bf16.mxu1 %v4049_v47  ;;  %v4133_v23 = vpack.c.bf16 %v2324_v43, %v2315_v25  ;;  %v2314_v47 = vld [vmem:[#allocation2 + $0x1d60] sm:$0xff]  ;;  %v2405_v42 = vld [vmem:[#allocation2 + $0x2038] sm:$0xff]  ;;  %v2408_v43 = vld [vmem:[#allocation2 + $0x2050] sm:$0xff] }
 0x2c9   : > { %4210 = vmatprep.subr.bf16.mxu0 %v4209_v51  ;;  %v2469_v51 = vld [vmem:[#allocation2 + $0x2238] sm:$0xff]  ;;  %v4135_v57 = vpack.c.bf16 %v2323_v48, %v2314_v47  ;;  %v2414_v25 = vld [vmem:[#allocation2 + $0x2080] sm:$0xff]  ;;  %v2264_v47 = vld [vmem:[#allocation2 + $0x1bd0] sm:$0xff] }
 0x2ca   : > { %v2417_v17 = vld [vmem:[#allocation2 + $0x2098] sm:$0xff]  ;;  %v4153_v48 = vpack.c.bf16 %v2414_v25, %v2405_v42  ;;  %v2498_v42 = vld [vmem:[#allocation2 + $0x2320] sm:$0xff]  ;;  %v2507_v25 = vld [vmem:[#allocation2 + $0x2368] sm:$0xff] }
 0x2cb   : > { %4052 = vmatpush1.bf16.msra.mxu1 %v4051_v58  ;;  %v4231_v58 = vpack.c.bf16 %v2469_v51, %v2460_v49  ;;  %v4249_v49 = vpack.c.bf16 %v2417_v17, %v2408_v43  ;;  %v2423_v51 = vld [vmem:[#allocation2 + $0x20c8] sm:$0xff] }
 0x2cc   : > { %4212 = vmatpush1.bf16.msra.mxu0 %v4211_v59  ;;  %4118 = vmatprep.subr.bf16.mxu1 %v4117_v60  ;;  %v4137_v59 = vpack.c.bf16 %v2342_v53, %v2333_v52  ;;  %v2332_v60 = vld [vmem:[#allocation2 + $0x1df0] sm:$0xff]  ;;  %v2426_v53 = vld [vmem:[#allocation2 + $0x20e0] sm:$0xff] }
 0x2cd   : > { %4214 = vmatprep.subr.bf16.mxu0 %v4213_v63  ;;  %v2487_v63 = vld [vmem:[#allocation2 + $0x22c8] sm:$0xff]  ;;  %v4139_v5 = vpack.c.bf16 %v2341_v61, %v2332_v60  ;;  %v2432_v52 = vld [vmem:[#allocation2 + $0x2110] sm:$0xff]  ;;  %v2282_v61 = vld [vmem:[#allocation2 + $0x1c60] sm:$0xff] }
 0x2ce   : > { %2591 = vmatmul.mubr.f32.vlgmr.msra.gmra.mrb[0].mxu1 %v4486_v33  ;;  %v2431_v60 = vld [vmem:[#allocation2 + $0x2108] sm:$0xff] }
 0x2cf   : > { %4120 = vmatpush1.bf16.msra.mxu1 %v4119_v14  ;;  %2732 = vmatprep.mubr.f32.mxu1 %v4488_v38  ;;  %v4235_v14 = vpack.c.bf16 %v2487_v63, %v2478_v62  ;;  %v4253_v62 = vpack.c.bf16 %v2435_v54, %v2426_v53  ;;  %v2441_v63 = vld [vmem:[#allocation2 + $0x2158] sm:$0xff] }
 0x2d0   : > { %4216 = vmatpush1.bf16.msra.mxu0 %v4215_v6  ;;  %4122 = vmatprep.subr.bf16.mxu1 %v4121_v7  ;;  %v4141_v6 = vpack.c.bf16 %v2360_v2, %v2351_v1  ;;  %v2350_v7 = vld [vmem:[#allocation2 + $0x1e80] sm:$0xff]  ;;  %v2444_v2 = vld [vmem:[#allocation2 + $0x2170] sm:$0xff] }
 0x2d1   : > { %4218 = vmatprep.subr.bf16.mxu0 %v4217_v11  ;;  %v2505_v11 = vld [vmem:[#allocation2 + $0x2358] sm:$0xff]  ;;  %v4143_v18 = vpack.c.bf16 %v2359_v8, %v2350_v7  ;;  %v2450_v1 = vld [vmem:[#allocation2 + $0x21a0] sm:$0xff]  ;;  %v2300_v7 = vld [vmem:[#allocation2 + $0x1cf0] sm:$0xff]  ;;  %v4257_v8 = vpack.c.bf16 %v2453_v3, %v2444_v2 }
 0x2d3   : > { %4124 = vmatpush1.bf16.msra.mxu1 %v4123_v19  ;;  %v4239_v19 = vpack.c.bf16 %v2505_v11, %v2496_v9  ;;  %v2309_v9 = vld [vmem:[#allocation2 + $0x1d38] sm:$0xff]  ;;  %v2468_v11 = vld [vmem:[#allocation2 + $0x2230] sm:$0xff] }
 0x2d4   : > { %4220 = vmatpush1.bf16.msra.mxu0 %v4219_v20  ;;  %4126 = vmatprep.subr.bf16.mxu1 %v4125_v21  ;;  %v4145_v20 = vpack.c.bf16 %v2378_v12, %v2369_v15  ;;  %v2368_v21 = vld [vmem:[#allocation2 + $0x1f10] sm:$0xff]  ;;  %v2462_v15 = vld [vmem:[#allocation2 + $0x2200] sm:$0xff]  ;;  %v2471_v12 = vld [vmem:[#allocation2 + $0x2248] sm:$0xff]  ;;  %v4259_v16 = vpack.c.bf16 %v2309_v9, %v2300_v7 }
 0x2d5   : > { %4222 = vmatprep.subr.bf16.mxu0 %v4221_v0  ;;  %v2523_v0 = vld [vmem:[#allocation2 + $0x23e8] sm:$0xff]  ;;  %v4147_v32 = vpack.c.bf16 %v2377_v22, %v2368_v21  ;;  %v2318_v21 = vld [vmem:[#allocation2 + $0x1d80] sm:$0xff]  ;;  %v4261_v22 = vpack.c.bf16 %v2471_v12, %v2462_v15 }
 0x2d7   : > { %4128 = vmatpush1.bf16.msra.mxu1 %v4127_v34  ;;  %v4243_v34 = vpack.c.bf16 %v2523_v0, %v2514_v24  ;;  %v2327_v24 = vld [vmem:[#allocation2 + $0x1dc8] sm:$0xff]  ;;  %v2486_v0 = vld [vmem:[#allocation2 + $0x22c0] sm:$0xff] }
 0x2d8   : > { %4224 = vmatpush1.bf16.msra.mxu0 %v4223_v35  ;;  %4130 = vmatprep.subr.bf16.mxu1 %v4129_v36  ;;  %v4149_v35 = vpack.c.bf16 %v2396_v28, %v2387_v27  ;;  %v2386_v36 = vld [vmem:[#allocation2 + $0x1fa0] sm:$0xff]  ;;  %v2480_v27 = vld [vmem:[#allocation2 + $0x2290] sm:$0xff]  ;;  %v2489_v28 = vld [vmem:[#allocation2 + $0x22d8] sm:$0xff]  ;;  %v4263_v31 = vpack.c.bf16 %v2327_v24, %v2318_v21 }
 0x2d9   : > { %4226 = vmatprep.subr.bf16.mxu0 %v4225_v41  ;;  %v2255_v41 = vld [vmem:[#allocation2 + $0x1b88] sm:$0xff]  ;;  %v4151_v44 = vpack.c.bf16 %v2395_v37, %v2386_v36  ;;  %v2336_v36 = vld [vmem:[#allocation2 + $0x1e10] sm:$0xff]  ;;  %v4265_v37 = vpack.c.bf16 %v2489_v28, %v2480_v27 }
 0x2db   : > { %4132 = vmatpush1.bf16.msra.mxu1 %v4131_v45  ;;  %v4247_v45 = vpack.c.bf16 %v2255_v41, %v2246_v40  ;;  %v2495_v40 = vld [vmem:[#allocation2 + $0x2308] sm:$0xff]  ;;  %v2504_v41 = vld [vmem:[#allocation2 + $0x2350] sm:$0xff] }
 0x2dc   : > { %4228 = vmatpush1.bf16.msra.mxu0 %v4227_v46  ;;  %4134 = vmatprep.subr.bf16.mxu1 %v4133_v23  ;;  %v2404_v46 = vld [vmem:[#allocation2 + $0x2030] sm:$0xff]  ;;  %v2413_v23 = vld [vmem:[#allocation2 + $0x2078] sm:$0xff] }
 0x2dd   : > { %4230 = vmatprep.subr.bf16.mxu0 %v4229_v50  ;;  %v2273_v50 = vld [vmem:[#allocation2 + $0x1c18] sm:$0xff]  ;;  %v4155_v56 = vpack.c.bf16 %v2413_v23, %v2404_v46  ;;  %v2503_v46 = vld [vmem:[#allocation2 + $0x2348] sm:$0xff]  ;;  %v2354_v23 = vld [vmem:[#allocation2 + $0x1ea0] sm:$0xff] }
 0x2df   : > { %4136 = vmatpush1.bf16.msra.mxu1 %v4135_v57  ;;  %v4251_v57 = vpack.c.bf16 %v2273_v50, %v2264_v47  ;;  %v4269_v47 = vpack.c.bf16 %v2507_v25, %v2498_v42  ;;  %v2522_v50 = vld [vmem:[#allocation2 + $0x23e0] sm:$0xff] }
 0x2e0   : > { %4232 = vmatpush1.bf16.msra.mxu0 %v4231_v58  ;;  %4138 = vmatprep.subr.bf16.mxu1 %v4137_v59  ;;  %v4157_v58 = vpack.c.bf16 %v2432_v52, %v2423_v51  ;;  %v2422_v59 = vld [vmem:[#allocation2 + $0x20c0] sm:$0xff]  ;;  %v2516_v51 = vld [vmem:[#allocation2 + $0x23b0] sm:$0xff]  ;;  %v2525_v52 = vld [vmem:[#allocation2 + $0x23f8] sm:$0xff] }
 0x2e1   : > { %4234 = vmatprep.subr.bf16.mxu0 %v4233_v29  ;;  %v2291_v29 = vld [vmem:[#allocation2 + $0x1ca8] sm:$0xff]  ;;  %v4159_v4 = vpack.c.bf16 %v2431_v60, %v2422_v59  ;;  %v4273_v59 = vpack.c.bf16 %v2525_v52, %v2516_v51  ;;  %v2372_v60 = vld [vmem:[#allocation2 + $0x1f30] sm:$0xff] }
 0x2e3   : > { %4140 = vmatpush1.bf16.msra.mxu1 %v4139_v5  ;;  %v4255_v5 = vpack.c.bf16 %v2291_v29, %v2282_v61  ;;  %v2381_v61 = vld [vmem:[#allocation2 + $0x1f78] sm:$0xff] }
 0x2e4   : > { %4236 = vmatpush1.bf16.msra.mxu0 %v4235_v14  ;;  %4142 = vmatprep.subr.bf16.mxu1 %v4141_v6  ;;  %v4161_v14 = vpack.c.bf16 %v2450_v1, %v2441_v63  ;;  %v2449_v6 = vld [vmem:[#allocation2 + $0x2198] sm:$0xff]  ;;  %v4275_v29 = vpack.c.bf16 %v2381_v61, %v2372_v60 }
 0x2e5   : > { %4238 = vmatprep.subr.bf16.mxu0 %v4237_v10  ;;  %v2459_v10 = vld [vmem:[#allocation2 + $0x21e8] sm:$0xff] }
 0x2e7   : > { %4144 = vmatpush1.bf16.msra.mxu1 %v4143_v18  ;;  %v4165_v18 = vpack.c.bf16 %v2468_v11, %v2459_v10 }
 0x2e8   : > { %4240 = vmatpush1.bf16.msra.mxu0 %v4239_v19  ;;  %4146 = vmatprep.subr.bf16.mxu1 %v4145_v20  ;;  %v2458_v19 = vld [vmem:[#allocation2 + $0x21e0] sm:$0xff]  ;;  %v2467_v20 = vld [vmem:[#allocation2 + $0x2228] sm:$0xff] }
 0x2e9   : > { %4242 = vmatprep.subr.bf16.mxu0 %v4241_v26  ;;  %v2477_v26 = vld [vmem:[#allocation2 + $0x2278] sm:$0xff]  ;;  %v4167_v30 = vpack.c.bf16 %v2467_v20, %v2458_v19 }
 0x2eb   : > { %4148 = vmatpush1.bf16.msra.mxu1 %v4147_v32  ;;  %v4169_v32 = vpack.c.bf16 %v2486_v0, %v2477_v26 }
 0x2ec   : > { %4244 = vmatpush1.bf16.msra.mxu0 %v4243_v34  ;;  %4150 = vmatprep.subr.bf16.mxu1 %v4149_v35  ;;  %v2476_v34 = vld [vmem:[#allocation2 + $0x2270] sm:$0xff]  ;;  %v2485_v35 = vld [vmem:[#allocation2 + $0x22b8] sm:$0xff] }
 0x2ed   : > { %4246 = vmatprep.subr.bf16.mxu0 %v4245_v39  ;;  %v2345_v39 = vld [vmem:[#allocation2 + $0x1e58] sm:$0xff]  ;;  %v4171_v43 = vpack.c.bf16 %v2485_v35, %v2476_v34 }
 0x2ee   : > { %v4267_v17 = vpack.c.bf16 %v2345_v39, %v2336_v36 }
 0x2ef   : > { %2804 = vmatmul.mubr.f32.vlgmr.msra.gmra.mrb[10].mxu0 %v4486_v33  ;;  %4152 = vmatpush1.bf16.msra.mxu1 %v4151_v44  ;;  %v4173_v44 = vpack.c.bf16 %v2504_v41, %v2495_v40 }
 0x2f0   : > { %4248 = vmatpush3.bf16.msra.mxu0 %v4247_v45  ;;  %2874 = vmatprep.mubr.f32.mxu0 %v4488_v38  ;;  %v2440_v38 = vld [vmem:[#allocation2 + $0x2150] sm:$0xff]  ;;  %v2494_v45 = vld [vmem:[#allocation2 + $0x2300] sm:$0xff] }
 0x2f1   : > { %4154 = vmatprep.subr.bf16.mxu1 %v4153_v48  ;;  %4250 = vmatprep.subr.bf16.mxu0 %v4249_v49  ;;  %v4163_v13 = vpack.c.bf16 %v2449_v6, %v2440_v38  ;;  %v2363_v48 = vld [vmem:[#allocation2 + $0x1ee8] sm:$0xff]  ;;  %v2513_v49 = vld [vmem:[#allocation2 + $0x2398] sm:$0xff]  ;;  %v4175_v53 = vpack.c.bf16 %v2503_v46, %v2494_v45 }
 0x2f2   : > { %v4271_v54 = vpack.c.bf16 %v2363_v48, %v2354_v23 }
 0x2f3   : > { %4156 = vmatpush1.bf16.msra.mxu1 %v4155_v56  ;;  %v4177_v56 = vpack.c.bf16 %v2522_v50, %v2513_v49 }
 0x2f4   : > { %4252 = vmatpush3.bf16.msra.mxu0 %v4251_v57  ;;  %4158 = vmatprep.subr.bf16.mxu1 %v4157_v58  ;;  %v2512_v57 = vld [vmem:[#allocation2 + $0x2390] sm:$0xff]  ;;  %v2521_v58 = vld [vmem:[#allocation2 + $0x23d8] sm:$0xff] }
 0x2f5   : > { %4254 = vmatprep.subr.bf16.mxu0 %v4253_v62  ;;  %v4179_v62 = vpack.c.bf16 %v2521_v58, %v2512_v57 }
 0x2f7   : > { %4160 = vmatpush1.bf16.msra.mxu1 %v4159_v4 }
 0x2f8   : > { %4256 = vmatpush3.bf16.msra.mxu0 %v4255_v5  ;;  %4162 = vmatprep.subr.bf16.mxu1 %v4161_v14 }
 0x2f9   : > { %4258 = vmatprep.subr.bf16.mxu0 %v4257_v8 }
 0x2fb   : > { %4164 = vmatpush1.bf16.msra.mxu1 %v4163_v13 }
 0x2fc   : > { %4260 = vmatpush3.bf16.msra.mxu0 %v4259_v16  ;;  %4166 = vmatprep.subr.bf16.mxu1 %v4165_v18 }
 0x2fd   : > { %4262 = vmatprep.subr.bf16.mxu0 %v4261_v22 }
 0x2ff   : > { %4168 = vmatpush1.bf16.msra.mxu1 %v4167_v30 }
 0x300   : > { %4264 = vmatpush3.bf16.msra.mxu0 %v4263_v31  ;;  %4170 = vmatprep.subr.bf16.mxu1 %v4169_v32 }
 0x301   : > { %4266 = vmatprep.subr.bf16.mxu0 %v4265_v37 }
 0x303   : > { %4172 = vmatpush1.bf16.msra.mxu1 %v4171_v43 }
 0x304   : > { %4268 = vmatpush3.bf16.msra.mxu0 %v4267_v17  ;;  %4174 = vmatprep.subr.bf16.mxu1 %v4173_v44 }
 0x305   : > { %4270 = vmatprep.subr.bf16.mxu0 %v4269_v47 }
 0x307   : > { %4176 = vmatpush1.bf16.msra.mxu1 %v4175_v53 }
 0x308   : > { %4272 = vmatpush3.bf16.msra.mxu0 %v4271_v54  ;;  %4178 = vmatprep.subr.bf16.mxu1 %v4177_v56 }
 0x309   : > { %4274 = vmatprep.subr.bf16.mxu0 %v4273_v59 }
 0x30b   : > { %4180 = vmatpush1.bf16.msra.mxu1 %v4179_v62 }
 0x30c   : > { %4276 = vmatpush3.bf16.msra.mxu0 %v4275_v29 }
 0x30e   : > { %2733 = vmatmul.mubr.f32.vlgmr.msra.gmra.mrb[2].mxu1 %v4486_v33 }
 0x30f   : > { %2875 = vmatmul.mubr.f32.vlgmr.msra.gmra.mrb[14].mxu0 %v4486_v33 }
 0x361   : > { %v3087_v63 = vpop.f32.mrb[6].mxu1 }
 0x362   : > { %v3088_v1 = vpop.f32.mrb[7].mxu1 }
 0x363   : > { %v3089_v2 = vadd.f32 %v3088_v1, %v3087_v63 }
 0x365   : > { %v2236_v3 = vadd.f32 %v3089_v2, %v4517_v55 }
 0x382   : > { %v2663_v4 = vpop.f32.mrb[8].mxu0 }
 0x383   : > { %2891 = vst [vmem:[%s185_s20 + $0x10] sm:$0xff] %v2663_v4  ;;  %v2665_v5 = vpop.f32.mrb[9].mxu0 }
 0x384   : > { %2892 = vst [vmem:[%s185_s20 + $0x18] sm:$0xff] %v2665_v5 }
 0x3a1   : > { %v2592_v14 = vpop.f32.mrb[0].mxu1 }
 0x3a2   : > { %2889 = vst [vmem:[%s185_s20] sm:$0xff] %v2592_v14  ;;  %v2594_v38 = vpop.f32.mrb[1].mxu1 }
 0x3a3   : > { %2890 = vst [vmem:[%s185_s20 + $0x8] sm:$0xff] %v2594_v38 }
 0x3c2   : > { %v2805_v6 = vpop.f32.mrb[10].mxu0 }
 0x3c3   : > { %2895 = vst [vmem:[%s185_s20 + $0x30] sm:$0xff] %v2805_v6  ;;  %v2807_v33 = vpop.f32.mrb[11].mxu0 }
 0x3c4   : > { %2896 = vst [vmem:[%s185_s20 + $0x38] sm:$0xff] %v2807_v33 }
 0x3e1   : > { %v2734_v7 = vpop.f32.mrb[2].mxu1 }
 0x3e2   : > { %2893 = vst [vmem:[%s185_s20 + $0x20] sm:$0xff] %v2734_v7  ;;  %v3122_v55 = vpop.f32.mrb[14].mxu0  ;;  %v2736_v8 = vpop.f32.mrb[3].mxu1 }
 0x3e3   : > { %2894 = vst [vmem:[%s185_s20 + $0x28] sm:$0xff] %v2736_v8  ;;  %v3123_v9 = vpop.f32.mrb[15].mxu0 }
 0x3e4   : > { %v3124_v10 = vadd.f32 %v3123_v9, %v3122_v55 }
 0x3e6   : > { %v2888_v11 = vadd.f32 %v3124_v10, %v2236_v3 }
 0x3e8   : > { %2898 = vst.msk [vmem:[%s185_s20 + $0x40] sm:$0xff] %vm2897_vm2, %v2888_v11 }
 0x3e9 PF: > { %s14_s12 = sadd.s32 1, %s4363_s12  }
 0x3ea   : > { %p11_p3 = scmp.ge.s32.totalorder %s14_s12, 4  }
 0x3ec   :  { %13 = sbr.rel (!%p11_p3) target bundleno = 1 (0x1), region = 70 }
 0x3f3   :  { %2920 = vsyncpa [#allocation3], 1 }
 0x3f4   :  { %2922 = vsyncpa [#allocation3 + $0x1], 1 }

</bundles_post_ra>
